<compile_context>
chip_gen: v6e
topology: v6e:2x2x1
jax: 0.10.0
libtpu: 0.0.40
codegen_flags: <defaults>
</compile_context>

<pallas_src>
import functools

import jax
import jax.numpy as jnp
from jax import lax
from jax.experimental import pallas as pl
from jax.experimental.pallas import tpu as pltpu

block_size = 48
n_embd = 72


def _head_kernel(x_ref, w_ref, o_ref, k_s, q_s, v_s, *, use_bf16):
    # x_ref: (Bt, T, C)   w_ref: (3, C, H) = [Wk, Wq * C**-0.5, Wv]   o_ref: (Bt, T, H)
    Bt, T, C = x_ref.shape
    H = o_ref.shape[-1]

    mm_dtype = jnp.bfloat16 if use_bf16 else jnp.float32

    x = x_ref[...].astype(mm_dtype)          # (Bt, T, C)
    # Leading-axis indexing of the stacked weight: no lane-offset slicing.
    wk = w_ref[0].astype(mm_dtype)           # (C, H)
    wq = w_ref[1].astype(mm_dtype)           # scale already folded into these columns
    wv = w_ref[2].astype(mm_dtype)

    # Fused tall projections: one (Bt*T, C) @ (C, H) matmul per weight.
    if T % 8 == 0:
        x2d = x.reshape(Bt * T, C)

        def _proj(w):
            return jnp.dot(x2d, w, preferred_element_type=jnp.float32).reshape(Bt, T, H)
    else:
        # Fallback when T is not sublane-aligned (reshape would force a relayout).
        def _proj(w):
            return jnp.einsum('btc,ch->bth', x, w, preferred_element_type=jnp.float32)

    k_s[...] = _proj(wk)
    q_s[...] = _proj(wq)
    v_s[...] = _proj(wv)

    # Causal mask: computed once per grid step, reused for every batch element.
    row = lax.broadcasted_iota(jnp.int32, (T, T), 0)
    col = lax.broadcasted_iota(jnp.int32, (T, T), 1)
    causal = col <= row
    # Note: every row keeps its diagonal unmasked, so max-subtract below never sees
    # a fully masked (-inf) row.

    def _attend(b, carry):
        q = q_s[b].astype(mm_dtype)          # (T, H)
        k = k_s[b].astype(mm_dtype)          # (T, H)
        v = v_s[b].astype(mm_dtype)          # (T, H)

        # QK^T: contract H of both operands (no explicit transposed copy in source).
        wei = lax.dot_general(q, k, (((1,), (1,)), ((), ())),
                              preferred_element_type=jnp.float32)       # (T, T)
        wei = jnp.where(causal, wei, -jnp.inf)

        # Numerically stable softmax over the last axis (exact divide, f32).
        wei = wei - jnp.max(wei, axis=-1, keepdims=True)
        p = jnp.exp(wei)
        p = p / jnp.sum(p, axis=-1, keepdims=True)

        # dropout(p=0.0) == identity (no-op by construction)
        out_b = jnp.dot(p.astype(mm_dtype), v,
                        preferred_element_type=jnp.float32)             # (T, H)

        # TODO(synk): output last dim is H=16 (< 128 lanes) -> masked stores; a
        # lane-dense output needs multi-head fusion, which would change this
        # single-head module's interface.
        o_ref[b] = out_b.astype(o_ref.dtype)
        return carry

    # Short fixed trip count: fully unrolled so the LLO scheduler sees straight-line
    # code, while only one batch element's (T, T) scores are data-dependent-live.
    lax.fori_loop(0, Bt, _attend, 0, unroll=True)


def _device_kind():
    try:
        return jax.devices()[0].device_kind.lower()
    except Exception:
        return ""


def _default_grid_steps(batch):
    """1 grid step on single-TC chips (v5e/v6e); 2 parallel steps on dual-TC v7x."""
    kind = _device_kind()
    if ("v7" in kind or "7x" in kind) and batch % 2 == 0:
        return 2
    return 1


def _use_bf16_matmuls():
    """bf16 matmul operands only on v5e (bf16-native MXU, f32 matmuls ~3x passes)."""
    kind = _device_kind()
    return ("v5e" in kind) or ("v5 lite" in kind) or ("v5lite" in kind)


def head_forward(x, wk, wq, wv, *, num_grid_steps=None, use_bf16=None):
    """x: (B, T, C) float32; wk/wq/wv: (C, H).  Returns (B, T, H)."""
    B, T, C = x.shape
    H = wk.shape[1]
    assert T <= block_size, "sequence length must not exceed block_size"

    if num_grid_steps is None:
        num_grid_steps = _default_grid_steps(B)
    if B % num_grid_steps != 0:
        num_grid_steps = 1
    bt = B // num_grid_steps

    if use_bf16 is None:
        use_bf16 = _use_bf16_matmuls()

    # Fold the 1/sqrt(C) softmax scale into the query weight (scales a tiny (C, H)
    # weight once, constant-folds under jit) and stack [Wk, Wq, Wv] on a new leading
    # axis so the kernel never lane-slices a fused projection output.
    w = jnp.stack([wk, wq * (C ** -0.5), wv], axis=0)                  # (3, C, H)

    flops = 2 * B * T * C * 3 * H + 4 * B * T * T * H
    bytes_accessed = 4 * (B * T * C + B * T * H + 3 * C * H)
    transcendentals = B * T * T

    kernel = functools.partial(_head_kernel, use_bf16=use_bf16)

    return pl.pallas_call(
        kernel,
        out_shape=jax.ShapeDtypeStruct((B, T, H), x.dtype),
        grid_spec=pltpu.PrefetchScalarGridSpec(
            num_scalar_prefetch=0,
            grid=(num_grid_steps,),
            in_specs=[
                pl.BlockSpec((bt, T, C), lambda i: (i, 0, 0)),
                pl.BlockSpec((3, C, H), lambda i: (0, 0, 0)),
            ],
            out_specs=pl.BlockSpec((bt, T, H), lambda i: (i, 0, 0)),
            scratch_shapes=[
                pltpu.VMEM((bt, T, H), jnp.float32),   # k
                pltpu.VMEM((bt, T, H), jnp.float32),   # q
                pltpu.VMEM((bt, T, H), jnp.float32),   # v
            ],
        ),
        compiler_params=pltpu.CompilerParams(
            dimension_semantics=("parallel",),
        ),
        cost_estimate=pl.CostEstimate(
            flops=flops,
            transcendentals=transcendentals,
            bytes_accessed=bytes_accessed,
        ),
    )(x, w)


def _reference(x, wk, wq, wv):
    B, T, C = x.shape
    k = x @ wk
    q = x @ wq
    v = x @ wv
    wei = (q @ jnp.swapaxes(k, -2, -1)) * (C ** -0.5)
    mask = jnp.tril(jnp.ones((T, T), dtype=bool))
    wei = jnp.where(mask[None, :, :], wei, -jnp.inf)
    wei = jax.nn.softmax(wei, axis=-1)
    return wei @ v


if __name__ == "__main__":
    key = jax.random.PRNGKey(0)
    B, T, C, head_size = 8, block_size, n_embd, 16   # T=48, C=72

    kx, kk, kq, kv = jax.random.split(key, 4)
    x = jax.random.normal(kx, (B, T, C), dtype=jnp.float32)
    # deterministic weight init (synthetic, not a checkpoint load)
    wk = jax.random.normal(kk, (C, head_size), dtype=jnp.float32) * (C ** -0.5)
    wq = jax.random.normal(kq, (C, head_size), dtype=jnp.float32) * (C ** -0.5)
    wv = jax.random.normal(kv, (C, head_size), dtype=jnp.float32) * (C ** -0.5)

    use_bf16 = _use_bf16_matmuls()
    out = head_forward(x, wk, wq, wv, use_bf16=use_bf16)
    out = jax.block_until_ready(out)

    ref = _reference(x, wk, wq, wv)
    assert out.shape == (B, T, head_size)
    # f32 path: exact softmax + f32 matmuls -> tight tolerance.
    # bf16 path (v5e only): bf16 matmul operands with f32 accumulation -> looser.
    tol = 3e-2 if use_bf16 else 1e-4
    assert jnp.allclose(out, ref, atol=tol, rtol=tol), "mismatch vs reference"

    print("KERNEL_OK")
</pallas_src>

<mosaic_0001>
module attributes {stable_mosaic.version = 11 : i64} {
  func.func @_head_kernel(%arg0: i32, %arg1: memref<8x48x72xf32, #tpu.memory_space<vmem>>, %arg2: memref<3x72x16xf32, #tpu.memory_space<vmem>>, %arg3: memref<8x48x16xf32, #tpu.memory_space<vmem>>, %arg4: memref<8x48x16xf32, #tpu.memory_space<vmem>>, %arg5: memref<8x48x16xf32, #tpu.memory_space<vmem>>, %arg6: memref<8x48x16xf32, #tpu.memory_space<vmem>>) attributes {dimension_semantics = [#tpu.dimension_semantics<parallel>], iteration_bounds = array<i64: 1>, scalar_prefetch = 0 : i64, scratch_operands = 3 : i64, tpu.core_type = #tpu.core_type<tc>, window_params = [{transform_indices = @transform_0, window_bounds = array<i64: 8, 48, 72>}, {pipeline_mode = #tpu.pipeline_mode<synchronous>, transform_indices = @transform_1, window_bounds = array<i64: 3, 72, 16>}, {transform_indices = @transform_2, window_bounds = array<i64: 8, 48, 16>}]} {
    %c0 = arith.constant 0 : index
    %c0_0 = arith.constant 0 : index
    %c0_1 = arith.constant 0 : index
    %0 = vector.load %arg1[%c0, %c0_0, %c0_1] : memref<8x48x72xf32, #tpu.memory_space<vmem>>, vector<8x48x72xf32>
    %c0_2 = arith.constant 0 : index
    %c0_3 = arith.constant 0 : index
    %c0_4 = arith.constant 0 : index
    %1 = vector.load %arg2[%c0_2, %c0_3, %c0_4] : memref<3x72x16xf32, #tpu.memory_space<vmem>>, vector<1x72x16xf32>
    %2 = vector.shape_cast %1 : vector<1x72x16xf32> to vector<72x16xf32>
    %c1 = arith.constant 1 : index
    %c0_5 = arith.constant 0 : index
    %c0_6 = arith.constant 0 : index
    %3 = vector.load %arg2[%c1, %c0_5, %c0_6] : memref<3x72x16xf32, #tpu.memory_space<vmem>>, vector<1x72x16xf32>
    %4 = vector.shape_cast %3 : vector<1x72x16xf32> to vector<72x16xf32>
    %c2 = arith.constant 2 : index
    %c0_7 = arith.constant 0 : index
    %c0_8 = arith.constant 0 : index
    %5 = vector.load %arg2[%c2, %c0_7, %c0_8] : memref<3x72x16xf32, #tpu.memory_space<vmem>>, vector<1x72x16xf32>
    %6 = vector.shape_cast %5 : vector<1x72x16xf32> to vector<72x16xf32>
    %7 = vector.shape_cast %0 : vector<8x48x72xf32> to vector<384x72xf32>
    %cst = arith.constant dense<0.000000e+00> : vector<384x16xf32>
    %8 = tpu.matmul %7, %2, %cst {dimension_numbers = #tpu.dot_dimension_numbers<[1], [0], [0], [1], [0, 0, 1, 1], [], []>} : vector<384x72xf32>, vector<72x16xf32>, vector<384x16xf32> -> vector<384x16xf32>
    %9 = vector.shape_cast %8 : vector<384x16xf32> to vector<8x48x16xf32>
    %c0_9 = arith.constant 0 : index
    %c0_10 = arith.constant 0 : index
    %c0_11 = arith.constant 0 : index
    %10 = vector.load %arg4[%c0_9, %c0_10, %c0_11] : memref<8x48x16xf32, #tpu.memory_space<vmem>>, vector<8x48x16xf32>
    tpu.vector_store %arg4[%c0_9, %c0_10, %c0_11], %9 {strides = array<i32>} : memref<8x48x16xf32, #tpu.memory_space<vmem>>, vector<8x48x16xf32>,
    %cst_12 = arith.constant dense<0.000000e+00> : vector<384x16xf32>
    %11 = tpu.matmul %7, %4, %cst_12 {dimension_numbers = #tpu.dot_dimension_numbers<[1], [0], [0], [1], [0, 0, 1, 1], [], []>} : vector<384x72xf32>, vector<72x16xf32>, vector<384x16xf32> -> vector<384x16xf32>
    %12 = vector.shape_cast %11 : vector<384x16xf32> to vector<8x48x16xf32>
    %c0_13 = arith.constant 0 : index
    %c0_14 = arith.constant 0 : index
    %c0_15 = arith.constant 0 : index
    %13 = vector.load %arg5[%c0_13, %c0_14, %c0_15] : memref<8x48x16xf32, #tpu.memory_space<vmem>>, vector<8x48x16xf32>
    tpu.vector_store %arg5[%c0_13, %c0_14, %c0_15], %12 {strides = array<i32>} : memref<8x48x16xf32, #tpu.memory_space<vmem>>, vector<8x48x16xf32>,
    %cst_16 = arith.constant dense<0.000000e+00> : vector<384x16xf32>
    %14 = tpu.matmul %7, %6, %cst_16 {dimension_numbers = #tpu.dot_dimension_numbers<[1], [0], [0], [1], [0, 0, 1, 1], [], []>} : vector<384x72xf32>, vector<72x16xf32>, vector<384x16xf32> -> vector<384x16xf32>
    %15 = vector.shape_cast %14 : vector<384x16xf32> to vector<8x48x16xf32>
    %c0_17 = arith.constant 0 : index
    %c0_18 = arith.constant 0 : index
    %c0_19 = arith.constant 0 : index
    %16 = vector.load %arg6[%c0_17, %c0_18, %c0_19] : memref<8x48x16xf32, #tpu.memory_space<vmem>>, vector<8x48x16xf32>
    tpu.vector_store %arg6[%c0_17, %c0_18, %c0_19], %15 {strides = array<i32>} : memref<8x48x16xf32, #tpu.memory_space<vmem>>, vector<8x48x16xf32>,
    %17 = tpu.iota {dimensions = array<i32: 0>} : vector<48x48xi32>
    %18 = tpu.iota {dimensions = array<i32: 1>} : vector<48x48xi32>
    %19 = arith.cmpi sle, %18, %17 : vector<48x48xi32>
    %c0_i32 = arith.constant 0 : i32
    %20 = arith.index_cast %c0_i32 : i32 to index
    %c0_20 = arith.constant 0 : index
    %c0_21 = arith.constant 0 : index
    %21 = vector.load %arg5[%20, %c0_20, %c0_21] : memref<8x48x16xf32, #tpu.memory_space<vmem>>, vector<1x48x16xf32>
    %22 = vector.shape_cast %21 : vector<1x48x16xf32> to vector<48x16xf32>
    %23 = arith.index_cast %c0_i32 : i32 to index
    %c0_22 = arith.constant 0 : index
    %c0_23 = arith.constant 0 : index
    %24 = vector.load %arg4[%23, %c0_22, %c0_23] : memref<8x48x16xf32, #tpu.memory_space<vmem>>, vector<1x48x16xf32>
    %25 = vector.shape_cast %24 : vector<1x48x16xf32> to vector<48x16xf32>
    %26 = arith.index_cast %c0_i32 : i32 to index
    %c0_24 = arith.constant 0 : index
    %c0_25 = arith.constant 0 : index
    %27 = vector.load %arg6[%26, %c0_24, %c0_25] : memref<8x48x16xf32, #tpu.memory_space<vmem>>, vector<1x48x16xf32>
    %28 = vector.shape_cast %27 : vector<1x48x16xf32> to vector<48x16xf32>
    %cst_26 = arith.constant dense<0.000000e+00> : vector<48x48xf32>
    %29 = tpu.matmul %22, %25, %cst_26 {dimension_numbers = #tpu.dot_dimension_numbers<[1], [1], [0], [0], [0, 0, 1, 0], [], []>} : vector<48x16xf32>, vector<48x16xf32>, vector<48x48xf32> -> vector<48x48xf32>
    %cst_27 = arith.constant 0xFF800000 : f32
    %30 = vector.broadcast %cst_27 : f32 to vector<48x48xf32>
    %31 = arith.select %19, %29, %30 : vector<48x48xi1>, vector<48x48xf32>
    %cst_28 = arith.constant dense<0xFF800000> : vector<48xf32>
    %32 = vector.multi_reduction <maximumf>, %31, %cst_28 [1] : vector<48x48xf32> to vector<48xf32>
    %33 = vector.shape_cast %32 : vector<48xf32> to vector<48x1xf32>
    %34 = vector.broadcast %33 : vector<48x1xf32> to vector<48x48xf32>
    %35 = arith.subf %31, %34 : vector<48x48xf32>
    %36 = math.exp %35 : vector<48x48xf32>
    %cst_29 = arith.constant dense<0.000000e+00> : vector<48xf32>
    %37 = vector.multi_reduction <add>, %36, %cst_29 [1] : vector<48x48xf32> to vector<48xf32>
    %38 = vector.shape_cast %37 : vector<48xf32> to vector<48x1xf32>
    %39 = vector.broadcast %38 : vector<48x1xf32> to vector<48x48xf32>
    %40 = arith.divf %36, %39 : vector<48x48xf32>
    %cst_30 = arith.constant dense<0.000000e+00> : vector<48x16xf32>
    %41 = tpu.matmul %40, %28, %cst_30 {dimension_numbers = #tpu.dot_dimension_numbers<[1], [0], [0], [1], [0, 0, 1, 1], [], []>} : vector<48x48xf32>, vector<48x16xf32>, vector<48x16xf32> -> vector<48x16xf32>
    %42 = arith.index_cast %c0_i32 : i32 to index
    %c0_31 = arith.constant 0 : index
    %c0_32 = arith.constant 0 : index
    %43 = vector.load %arg3[%42, %c0_31, %c0_32] : memref<8x48x16xf32, #tpu.memory_space<vmem>>, vector<1x48x16xf32>
    %44 = vector.shape_cast %43 : vector<1x48x16xf32> to vector<48x16xf32>
    %45 = vector.shape_cast %41 : vector<48x16xf32> to vector<1x48x16xf32>
    tpu.vector_store %arg3[%42, %c0_31, %c0_32], %45 {strides = array<i32>} : memref<8x48x16xf32, #tpu.memory_space<vmem>>, vector<1x48x16xf32>,
    %c1_i32 = arith.constant 1 : i32
    %46 = arith.index_cast %c1_i32 : i32 to index
    %c0_33 = arith.constant 0 : index
    %c0_34 = arith.constant 0 : index
    %47 = vector.load %arg5[%46, %c0_33, %c0_34] : memref<8x48x16xf32, #tpu.memory_space<vmem>>, vector<1x48x16xf32>
    %48 = vector.shape_cast %47 : vector<1x48x16xf32> to vector<48x16xf32>
    %49 = arith.index_cast %c1_i32 : i32 to index
    %c0_35 = arith.constant 0 : index
    %c0_36 = arith.constant 0 : index
    %50 = vector.load %arg4[%49, %c0_35, %c0_36] : memref<8x48x16xf32, #tpu.memory_space<vmem>>, vector<1x48x16xf32>
    %51 = vector.shape_cast %50 : vector<1x48x16xf32> to vector<48x16xf32>
    %52 = arith.index_cast %c1_i32 : i32 to index
    %c0_37 = arith.constant 0 : index
    %c0_38 = arith.constant 0 : index
    %53 = vector.load %arg6[%52, %c0_37, %c0_38] : memref<8x48x16xf32, #tpu.memory_space<vmem>>, vector<1x48x16xf32>
    %54 = vector.shape_cast %53 : vector<1x48x16xf32> to vector<48x16xf32>
    %cst_39 = arith.constant dense<0.000000e+00> : vector<48x48xf32>
    %55 = tpu.matmul %48, %51, %cst_39 {dimension_numbers = #tpu.dot_dimension_numbers<[1], [1], [0], [0], [0, 0, 1, 0], [], []>} : vector<48x16xf32>, vector<48x16xf32>, vector<48x48xf32> -> vector<48x48xf32>
    %cst_40 = arith.constant 0xFF800000 : f32
    %56 = vector.broadcast %cst_40 : f32 to vector<48x48xf32>
    %57 = arith.select %19, %55, %56 : vector<48x48xi1>, vector<48x48xf32>
    %cst_41 = arith.constant dense<0xFF800000> : vector<48xf32>
    %58 = vector.multi_reduction <maximumf>, %57, %cst_41 [1] : vector<48x48xf32> to vector<48xf32>
    %59 = vector.shape_cast %58 : vector<48xf32> to vector<48x1xf32>
    %60 = vector.broadcast %59 : vector<48x1xf32> to vector<48x48xf32>
    %61 = arith.subf %57, %60 : vector<48x48xf32>
    %62 = math.exp %61 : vector<48x48xf32>
    %cst_42 = arith.constant dense<0.000000e+00> : vector<48xf32>
    %63 = vector.multi_reduction <add>, %62, %cst_42 [1] : vector<48x48xf32> to vector<48xf32>
    %64 = vector.shape_cast %63 : vector<48xf32> to vector<48x1xf32>
    %65 = vector.broadcast %64 : vector<48x1xf32> to vector<48x48xf32>
    %66 = arith.divf %62, %65 : vector<48x48xf32>
    %cst_43 = arith.constant dense<0.000000e+00> : vector<48x16xf32>
    %67 = tpu.matmul %66, %54, %cst_43 {dimension_numbers = #tpu.dot_dimension_numbers<[1], [0], [0], [1], [0, 0, 1, 1], [], []>} : vector<48x48xf32>, vector<48x16xf32>, vector<48x16xf32> -> vector<48x16xf32>
    %68 = arith.index_cast %c1_i32 : i32 to index
    %c0_44 = arith.constant 0 : index
    %c0_45 = arith.constant 0 : index
    %69 = vector.load %arg3[%68, %c0_44, %c0_45] : memref<8x48x16xf32, #tpu.memory_space<vmem>>, vector<1x48x16xf32>
    %70 = vector.shape_cast %69 : vector<1x48x16xf32> to vector<48x16xf32>
    %71 = vector.shape_cast %67 : vector<48x16xf32> to vector<1x48x16xf32>
    tpu.vector_store %arg3[%68, %c0_44, %c0_45], %71 {strides = array<i32>} : memref<8x48x16xf32, #tpu.memory_space<vmem>>, vector<1x48x16xf32>,
    %c2_i32 = arith.constant 2 : i32
    %72 = arith.index_cast %c2_i32 : i32 to index
    %c0_46 = arith.constant 0 : index
    %c0_47 = arith.constant 0 : index
    %73 = vector.load %arg5[%72, %c0_46, %c0_47] : memref<8x48x16xf32, #tpu.memory_space<vmem>>, vector<1x48x16xf32>
    %74 = vector.shape_cast %73 : vector<1x48x16xf32> to vector<48x16xf32>
    %75 = arith.index_cast %c2_i32 : i32 to index
    %c0_48 = arith.constant 0 : index
    %c0_49 = arith.constant 0 : index
    %76 = vector.load %arg4[%75, %c0_48, %c0_49] : memref<8x48x16xf32, #tpu.memory_space<vmem>>, vector<1x48x16xf32>
    %77 = vector.shape_cast %76 : vector<1x48x16xf32> to vector<48x16xf32>
    %78 = arith.index_cast %c2_i32 : i32 to index
    %c0_50 = arith.constant 0 : index
    %c0_51 = arith.constant 0 : index
    %79 = vector.load %arg6[%78, %c0_50, %c0_51] : memref<8x48x16xf32, #tpu.memory_space<vmem>>, vector<1x48x16xf32>
    %80 = vector.shape_cast %79 : vector<1x48x16xf32> to vector<48x16xf32>
    %cst_52 = arith.constant dense<0.000000e+00> : vector<48x48xf32>
    %81 = tpu.matmul %74, %77, %cst_52 {dimension_numbers = #tpu.dot_dimension_numbers<[1], [1], [0], [0], [0, 0, 1, 0], [], []>} : vector<48x16xf32>, vector<48x16xf32>, vector<48x48xf32> -> vector<48x48xf32>
    %cst_53 = arith.constant 0xFF800000 : f32
    %82 = vector.broadcast %cst_53 : f32 to vector<48x48xf32>
    %83 = arith.select %19, %81, %82 : vector<48x48xi1>, vector<48x48xf32>
    %cst_54 = arith.constant dense<0xFF800000> : vector<48xf32>
    %84 = vector.multi_reduction <maximumf>, %83, %cst_54 [1] : vector<48x48xf32> to vector<48xf32>
    %85 = vector.shape_cast %84 : vector<48xf32> to vector<48x1xf32>
    %86 = vector.broadcast %85 : vector<48x1xf32> to vector<48x48xf32>
    %87 = arith.subf %83, %86 : vector<48x48xf32>
    %88 = math.exp %87 : vector<48x48xf32>
    %cst_55 = arith.constant dense<0.000000e+00> : vector<48xf32>
    %89 = vector.multi_reduction <add>, %88, %cst_55 [1] : vector<48x48xf32> to vector<48xf32>
    %90 = vector.shape_cast %89 : vector<48xf32> to vector<48x1xf32>
    %91 = vector.broadcast %90 : vector<48x1xf32> to vector<48x48xf32>
    %92 = arith.divf %88, %91 : vector<48x48xf32>
    %cst_56 = arith.constant dense<0.000000e+00> : vector<48x16xf32>
    %93 = tpu.matmul %92, %80, %cst_56 {dimension_numbers = #tpu.dot_dimension_numbers<[1], [0], [0], [1], [0, 0, 1, 1], [], []>} : vector<48x48xf32>, vector<48x16xf32>, vector<48x16xf32> -> vector<48x16xf32>
    %94 = arith.index_cast %c2_i32 : i32 to index
    %c0_57 = arith.constant 0 : index
    %c0_58 = arith.constant 0 : index
    %95 = vector.load %arg3[%94, %c0_57, %c0_58] : memref<8x48x16xf32, #tpu.memory_space<vmem>>, vector<1x48x16xf32>
    %96 = vector.shape_cast %95 : vector<1x48x16xf32> to vector<48x16xf32>
    %97 = vector.shape_cast %93 : vector<48x16xf32> to vector<1x48x16xf32>
    tpu.vector_store %arg3[%94, %c0_57, %c0_58], %97 {strides = array<i32>} : memref<8x48x16xf32, #tpu.memory_space<vmem>>, vector<1x48x16xf32>,
    %c3_i32 = arith.constant 3 : i32
    %98 = arith.index_cast %c3_i32 : i32 to index
    %c0_59 = arith.constant 0 : index
    %c0_60 = arith.constant 0 : index
    %99 = vector.load %arg5[%98, %c0_59, %c0_60] : memref<8x48x16xf32, #tpu.memory_space<vmem>>, vector<1x48x16xf32>
    %100 = vector.shape_cast %99 : vector<1x48x16xf32> to vector<48x16xf32>
    %101 = arith.index_cast %c3_i32 : i32 to index
    %c0_61 = arith.constant 0 : index
    %c0_62 = arith.constant 0 : index
    %102 = vector.load %arg4[%101, %c0_61, %c0_62] : memref<8x48x16xf32, #tpu.memory_space<vmem>>, vector<1x48x16xf32>
    %103 = vector.shape_cast %102 : vector<1x48x16xf32> to vector<48x16xf32>
    %104 = arith.index_cast %c3_i32 : i32 to index
    %c0_63 = arith.constant 0 : index
    %c0_64 = arith.constant 0 : index
    %105 = vector.load %arg6[%104, %c0_63, %c0_64] : memref<8x48x16xf32, #tpu.memory_space<vmem>>, vector<1x48x16xf32>
    %106 = vector.shape_cast %105 : vector<1x48x16xf32> to vector<48x16xf32>
    %cst_65 = arith.constant dense<0.000000e+00> : vector<48x48xf32>
    %107 = tpu.matmul %100, %103, %cst_65 {dimension_numbers = #tpu.dot_dimension_numbers<[1], [1], [0], [0], [0, 0, 1, 0], [], []>} : vector<48x16xf32>, vector<48x16xf32>, vector<48x48xf32> -> vector<48x48xf32>
    %cst_66 = arith.constant 0xFF800000 : f32
    %108 = vector.broadcast %cst_66 : f32 to vector<48x48xf32>
    %109 = arith.select %19, %107, %108 : vector<48x48xi1>, vector<48x48xf32>
    %cst_67 = arith.constant dense<0xFF800000> : vector<48xf32>
    %110 = vector.multi_reduction <maximumf>, %109, %cst_67 [1] : vector<48x48xf32> to vector<48xf32>
    %111 = vector.shape_cast %110 : vector<48xf32> to vector<48x1xf32>
    %112 = vector.broadcast %111 : vector<48x1xf32> to vector<48x48xf32>
    %113 = arith.subf %109, %112 : vector<48x48xf32>
    %114 = math.exp %113 : vector<48x48xf32>
    %cst_68 = arith.constant dense<0.000000e+00> : vector<48xf32>
    %115 = vector.multi_reduction <add>, %114, %cst_68 [1] : vector<48x48xf32> to vector<48xf32>
    %116 = vector.shape_cast %115 : vector<48xf32> to vector<48x1xf32>
    %117 = vector.broadcast %116 : vector<48x1xf32> to vector<48x48xf32>
    %118 = arith.divf %114, %117 : vector<48x48xf32>
    %cst_69 = arith.constant dense<0.000000e+00> : vector<48x16xf32>
    %119 = tpu.matmul %118, %106, %cst_69 {dimension_numbers = #tpu.dot_dimension_numbers<[1], [0], [0], [1], [0, 0, 1, 1], [], []>} : vector<48x48xf32>, vector<48x16xf32>, vector<48x16xf32> -> vector<48x16xf32>
    %120 = arith.index_cast %c3_i32 : i32 to index
    %c0_70 = arith.constant 0 : index
    %c0_71 = arith.constant 0 : index
    %121 = vector.load %arg3[%120, %c0_70, %c0_71] : memref<8x48x16xf32, #tpu.memory_space<vmem>>, vector<1x48x16xf32>
    %122 = vector.shape_cast %121 : vector<1x48x16xf32> to vector<48x16xf32>
    %123 = vector.shape_cast %119 : vector<48x16xf32> to vector<1x48x16xf32>
    tpu.vector_store %arg3[%120, %c0_70, %c0_71], %123 {strides = array<i32>} : memref<8x48x16xf32, #tpu.memory_space<vmem>>, vector<1x48x16xf32>,
    %c4_i32 = arith.constant 4 : i32
    %124 = arith.index_cast %c4_i32 : i32 to index
    %c0_72 = arith.constant 0 : index
    %c0_73 = arith.constant 0 : index
    %125 = vector.load %arg5[%124, %c0_72, %c0_73] : memref<8x48x16xf32, #tpu.memory_space<vmem>>, vector<1x48x16xf32>
    %126 = vector.shape_cast %125 : vector<1x48x16xf32> to vector<48x16xf32>
    %127 = arith.index_cast %c4_i32 : i32 to index
    %c0_74 = arith.constant 0 : index
    %c0_75 = arith.constant 0 : index
    %128 = vector.load %arg4[%127, %c0_74, %c0_75] : memref<8x48x16xf32, #tpu.memory_space<vmem>>, vector<1x48x16xf32>
    %129 = vector.shape_cast %128 : vector<1x48x16xf32> to vector<48x16xf32>
    %130 = arith.index_cast %c4_i32 : i32 to index
    %c0_76 = arith.constant 0 : index
    %c0_77 = arith.constant 0 : index
    %131 = vector.load %arg6[%130, %c0_76, %c0_77] : memref<8x48x16xf32, #tpu.memory_space<vmem>>, vector<1x48x16xf32>
    %132 = vector.shape_cast %131 : vector<1x48x16xf32> to vector<48x16xf32>
    %cst_78 = arith.constant dense<0.000000e+00> : vector<48x48xf32>
    %133 = tpu.matmul %126, %129, %cst_78 {dimension_numbers = #tpu.dot_dimension_numbers<[1], [1], [0], [0], [0, 0, 1, 0], [], []>} : vector<48x16xf32>, vector<48x16xf32>, vector<48x48xf32> -> vector<48x48xf32>
    %cst_79 = arith.constant 0xFF800000 : f32
    %134 = vector.broadcast %cst_79 : f32 to vector<48x48xf32>
    %135 = arith.select %19, %133, %134 : vector<48x48xi1>, vector<48x48xf32>
    %cst_80 = arith.constant dense<0xFF800000> : vector<48xf32>
    %136 = vector.multi_reduction <maximumf>, %135, %cst_80 [1] : vector<48x48xf32> to vector<48xf32>
    %137 = vector.shape_cast %136 : vector<48xf32> to vector<48x1xf32>
    %138 = vector.broadcast %137 : vector<48x1xf32> to vector<48x48xf32>
    %139 = arith.subf %135, %138 : vector<48x48xf32>
    %140 = math.exp %139 : vector<48x48xf32>
    %cst_81 = arith.constant dense<0.000000e+00> : vector<48xf32>
    %141 = vector.multi_reduction <add>, %140, %cst_81 [1] : vector<48x48xf32> to vector<48xf32>
    %142 = vector.shape_cast %141 : vector<48xf32> to vector<48x1xf32>
    %143 = vector.broadcast %142 : vector<48x1xf32> to vector<48x48xf32>
    %144 = arith.divf %140, %143 : vector<48x48xf32>
    %cst_82 = arith.constant dense<0.000000e+00> : vector<48x16xf32>
    %145 = tpu.matmul %144, %132, %cst_82 {dimension_numbers = #tpu.dot_dimension_numbers<[1], [0], [0], [1], [0, 0, 1, 1], [], []>} : vector<48x48xf32>, vector<48x16xf32>, vector<48x16xf32> -> vector<48x16xf32>
    %146 = arith.index_cast %c4_i32 : i32 to index
    %c0_83 = arith.constant 0 : index
    %c0_84 = arith.constant 0 : index
    %147 = vector.load %arg3[%146, %c0_83, %c0_84] : memref<8x48x16xf32, #tpu.memory_space<vmem>>, vector<1x48x16xf32>
    %148 = vector.shape_cast %147 : vector<1x48x16xf32> to vector<48x16xf32>
    %149 = vector.shape_cast %145 : vector<48x16xf32> to vector<1x48x16xf32>
    tpu.vector_store %arg3[%146, %c0_83, %c0_84], %149 {strides = array<i32>} : memref<8x48x16xf32, #tpu.memory_space<vmem>>, vector<1x48x16xf32>,
    %c5_i32 = arith.constant 5 : i32
    %150 = arith.index_cast %c5_i32 : i32 to index
    %c0_85 = arith.constant 0 : index
    %c0_86 = arith.constant 0 : index
    %151 = vector.load %arg5[%150, %c0_85, %c0_86] : memref<8x48x16xf32, #tpu.memory_space<vmem>>, vector<1x48x16xf32>
    %152 = vector.shape_cast %151 : vector<1x48x16xf32> to vector<48x16xf32>
    %153 = arith.index_cast %c5_i32 : i32 to index
    %c0_87 = arith.constant 0 : index
    %c0_88 = arith.constant 0 : index
    %154 = vector.load %arg4[%153, %c0_87, %c0_88] : memref<8x48x16xf32, #tpu.memory_space<vmem>>, vector<1x48x16xf32>
    %155 = vector.shape_cast %154 : vector<1x48x16xf32> to vector<48x16xf32>
    %156 = arith.index_cast %c5_i32 : i32 to index
    %c0_89 = arith.constant 0 : index
    %c0_90 = arith.constant 0 : index
    %157 = vector.load %arg6[%156, %c0_89, %c0_90] : memref<8x48x16xf32, #tpu.memory_space<vmem>>, vector<1x48x16xf32>
    %158 = vector.shape_cast %157 : vector<1x48x16xf32> to vector<48x16xf32>
    %cst_91 = arith.constant dense<0.000000e+00> : vector<48x48xf32>
    %159 = tpu.matmul %152, %155, %cst_91 {dimension_numbers = #tpu.dot_dimension_numbers<[1], [1], [0], [0], [0, 0, 1, 0], [], []>} : vector<48x16xf32>, vector<48x16xf32>, vector<48x48xf32> -> vector<48x48xf32>
    %cst_92 = arith.constant 0xFF800000 : f32
    %160 = vector.broadcast %cst_92 : f32 to vector<48x48xf32>
    %161 = arith.select %19, %159, %160 : vector<48x48xi1>, vector<48x48xf32>
    %cst_93 = arith.constant dense<0xFF800000> : vector<48xf32>
    %162 = vector.multi_reduction <maximumf>, %161, %cst_93 [1] : vector<48x48xf32> to vector<48xf32>
    %163 = vector.shape_cast %162 : vector<48xf32> to vector<48x1xf32>
    %164 = vector.broadcast %163 : vector<48x1xf32> to vector<48x48xf32>
    %165 = arith.subf %161, %164 : vector<48x48xf32>
    %166 = math.exp %165 : vector<48x48xf32>
    %cst_94 = arith.constant dense<0.000000e+00> : vector<48xf32>
    %167 = vector.multi_reduction <add>, %166, %cst_94 [1] : vector<48x48xf32> to vector<48xf32>
    %168 = vector.shape_cast %167 : vector<48xf32> to vector<48x1xf32>
    %169 = vector.broadcast %168 : vector<48x1xf32> to vector<48x48xf32>
    %170 = arith.divf %166, %169 : vector<48x48xf32>
    %cst_95 = arith.constant dense<0.000000e+00> : vector<48x16xf32>
    %171 = tpu.matmul %170, %158, %cst_95 {dimension_numbers = #tpu.dot_dimension_numbers<[1], [0], [0], [1], [0, 0, 1, 1], [], []>} : vector<48x48xf32>, vector<48x16xf32>, vector<48x16xf32> -> vector<48x16xf32>
    %172 = arith.index_cast %c5_i32 : i32 to index
    %c0_96 = arith.constant 0 : index
    %c0_97 = arith.constant 0 : index
    %173 = vector.load %arg3[%172, %c0_96, %c0_97] : memref<8x48x16xf32, #tpu.memory_space<vmem>>, vector<1x48x16xf32>
    %174 = vector.shape_cast %173 : vector<1x48x16xf32> to vector<48x16xf32>
    %175 = vector.shape_cast %171 : vector<48x16xf32> to vector<1x48x16xf32>
    tpu.vector_store %arg3[%172, %c0_96, %c0_97], %175 {strides = array<i32>} : memref<8x48x16xf32, #tpu.memory_space<vmem>>, vector<1x48x16xf32>,
    %c6_i32 = arith.constant 6 : i32
    %176 = arith.index_cast %c6_i32 : i32 to index
    %c0_98 = arith.constant 0 : index
    %c0_99 = arith.constant 0 : index
    %177 = vector.load %arg5[%176, %c0_98, %c0_99] : memref<8x48x16xf32, #tpu.memory_space<vmem>>, vector<1x48x16xf32>
    %178 = vector.shape_cast %177 : vector<1x48x16xf32> to vector<48x16xf32>
    %179 = arith.index_cast %c6_i32 : i32 to index
    %c0_100 = arith.constant 0 : index
    %c0_101 = arith.constant 0 : index
    %180 = vector.load %arg4[%179, %c0_100, %c0_101] : memref<8x48x16xf32, #tpu.memory_space<vmem>>, vector<1x48x16xf32>
    %181 = vector.shape_cast %180 : vector<1x48x16xf32> to vector<48x16xf32>
    %182 = arith.index_cast %c6_i32 : i32 to index
    %c0_102 = arith.constant 0 : index
    %c0_103 = arith.constant 0 : index
    %183 = vector.load %arg6[%182, %c0_102, %c0_103] : memref<8x48x16xf32, #tpu.memory_space<vmem>>, vector<1x48x16xf32>
    %184 = vector.shape_cast %183 : vector<1x48x16xf32> to vector<48x16xf32>
    %cst_104 = arith.constant dense<0.000000e+00> : vector<48x48xf32>
    %185 = tpu.matmul %178, %181, %cst_104 {dimension_numbers = #tpu.dot_dimension_numbers<[1], [1], [0], [0], [0, 0, 1, 0], [], []>} : vector<48x16xf32>, vector<48x16xf32>, vector<48x48xf32> -> vector<48x48xf32>
    %cst_105 = arith.constant 0xFF800000 : f32
    %186 = vector.broadcast %cst_105 : f32 to vector<48x48xf32>
    %187 = arith.select %19, %185, %186 : vector<48x48xi1>, vector<48x48xf32>
    %cst_106 = arith.constant dense<0xFF800000> : vector<48xf32>
    %188 = vector.multi_reduction <maximumf>, %187, %cst_106 [1] : vector<48x48xf32> to vector<48xf32>
    %189 = vector.shape_cast %188 : vector<48xf32> to vector<48x1xf32>
    %190 = vector.broadcast %189 : vector<48x1xf32> to vector<48x48xf32>
    %191 = arith.subf %187, %190 : vector<48x48xf32>
    %192 = math.exp %191 : vector<48x48xf32>
    %cst_107 = arith.constant dense<0.000000e+00> : vector<48xf32>
    %193 = vector.multi_reduction <add>, %192, %cst_107 [1] : vector<48x48xf32> to vector<48xf32>
    %194 = vector.shape_cast %193 : vector<48xf32> to vector<48x1xf32>
    %195 = vector.broadcast %194 : vector<48x1xf32> to vector<48x48xf32>
    %196 = arith.divf %192, %195 : vector<48x48xf32>
    %cst_108 = arith.constant dense<0.000000e+00> : vector<48x16xf32>
    %197 = tpu.matmul %196, %184, %cst_108 {dimension_numbers = #tpu.dot_dimension_numbers<[1], [0], [0], [1], [0, 0, 1, 1], [], []>} : vector<48x48xf32>, vector<48x16xf32>, vector<48x16xf32> -> vector<48x16xf32>
    %198 = arith.index_cast %c6_i32 : i32 to index
    %c0_109 = arith.constant 0 : index
    %c0_110 = arith.constant 0 : index
    %199 = vector.load %arg3[%198, %c0_109, %c0_110] : memref<8x48x16xf32, #tpu.memory_space<vmem>>, vector<1x48x16xf32>
    %200 = vector.shape_cast %199 : vector<1x48x16xf32> to vector<48x16xf32>
    %201 = vector.shape_cast %197 : vector<48x16xf32> to vector<1x48x16xf32>
    tpu.vector_store %arg3[%198, %c0_109, %c0_110], %201 {strides = array<i32>} : memref<8x48x16xf32, #tpu.memory_space<vmem>>, vector<1x48x16xf32>,
    %c7_i32 = arith.constant 7 : i32
    %202 = arith.index_cast %c7_i32 : i32 to index
    %c0_111 = arith.constant 0 : index
    %c0_112 = arith.constant 0 : index
    %203 = vector.load %arg5[%202, %c0_111, %c0_112] : memref<8x48x16xf32, #tpu.memory_space<vmem>>, vector<1x48x16xf32>
    %204 = vector.shape_cast %203 : vector<1x48x16xf32> to vector<48x16xf32>
    %205 = arith.index_cast %c7_i32 : i32 to index
    %c0_113 = arith.constant 0 : index
    %c0_114 = arith.constant 0 : index
    %206 = vector.load %arg4[%205, %c0_113, %c0_114] : memref<8x48x16xf32, #tpu.memory_space<vmem>>, vector<1x48x16xf32>
    %207 = vector.shape_cast %206 : vector<1x48x16xf32> to vector<48x16xf32>
    %208 = arith.index_cast %c7_i32 : i32 to index
    %c0_115 = arith.constant 0 : index
    %c0_116 = arith.constant 0 : index
    %209 = vector.load %arg6[%208, %c0_115, %c0_116] : memref<8x48x16xf32, #tpu.memory_space<vmem>>, vector<1x48x16xf32>
    %210 = vector.shape_cast %209 : vector<1x48x16xf32> to vector<48x16xf32>
    %cst_117 = arith.constant dense<0.000000e+00> : vector<48x48xf32>
    %211 = tpu.matmul %204, %207, %cst_117 {dimension_numbers = #tpu.dot_dimension_numbers<[1], [1], [0], [0], [0, 0, 1, 0], [], []>} : vector<48x16xf32>, vector<48x16xf32>, vector<48x48xf32> -> vector<48x48xf32>
    %cst_118 = arith.constant 0xFF800000 : f32
    %212 = vector.broadcast %cst_118 : f32 to vector<48x48xf32>
    %213 = arith.select %19, %211, %212 : vector<48x48xi1>, vector<48x48xf32>
    %cst_119 = arith.constant dense<0xFF800000> : vector<48xf32>
    %214 = vector.multi_reduction <maximumf>, %213, %cst_119 [1] : vector<48x48xf32> to vector<48xf32>
    %215 = vector.shape_cast %214 : vector<48xf32> to vector<48x1xf32>
    %216 = vector.broadcast %215 : vector<48x1xf32> to vector<48x48xf32>
    %217 = arith.subf %213, %216 : vector<48x48xf32>
    %218 = math.exp %217 : vector<48x48xf32>
    %cst_120 = arith.constant dense<0.000000e+00> : vector<48xf32>
    %219 = vector.multi_reduction <add>, %218, %cst_120 [1] : vector<48x48xf32> to vector<48xf32>
    %220 = vector.shape_cast %219 : vector<48xf32> to vector<48x1xf32>
    %221 = vector.broadcast %220 : vector<48x1xf32> to vector<48x48xf32>
    %222 = arith.divf %218, %221 : vector<48x48xf32>
    %cst_121 = arith.constant dense<0.000000e+00> : vector<48x16xf32>
    %223 = tpu.matmul %222, %210, %cst_121 {dimension_numbers = #tpu.dot_dimension_numbers<[1], [0], [0], [1], [0, 0, 1, 1], [], []>} : vector<48x48xf32>, vector<48x16xf32>, vector<48x16xf32> -> vector<48x16xf32>
    %224 = arith.index_cast %c7_i32 : i32 to index
    %c0_122 = arith.constant 0 : index
    %c0_123 = arith.constant 0 : index
    %225 = vector.load %arg3[%224, %c0_122, %c0_123] : memref<8x48x16xf32, #tpu.memory_space<vmem>>, vector<1x48x16xf32>
    %226 = vector.shape_cast %225 : vector<1x48x16xf32> to vector<48x16xf32>
    %227 = vector.shape_cast %223 : vector<48x16xf32> to vector<1x48x16xf32>
    tpu.vector_store %arg3[%224, %c0_122, %c0_123], %227 {strides = array<i32>} : memref<8x48x16xf32, #tpu.memory_space<vmem>>, vector<1x48x16xf32>,
    %c8_i32 = arith.constant 8 : i32
    return
  }
  func.func @transform_0(%arg0: i32) -> (i32, i32, i32) {
    %c0_i32 = arith.constant 0 : i32
    %c0_i32_0 = arith.constant 0 : i32
    %c0_i32_1 = arith.constant 0 : i32
    return %arg0, %c0_i32, %c0_i32_0 : i32, i32, i32
  }
  func.func @transform_1(%arg0: i32) -> (i32, i32, i32) {
    %c0_i32 = arith.constant 0 : i32
    %c0_i32_0 = arith.constant 0 : i32
    %c0_i32_1 = arith.constant 0 : i32
    %c0_i32_2 = arith.constant 0 : i32
    return %c0_i32, %c0_i32_0, %c0_i32_1 : i32, i32, i32
  }
  func.func @transform_2(%arg0: i32) -> (i32, i32, i32) {
    %c0_i32 = arith.constant 0 : i32
    %c0_i32_0 = arith.constant 0 : i32
    %c0_i32_1 = arith.constant 0 : i32
    return %arg0, %c0_i32, %c0_i32_0 : i32, i32, i32
  }
}

</mosaic_0001>

<bundles_post_ra>
// kernel: tpu_custom_call.1
= control target key start
LH: loop header
LB: loop body
LE: loop exit
PB: predicated region body
PF: predicated region fallthrough
CT: control target
= control target key end

     0   :  { %7 = vsyncpa [#allocation6], 0  ;;  %s5611_s9 = smov [#allocation5]   ;;  %s7013_s0 = inlined_call_operand.hbm [shape: f32[8,48,72], index: 0, kind: input, shape index: {}]   ;;  %s7014_s1 = inlined_call_operand.vmem [shape: f32[3,72,16], index: 1, kind: input, shape index: {}]   ;;  %s7015_s2 = inlined_call_operand.vmem [shape: f32[8,48,16], index: 2, kind: output, shape index: {}]  }
   0x1   :  { %s13_s10 = sshll.u32 %s5611_s9, 4  ;;  %s14_s10 = int_to_ptr.vmem [resolvable:$true] %s13_s10 }
   0x2   :  { %s5597_s11 = scalar_lea.vmem %s14_s10, 6144  ;;  %p5602_p1 = scmp.lt.s32.totalorder %s14_s10, %s14_s10 }
   0x3   :  { %p5598_p0 = scmp.ne.s32.totalorder %s14_s10, %s5597_s11  ;;  %p5603_p2 = scmp.lt.s32.totalorder %s5597_s11, %s5597_s11 }
   0x5   :  { %p5604_p3 = por %p5603_p2, %p5602_p1 }
   0x7   :  { %p5605_p4 = pnand %p5604_p3, %p5598_p0 }
   0x9   :  { %5608 = shalt.err (!%p5605_p4)
}
   0xa   :  { %s5612_s12 = smov 128   ;;  %s5613_s13 = smov 8  }
   0xb   :  { %19 = dma.hbm_to_vmem [thread:$0]  %s7013_s0, 6144, %s14_s10, [#allocation6], %s5612_s12, %s5612_s12, %s5613_s13  }
   0xc   :  { %5609 = dma.done.wait [#allocation6], 6144  }
   0xd   :  { %5610 = vsyncadd [#allocation6], 4294961152  ;;  %v81_v0 = vld [vmem:[%s7014_s1 + $0x40] sm:$0xff]  ;;  %v80_v1 = vld [vmem:[%s7014_s1 + $0x38] sm:$0xff]  ;;  %vm102_vm0 = vcmask 588800   ;;  %vm552_vm1 = vcmask 130048  }
   0xe   :  { %4787 = vmatprep.subr.mxu0 %v81_v0  ;;  %v79_v2 = vld [vmem:[%s7014_s1 + $0x30] sm:$0xff]  ;;  %v5641_v3 = vld [vmem:[#allocation5] sm:$0xff]  ;;  %v78_v4 = vld [vmem:[%s7014_s1 + $0x28] sm:$0xff]  ;;  %vm1477_vm5 = vcmask 392192  }
   0xf   :  { %4788 = vmatpush3.msra.mxu0 %v81_v0  ;;  %4805 = vmatprep.mubr.msk.f32.mxu0 %vm102_vm0, %v5641_v3  ;;  %v4084_v5 = vld [vmem:[%s7014_s1 + $0x88] sm:$0xff]  ;;  %v4083_v6 = vld [vmem:[%s7014_s1 + $0x80] sm:$0xff]  ;;  %v4082_v8 = vld [vmem:[%s7014_s1 + $0x78] sm:$0xff] }
  0x10   :  { %4789 = vmatprep.subr.mxu0 %v80_v1  ;;  %4895 = vmatprep.mubr.msk.f32.mxu1 %vm102_vm0, %v5641_v3  ;;  %v77_v7 = vld [vmem:[%s7014_s1 + $0x20] sm:$0xff]  ;;  %v76_v9 = vld [vmem:[%s7014_s1 + $0x18] sm:$0xff]  ;;  %v4081_v10 = vld [vmem:[%s7014_s1 + $0x70] sm:$0xff] }
  0x11   :  { %4790 = vmatpush3.msra.mxu0 %v80_v1  ;;  %4877 = vmatprep.subr.mxu1 %v4084_v5  ;;  %v75_v11 = vld [vmem:[%s7014_s1 + $0x10] sm:$0xff]  ;;  %v4080_v12 = vld [vmem:[%s7014_s1 + $0x68] sm:$0xff]  ;;  %v4079_v14 = vld [vmem:[%s7014_s1 + $0x60] sm:$0xff] }
  0x12   :  { %4791 = vmatprep.subr.mxu0 %v79_v2  ;;  %4878 = vmatpush3.msra.mxu1 %v4084_v5  ;;  %v74_v13 = vld [vmem:[%s7014_s1 + $0x8] sm:$0xff]  ;;  %v73_v15 = vld [vmem:[%s7014_s1] sm:$0xff]  ;;  %v4078_v16 = vld [vmem:[%s7014_s1 + $0x58] sm:$0xff] }
  0x13   :  { %4792 = vmatpush3.msra.mxu0 %v79_v2  ;;  %4879 = vmatprep.subr.mxu1 %v4083_v6  ;;  %v5686_v17 = vld [vmem:[#allocation5 + $0x8] sm:$0xff]  ;;  %v5688_v18 = vld [vmem:[#allocation5 + $0x10] sm:$0xff]  ;;  %v5700_v21 = vld [vmem:[#allocation5 + $0x18] sm:$0xff] }
  0x14   :  { %4793 = vmatprep.subr.mxu0 %v78_v4  ;;  %4880 = vmatpush3.msra.mxu1 %v4083_v6  ;;  %v4077_v19 = vld [vmem:[%s7014_s1 + $0x50] sm:$0xff]  ;;  %v4076_v20 = vld [vmem:[%s7014_s1 + $0x48] sm:$0xff]  ;;  %v5702_v22 = vld [vmem:[#allocation5 + $0x20] sm:$0xff] }
  0x15   :  { %4794 = vmatpush3.msra.mxu0 %v78_v4  ;;  %4881 = vmatprep.subr.mxu1 %v4082_v8  ;;  %v5708_v23 = vld [vmem:[#allocation5 + $0x28] sm:$0xff]  ;;  %v5714_v24 = vld [vmem:[#allocation5 + $0x30] sm:$0xff]  ;;  %v5720_v25 = vld [vmem:[#allocation5 + $0x38] sm:$0xff] }
  0x16   :  { %4795 = vmatprep.subr.mxu0 %v77_v7  ;;  %4882 = vmatpush3.msra.mxu1 %v4082_v8  ;;  %v5726_v26 = vld [vmem:[#allocation5 + $0x40] sm:$0xff]  ;;  %v5732_v27 = vld [vmem:[#allocation5 + $0x48] sm:$0xff]  ;;  %v5738_v28 = vld [vmem:[#allocation5 + $0x50] sm:$0xff] }
  0x17   :  { %4796 = vmatpush3.msra.mxu0 %v77_v7  ;;  %4883 = vmatprep.subr.mxu1 %v4081_v10  ;;  %v5744_v29 = vld [vmem:[#allocation5 + $0x58] sm:$0xff]  ;;  %v5750_v30 = vld [vmem:[#allocation5 + $0x60] sm:$0xff]  ;;  %v5756_v31 = vld [vmem:[#allocation5 + $0x68] sm:$0xff] }
  0x18   :  { %4797 = vmatprep.subr.mxu0 %v76_v9  ;;  %4884 = vmatpush3.msra.mxu1 %v4081_v10  ;;  %v5762_v32 = vld [vmem:[#allocation5 + $0x70] sm:$0xff]  ;;  %v5768_v33 = vld [vmem:[#allocation5 + $0x78] sm:$0xff]  ;;  %v5774_v34 = vld [vmem:[#allocation5 + $0x80] sm:$0xff] }
  0x19   :  { %4798 = vmatpush3.msra.mxu0 %v76_v9  ;;  %4885 = vmatprep.subr.mxu1 %v4080_v12  ;;  %v5780_v35 = vld [vmem:[#allocation5 + $0x88] sm:$0xff]  ;;  %v5786_v36 = vld [vmem:[#allocation5 + $0x90] sm:$0xff]  ;;  %v5792_v37 = vld [vmem:[#allocation5 + $0x98] sm:$0xff] }
  0x1a   :  { %4799 = vmatprep.subr.mxu0 %v75_v11  ;;  %4886 = vmatpush3.msra.mxu1 %v4080_v12  ;;  %v5798_v38 = vld [vmem:[#allocation5 + $0xa0] sm:$0xff]  ;;  %v5804_v39 = vld [vmem:[#allocation5 + $0xa8] sm:$0xff]  ;;  %v5810_v40 = vld [vmem:[#allocation5 + $0xb0] sm:$0xff] }
  0x1b   :  { %4800 = vmatpush3.msra.mxu0 %v75_v11  ;;  %4887 = vmatprep.subr.mxu1 %v4079_v14  ;;  %v5816_v41 = vld [vmem:[#allocation5 + $0xb8] sm:$0xff]  ;;  %v5822_v42 = vld [vmem:[#allocation5 + $0xc0] sm:$0xff]  ;;  %v5828_v43 = vld [vmem:[#allocation5 + $0xc8] sm:$0xff] }
  0x1c   :  { %4801 = vmatprep.subr.mxu0 %v74_v13  ;;  %4888 = vmatpush3.msra.mxu1 %v4079_v14  ;;  %v5834_v44 = vld [vmem:[#allocation5 + $0xd0] sm:$0xff]  ;;  %v5840_v45 = vld [vmem:[#allocation5 + $0xd8] sm:$0xff]  ;;  %v5846_v46 = vld [vmem:[#allocation5 + $0xe0] sm:$0xff] }
  0x1d   :  { %4802 = vmatpush3.msra.mxu0 %v74_v13  ;;  %4889 = vmatprep.subr.mxu1 %v4078_v16  ;;  %v5852_v47 = vld [vmem:[#allocation5 + $0xe8] sm:$0xff]  ;;  %v5866_v48 = vld [vmem:[#allocation5 + $0xf0] sm:$0xff]  ;;  %v5870_v49 = vld [vmem:[#allocation5 + $0xf8] sm:$0xff] }
  0x1e   :  { %4803 = vmatprep.subr.mxu0 %v73_v15  ;;  %4890 = vmatpush3.msra.mxu1 %v4078_v16  ;;  %v5878_v50 = vld [vmem:[#allocation5 + $0x100] sm:$0xff]  ;;  %v5882_v51 = vld [vmem:[#allocation5 + $0x108] sm:$0xff]  ;;  %v5890_v52 = vld [vmem:[#allocation5 + $0x110] sm:$0xff] }
  0x1f   :  { %4804 = vmatpush3.msra.mxu0 %v73_v15  ;;  %4891 = vmatprep.subr.mxu1 %v4077_v19  ;;  %v5894_v53 = vld [vmem:[#allocation5 + $0x118] sm:$0xff]  ;;  %v5900_v54 = vld [vmem:[#allocation5 + $0x120] sm:$0xff]  ;;  %v5906_v55 = vld [vmem:[#allocation5 + $0x128] sm:$0xff] }
  0x20   :  { %4806 = vmatmul.mubr.msk.f32.vlgmr.msra.gmra.mxu0 %vm102_vm0, %v5686_v17  ;;  %4892 = vmatpush3.msra.mxu1 %v4077_v19  ;;  %v5914_v56 = vld [vmem:[#allocation5 + $0x130] sm:$0xff]  ;;  %v5918_v57 = vld [vmem:[#allocation5 + $0x138] sm:$0xff]  ;;  %v5926_v58 = vld [vmem:[#allocation5 + $0x140] sm:$0xff] }
  0x21   :  { %4808 = vmatprep.mubr.msk.f32.mxu0 %vm102_vm0, %v5688_v18  ;;  %4893 = vmatprep.subr.mxu1 %v4076_v20  ;;  %v5930_v59 = vld [vmem:[#allocation5 + $0x148] sm:$0xff]  ;;  %v5938_v60 = vld [vmem:[#allocation5 + $0x150] sm:$0xff]  ;;  %v5942_v61 = vld [vmem:[#allocation5 + $0x158] sm:$0xff] }
  0x22   :  { %4894 = vmatpush3.msra.mxu1 %v4076_v20  ;;  %v5950_v62 = vld [vmem:[#allocation5 + $0x160] sm:$0xff]  ;;  %v5954_v63 = vld [vmem:[#allocation5 + $0x168] sm:$0xff]  ;;  %v5962_v0 = vld [vmem:[#allocation5 + $0x170] sm:$0xff] }
  0x23   :  { %4896 = vmatmul.mubr.msk.f32.vlgmr.msra.gmra.mxu1 %vm102_vm0, %v5686_v17  ;;  %v5966_v1 = vld [vmem:[#allocation5 + $0x178] sm:$0xff]  ;;  %v4093_v2 = vld [vmem:[%s7014_s1 + $0xd0] sm:$0xff]  ;;  %v4092_v4 = vld [vmem:[%s7014_s1 + $0xc8] sm:$0xff] }
  0x24   :  { %4809 = vmatmul.mubr.msk.f32.gmra.mxu0 %vm102_vm0, %v5700_v21  ;;  %4898 = vmatprep.mubr.msk.f32.mxu1 %vm102_vm0, %v5688_v18  ;;  %v4091_v5 = vld [vmem:[%s7014_s1 + $0xc0] sm:$0xff]  ;;  %v4089_v6 = vld [vmem:[%s7014_s1 + $0xb0] sm:$0xff]  ;;  %v4088_v7 = vld [vmem:[%s7014_s1 + $0xa8] sm:$0xff] }
  0x25   :  { %4811 = vmatprep.mubr.msk.f32.mxu0 %vm102_vm0, %v5702_v22  ;;  %4967 = vmatprep.subr.mxu0 %v4093_v2  ;;  %v4087_v8 = vld [vmem:[%s7014_s1 + $0xa0] sm:$0xff]  ;;  %v4086_v9 = vld [vmem:[%s7014_s1 + $0x98] sm:$0xff]  ;;  %v4085_v10 = vld [vmem:[%s7014_s1 + $0x90] sm:$0xff] }
  0x26   :  { %4968 = vmatpush3.msra.mxu0 %v4093_v2 }
  0x27   :  { %4899 = vmatmul.mubr.msk.f32.gmra.mxu1 %vm102_vm0, %v5700_v21  ;;  %4969 = vmatprep.subr.mxu0 %v4092_v4 }
  0x28   :  { %4812 = vmatmul.mubr.msk.f32.gmra.mxu0 %vm102_vm0, %v5708_v23  ;;  %4901 = vmatprep.mubr.msk.f32.mxu1 %vm102_vm0, %v5702_v22 }
  0x29   :  { %4814 = vmatprep.mubr.msk.f32.mxu0 %vm102_vm0, %v5714_v24  ;;  %4970 = vmatpush3.msra.mxu0 %v4092_v4 }
  0x2a   :  { %4971 = vmatprep.subr.mxu0 %v4091_v5 }
  0x2b   :  { %4902 = vmatmul.mubr.msk.f32.gmra.mxu1 %vm102_vm0, %v5708_v23  ;;  %4972 = vmatpush3.msra.mxu0 %v4091_v5 }
  0x2c   :  { %4815 = vmatmul.mubr.msk.f32.gmra.mxu0 %vm102_vm0, %v5720_v25  ;;  %4904 = vmatprep.mubr.msk.f32.mxu1 %vm102_vm0, %v5714_v24 }
  0x2d   :  { %4817 = vmatprep.mubr.msk.f32.mxu0 %vm102_vm0, %v5726_v26 }
  0x2f   :  { %4905 = vmatmul.mubr.msk.f32.gmra.mxu1 %vm102_vm0, %v5720_v25 }
  0x30   :  { %4818 = vmatmul.mubr.msk.f32.gmra.mxu0 %vm102_vm0, %v5732_v27  ;;  %4907 = vmatprep.mubr.msk.f32.mxu1 %vm102_vm0, %v5726_v26 }
  0x31   :  { %4820 = vmatprep.mubr.msk.f32.mxu0 %vm102_vm0, %v5738_v28 }
  0x33   :  { %4908 = vmatmul.mubr.msk.f32.gmra.mxu1 %vm102_vm0, %v5732_v27 }
  0x34   :  { %4821 = vmatmul.mubr.msk.f32.gmra.mxu0 %vm102_vm0, %v5744_v29  ;;  %4910 = vmatprep.mubr.msk.f32.mxu1 %vm102_vm0, %v5738_v28 }
  0x35   :  { %4823 = vmatprep.mubr.msk.f32.mxu0 %vm102_vm0, %v5750_v30 }
  0x37   :  { %4911 = vmatmul.mubr.msk.f32.gmra.mxu1 %vm102_vm0, %v5744_v29 }
  0x38   :  { %4824 = vmatmul.mubr.msk.f32.gmra.mxu0 %vm102_vm0, %v5756_v31  ;;  %4913 = vmatprep.mubr.msk.f32.mxu1 %vm102_vm0, %v5750_v30 }
  0x39   :  { %4826 = vmatprep.mubr.msk.f32.mxu0 %vm102_vm0, %v5762_v32 }
  0x3b   :  { %4914 = vmatmul.mubr.msk.f32.gmra.mxu1 %vm102_vm0, %v5756_v31 }
  0x3c   :  { %4827 = vmatmul.mubr.msk.f32.gmra.mxu0 %vm102_vm0, %v5768_v33  ;;  %4916 = vmatprep.mubr.msk.f32.mxu1 %vm102_vm0, %v5762_v32 }
  0x3d   :  { %4829 = vmatprep.mubr.msk.f32.mxu0 %vm102_vm0, %v5774_v34 }
  0x3f   :  { %4917 = vmatmul.mubr.msk.f32.gmra.mxu1 %vm102_vm0, %v5768_v33 }
  0x40   :  { %4830 = vmatmul.mubr.msk.f32.gmra.mxu0 %vm102_vm0, %v5780_v35  ;;  %4919 = vmatprep.mubr.msk.f32.mxu1 %vm102_vm0, %v5774_v34 }
  0x41   :  { %4832 = vmatprep.mubr.msk.f32.mxu0 %vm102_vm0, %v5786_v36 }
  0x43   :  { %4920 = vmatmul.mubr.msk.f32.gmra.mxu1 %vm102_vm0, %v5780_v35 }
  0x44   :  { %4833 = vmatmul.mubr.msk.f32.gmra.mxu0 %vm102_vm0, %v5792_v37  ;;  %4922 = vmatprep.mubr.msk.f32.mxu1 %vm102_vm0, %v5786_v36 }
  0x45   :  { %4835 = vmatprep.mubr.msk.f32.mxu0 %vm102_vm0, %v5798_v38 }
  0x47   :  { %4923 = vmatmul.mubr.msk.f32.gmra.mxu1 %vm102_vm0, %v5792_v37 }
  0x48   :  { %4836 = vmatmul.mubr.msk.f32.gmra.mxu0 %vm102_vm0, %v5804_v39  ;;  %4925 = vmatprep.mubr.msk.f32.mxu1 %vm102_vm0, %v5798_v38 }
  0x49   :  { %4838 = vmatprep.mubr.msk.f32.mxu0 %vm102_vm0, %v5810_v40 }
  0x4b   :  { %4926 = vmatmul.mubr.msk.f32.gmra.mxu1 %vm102_vm0, %v5804_v39 }
  0x4c   :  { %4839 = vmatmul.mubr.msk.f32.gmra.mxu0 %vm102_vm0, %v5816_v41  ;;  %4928 = vmatprep.mubr.msk.f32.mxu1 %vm102_vm0, %v5810_v40 }
  0x4d   :  { %4841 = vmatprep.mubr.msk.f32.mxu0 %vm102_vm0, %v5822_v42 }
  0x4f   :  { %4929 = vmatmul.mubr.msk.f32.gmra.mxu1 %vm102_vm0, %v5816_v41 }
  0x50   :  { %4842 = vmatmul.mubr.msk.f32.gmra.mxu0 %vm102_vm0, %v5828_v43  ;;  %4931 = vmatprep.mubr.msk.f32.mxu1 %vm102_vm0, %v5822_v42 }
  0x51   :  { %4844 = vmatprep.mubr.msk.f32.mxu0 %vm102_vm0, %v5834_v44 }
  0x53   :  { %4932 = vmatmul.mubr.msk.f32.gmra.mxu1 %vm102_vm0, %v5828_v43 }
  0x54   :  { %4845 = vmatmul.mubr.msk.f32.gmra.mxu0 %vm102_vm0, %v5840_v45  ;;  %4934 = vmatprep.mubr.msk.f32.mxu1 %vm102_vm0, %v5834_v44 }
  0x55   :  { %4847 = vmatprep.mubr.msk.f32.mxu0 %vm102_vm0, %v5846_v46 }
  0x57   :  { %4935 = vmatmul.mubr.msk.f32.gmra.mxu1 %vm102_vm0, %v5840_v45 }
  0x58   :  { %4848 = vmatmul.mubr.msk.f32.gmra.mxu0 %vm102_vm0, %v5852_v47  ;;  %4937 = vmatprep.mubr.msk.f32.mxu1 %vm102_vm0, %v5846_v46 }
  0x59   :  { %4850 = vmatprep.mubr.msk.f32.mxu0 %vm102_vm0, %v5866_v48 }
  0x5b   :  { %4938 = vmatmul.mubr.msk.f32.gmra.mxu1 %vm102_vm0, %v5852_v47 }
  0x5c   :  { %4940 = vmatprep.mubr.msk.f32.mxu1 %vm102_vm0, %v5866_v48  ;;  %4851 = vmatmul.mubr.msk.f32.gmra.mxu0 %vm102_vm0, %v5870_v49 }
  0x5d   :  { %4853 = vmatprep.mubr.msk.f32.mxu0 %vm102_vm0, %v5878_v50 }
  0x5f   :  { %4941 = vmatmul.mubr.msk.f32.gmra.mxu1 %vm102_vm0, %v5870_v49 }
  0x60   :  { %4943 = vmatprep.mubr.msk.f32.mxu1 %vm102_vm0, %v5878_v50  ;;  %4854 = vmatmul.mubr.msk.f32.gmra.mxu0 %vm102_vm0, %v5882_v51 }
  0x61   :  { %4856 = vmatprep.mubr.msk.f32.mxu0 %vm102_vm0, %v5890_v52 }
  0x63   :  { %4944 = vmatmul.mubr.msk.f32.gmra.mxu1 %vm102_vm0, %v5882_v51 }
  0x64   :  { %4946 = vmatprep.mubr.msk.f32.mxu1 %vm102_vm0, %v5890_v52  ;;  %4857 = vmatmul.mubr.msk.f32.gmra.mxu0 %vm102_vm0, %v5894_v53 }
  0x65   :  { %4859 = vmatprep.mubr.msk.f32.mxu0 %vm102_vm0, %v5900_v54 }
  0x67   :  { %4947 = vmatmul.mubr.msk.f32.gmra.mxu1 %vm102_vm0, %v5894_v53 }
  0x68   :  { %4949 = vmatprep.mubr.msk.f32.mxu1 %vm102_vm0, %v5900_v54  ;;  %4860 = vmatmul.mubr.msk.f32.gmra.mxu0 %vm102_vm0, %v5906_v55 }
  0x69   :  { %4862 = vmatprep.mubr.msk.f32.mxu0 %vm102_vm0, %v5914_v56 }
  0x6b   :  { %4950 = vmatmul.mubr.msk.f32.gmra.mxu1 %vm102_vm0, %v5906_v55 }
  0x6c   :  { %4952 = vmatprep.mubr.msk.f32.mxu1 %vm102_vm0, %v5914_v56  ;;  %4863 = vmatmul.mubr.msk.f32.gmra.mxu0 %vm102_vm0, %v5918_v57 }
  0x6d   :  { %4865 = vmatprep.mubr.msk.f32.mxu0 %vm102_vm0, %v5926_v58 }
  0x6f   :  { %4953 = vmatmul.mubr.msk.f32.gmra.mxu1 %vm102_vm0, %v5918_v57 }
  0x70   :  { %4955 = vmatprep.mubr.msk.f32.mxu1 %vm102_vm0, %v5926_v58  ;;  %4866 = vmatmul.mubr.msk.f32.gmra.mxu0 %vm102_vm0, %v5930_v59 }
  0x71   :  { %4868 = vmatprep.mubr.msk.f32.mxu0 %vm102_vm0, %v5938_v60 }
  0x73   :  { %4956 = vmatmul.mubr.msk.f32.gmra.mxu1 %vm102_vm0, %v5930_v59 }
  0x74   :  { %4958 = vmatprep.mubr.msk.f32.mxu1 %vm102_vm0, %v5938_v60  ;;  %4869 = vmatmul.mubr.msk.f32.gmra.mxu0 %vm102_vm0, %v5942_v61 }
  0x75   :  { %4871 = vmatprep.mubr.msk.f32.mxu0 %vm102_vm0, %v5950_v62 }
  0x77   :  { %4959 = vmatmul.mubr.msk.f32.gmra.mxu1 %vm102_vm0, %v5942_v61 }
  0x78   :  { %4961 = vmatprep.mubr.msk.f32.mxu1 %vm102_vm0, %v5950_v62  ;;  %4872 = vmatmul.mubr.msk.f32.gmra.mxu0 %vm102_vm0, %v5954_v63 }
  0x79   :  { %4874 = vmatprep.mubr.msk.f32.mxu0 %vm102_vm0, %v5962_v0 }
  0x7b   :  { %4962 = vmatmul.mubr.msk.f32.gmra.mxu1 %vm102_vm0, %v5954_v63 }
  0x7c   :  { %4964 = vmatprep.mubr.msk.f32.mxu1 %vm102_vm0, %v5962_v0  ;;  %4875 = vmatmul.mubr.msk.f32.gmra.mxu0 %vm102_vm0, %v5966_v1 }
  0x7d   :  { %4985 = vmatprep.mubr.msk.f32.mxu0 %vm102_vm0, %v5641_v3  ;;  %v4090_v3 = vld [vmem:[%s7014_s1 + $0xb8] sm:$0xff] }
  0x7e   :  { %4973 = vmatprep.subr.mxu0 %v4090_v3 }
  0x7f   :  { %4965 = vmatmul.mubr.msk.f32.gmra.mxu1 %vm102_vm0, %v5966_v1  ;;  %4974 = vmatpush3.msra.mxu0 %v4090_v3 }
  0x80   :  { %4975 = vmatprep.subr.mxu0 %v4089_v6 }
  0x81   :  { %4976 = vmatpush3.msra.mxu0 %v4089_v6 }
  0x82   :  { %4977 = vmatprep.subr.mxu0 %v4088_v7 }
  0x83   :  { %4978 = vmatpush3.msra.mxu0 %v4088_v7 }
  0x84   :  { %4979 = vmatprep.subr.mxu0 %v4087_v8 }
  0x85   :  { %4980 = vmatpush3.msra.mxu0 %v4087_v8 }
  0x86   :  { %4981 = vmatprep.subr.mxu0 %v4086_v9 }
  0x87   :  { %4982 = vmatpush3.msra.mxu0 %v4086_v9 }
  0x88   :  { %4983 = vmatprep.subr.mxu0 %v4085_v10 }
  0x89   :  { %4984 = vmatpush3.msra.mxu0 %v4085_v10 }
  0x8a   :  { %4986 = vmatmul.mubr.msk.f32.vlgmr.msra.gmra.mxu0 %vm102_vm0, %v5686_v17 }
  0x8b   :  { %4988 = vmatprep.mubr.msk.f32.mxu0 %vm102_vm0, %v5688_v18 }
  0x8e   :  { %4989 = vmatmul.mubr.msk.f32.gmra.mxu0 %vm102_vm0, %v5700_v21 }
  0x8f   :  { %4991 = vmatprep.mubr.msk.f32.mxu0 %vm102_vm0, %v5702_v22 }
  0x92   :  { %4992 = vmatmul.mubr.msk.f32.gmra.mxu0 %vm102_vm0, %v5708_v23 }
  0x93   :  { %4994 = vmatprep.mubr.msk.f32.mxu0 %vm102_vm0, %v5714_v24 }
  0x96   :  { %4995 = vmatmul.mubr.msk.f32.gmra.mxu0 %vm102_vm0, %v5720_v25 }
  0x97   :  { %4997 = vmatprep.mubr.msk.f32.mxu0 %vm102_vm0, %v5726_v26 }
  0x9a   :  { %4998 = vmatmul.mubr.msk.f32.gmra.mxu0 %vm102_vm0, %v5732_v27 }
  0x9b   :  { %5000 = vmatprep.mubr.msk.f32.mxu0 %vm102_vm0, %v5738_v28 }
  0x9e   :  { %5001 = vmatmul.mubr.msk.f32.gmra.mxu0 %vm102_vm0, %v5744_v29 }
  0x9f   :  { %5003 = vmatprep.mubr.msk.f32.mxu0 %vm102_vm0, %v5750_v30 }
  0xa2   :  { %5004 = vmatmul.mubr.msk.f32.gmra.mxu0 %vm102_vm0, %v5756_v31 }
  0xa3   :  { %5006 = vmatprep.mubr.msk.f32.mxu0 %vm102_vm0, %v5762_v32 }
  0xa6   :  { %5007 = vmatmul.mubr.msk.f32.gmra.mxu0 %vm102_vm0, %v5768_v33 }
  0xa7   :  { %5009 = vmatprep.mubr.msk.f32.mxu0 %vm102_vm0, %v5774_v34 }
  0xaa   :  { %5010 = vmatmul.mubr.msk.f32.gmra.mxu0 %vm102_vm0, %v5780_v35 }
  0xab   :  { %5012 = vmatprep.mubr.msk.f32.mxu0 %vm102_vm0, %v5786_v36 }
  0xae   :  { %5013 = vmatmul.mubr.msk.f32.gmra.mxu0 %vm102_vm0, %v5792_v37 }
  0xaf   :  { %5015 = vmatprep.mubr.msk.f32.mxu0 %vm102_vm0, %v5798_v38 }
  0xb2   :  { %5016 = vmatmul.mubr.msk.f32.gmra.mxu0 %vm102_vm0, %v5804_v39 }
  0xb3   :  { %5018 = vmatprep.mubr.msk.f32.mxu0 %vm102_vm0, %v5810_v40 }
  0xb6   :  { %5019 = vmatmul.mubr.msk.f32.gmra.mxu0 %vm102_vm0, %v5816_v41 }
  0xb7   :  { %5021 = vmatprep.mubr.msk.f32.mxu0 %vm102_vm0, %v5822_v42 }
  0xba   :  { %5022 = vmatmul.mubr.msk.f32.gmra.mxu0 %vm102_vm0, %v5828_v43 }
  0xbb   :  { %5024 = vmatprep.mubr.msk.f32.mxu0 %vm102_vm0, %v5834_v44 }
  0xbe   :  { %5025 = vmatmul.mubr.msk.f32.gmra.mxu0 %vm102_vm0, %v5840_v45 }
  0xbf   :  { %5027 = vmatprep.mubr.msk.f32.mxu0 %vm102_vm0, %v5846_v46 }
  0xc2   :  { %5028 = vmatmul.mubr.msk.f32.gmra.mxu0 %vm102_vm0, %v5852_v47 }
  0xc3   :  { %5030 = vmatprep.mubr.msk.f32.mxu0 %vm102_vm0, %v5866_v48 }
  0xc6   :  { %5031 = vmatmul.mubr.msk.f32.gmra.mxu0 %vm102_vm0, %v5870_v49 }
  0xc7   :  { %5033 = vmatprep.mubr.msk.f32.mxu0 %vm102_vm0, %v5878_v50 }
  0xca   :  { %5034 = vmatmul.mubr.msk.f32.gmra.mxu0 %vm102_vm0, %v5882_v51 }
  0xcb   :  { %5036 = vmatprep.mubr.msk.f32.mxu0 %vm102_vm0, %v5890_v52 }
  0xce   :  { %5037 = vmatmul.mubr.msk.f32.gmra.mxu0 %vm102_vm0, %v5894_v53 }
  0xcf   :  { %5039 = vmatprep.mubr.msk.f32.mxu0 %vm102_vm0, %v5900_v54 }
  0xd2   :  { %5040 = vmatmul.mubr.msk.f32.gmra.mxu0 %vm102_vm0, %v5906_v55 }
  0xd3   :  { %5042 = vmatprep.mubr.msk.f32.mxu0 %vm102_vm0, %v5914_v56 }
  0xd6   :  { %5043 = vmatmul.mubr.msk.f32.gmra.mxu0 %vm102_vm0, %v5918_v57 }
  0xd7   :  { %5045 = vmatprep.mubr.msk.f32.mxu0 %vm102_vm0, %v5926_v58 }
  0xda   :  { %5046 = vmatmul.mubr.msk.f32.gmra.mxu0 %vm102_vm0, %v5930_v59 }
  0xdb   :  { %5048 = vmatprep.mubr.msk.f32.mxu0 %vm102_vm0, %v5938_v60 }
  0xde   :  { %5049 = vmatmul.mubr.msk.f32.gmra.mxu0 %vm102_vm0, %v5942_v61 }
  0xdf   :  { %5051 = vmatprep.mubr.msk.f32.mxu0 %vm102_vm0, %v5950_v62 }
  0xe0   :  { %v4807_v11 = vpop.f32.mrf.mxu0 }
  0xe1   :  { %554 = vst.msk [vmem:[#allocation2 + $0x8] sm:$0xff] %vm552_vm1, %v4807_v11 }
  0xe2   :  { %v313_v12 = vpop.f32.mrf.mxu0  ;;  %5052 = vmatmul.mubr.msk.f32.gmra.mxu0 %vm102_vm0, %v5954_v63 }
  0xe3   :  { %553 = vst.msk [vmem:[#allocation2] sm:$0xff] %vm552_vm1, %v313_v12  ;;  %v4897_v14 = vpop.f32.mrf.mxu1  ;;  %5054 = vmatprep.mubr.msk.f32.mxu0 %vm102_vm0, %v5962_v0 }
  0xe4   :  { %v4810_v13 = vpop.f32.mrf.mxu0  ;;  %907 = vst.msk [vmem:[#allocation3 + $0x8] sm:$0xff] %vm552_vm1, %v4897_v14 }
  0xe5   :  { %556 = vst.msk [vmem:[#allocation2 + $0x18] sm:$0xff] %vm552_vm1, %v4810_v13  ;;  %v667_v16 = vpop.f32.mrf.mxu1 }
  0xe6   :  { %v323_v15 = vpop.f32.mrf.mxu0  ;;  %906 = vst.msk [vmem:[#allocation3] sm:$0xff] %vm552_vm1, %v667_v16  ;;  %5055 = vmatmul.mubr.msk.f32.gmra.mxu0 %vm102_vm0, %v5966_v1 }
  0xe7   :  { %555 = vst.msk [vmem:[#allocation2 + $0x10] sm:$0xff] %vm552_vm1, %v323_v15  ;;  %v4900_v18 = vpop.f32.mrf.mxu1 }
  0xe8   :  { %v4813_v17 = vpop.f32.mrf.mxu0  ;;  %909 = vst.msk [vmem:[#allocation3 + $0x18] sm:$0xff] %vm552_vm1, %v4900_v18  ;;  %v1329_v44 = vld [vmem:[#allocation2 + $0x8] sm:$0xff] }
  0xe9   :  { %558 = vst.msk [vmem:[#allocation2 + $0x28] sm:$0xff] %vm552_vm1, %v4813_v17  ;;  %v677_v20 = vpop.f32.mrf.mxu1 }
  0xea   :  { %v333_v19 = vpop.f32.mrf.mxu0  ;;  %908 = vst.msk [vmem:[#allocation3 + $0x10] sm:$0xff] %vm552_vm1, %v677_v20  ;;  %v1328_v49 = vld [vmem:[#allocation2] sm:$0xff] }
  0xeb   :  { %557 = vst.msk [vmem:[#allocation2 + $0x20] sm:$0xff] %vm552_vm1, %v333_v19  ;;  %v4903_v22 = vpop.f32.mrf.mxu1  ;;  %v1323_v57 = vld [vmem:[#allocation3 + $0x8] sm:$0xff] }
  0xec   :  { %v4816_v21 = vpop.f32.mrf.mxu0  ;;  %911 = vst.msk [vmem:[#allocation3 + $0x28] sm:$0xff] %vm552_vm1, %v4903_v22  ;;  %v1331_v34 = vld [vmem:[#allocation2 + $0x18] sm:$0xff] }
  0xed   :  { %560 = vst.msk [vmem:[#allocation2 + $0x38] sm:$0xff] %vm552_vm1, %v4816_v21  ;;  %v687_v24 = vpop.f32.mrf.mxu1  ;;  %v1322_v25 = vld [vmem:[#allocation3] sm:$0xff] }
  0xee   :  { %v343_v23 = vpop.f32.mrf.mxu0  ;;  %910 = vst.msk [vmem:[#allocation3 + $0x20] sm:$0xff] %vm552_vm1, %v687_v24  ;;  %5069 = vmatprep.mubr.msk.f32.mxu1 %vm552_vm1, %v1322_v25  ;;  %v1330_v39 = vld [vmem:[#allocation2 + $0x10] sm:$0xff] }
  0xef   :  { %559 = vst.msk [vmem:[#allocation2 + $0x30] sm:$0xff] %vm552_vm1, %v343_v23  ;;  %v4906_v28 = vpop.f32.mrf.mxu1  ;;  %v1325_v60 = vld [vmem:[#allocation3 + $0x18] sm:$0xff] }
  0xf0   :  { %v1333_v26 = vld [vmem:[#allocation2 + $0x28] sm:$0xff]  ;;  %v4819_v27 = vpop.f32.mrf.mxu0  ;;  %913 = vst.msk [vmem:[#allocation3 + $0x38] sm:$0xff] %vm552_vm1, %v4906_v28 }
  0xf1   :  { %5057 = vmatprep.subr.msk.mxu1 %vm552_vm1, %v1333_v26  ;;  %562 = vst.msk [vmem:[#allocation2 + $0x48] sm:$0xff] %vm552_vm1, %v4819_v27  ;;  %v697_v31 = vpop.f32.mrf.mxu1  ;;  %v1324_v55 = vld [vmem:[#allocation3 + $0x10] sm:$0xff] }
  0xf2   :  { %5058 = vmatpush3.xpose.msk.msra.mxu1 %vm552_vm1, %v1333_v26  ;;  %v1332_v29 = vld [vmem:[#allocation2 + $0x20] sm:$0xff]  ;;  %v353_v30 = vpop.f32.mrf.mxu0  ;;  %912 = vst.msk [vmem:[#allocation3 + $0x30] sm:$0xff] %vm552_vm1, %v697_v31 }
  0xf3   :  { %5059 = vmatprep.subr.msk.mxu1 %vm552_vm1, %v1332_v29  ;;  %561 = vst.msk [vmem:[#allocation2 + $0x40] sm:$0xff] %vm552_vm1, %v353_v30  ;;  %v4909_v33 = vpop.f32.mrf.mxu1  ;;  %v1327_v2 = vld [vmem:[#allocation3 + $0x28] sm:$0xff] }
  0xf4   :  { %v4822_v32 = vpop.f32.mrf.mxu0  ;;  %915 = vst.msk [vmem:[#allocation3 + $0x48] sm:$0xff] %vm552_vm1, %v4909_v33 }
  0xf5   :  { %564 = vst.msk [vmem:[#allocation2 + $0x58] sm:$0xff] %vm552_vm1, %v4822_v32  ;;  %v707_v36 = vpop.f32.mrf.mxu1  ;;  %v1326_v62 = vld [vmem:[#allocation3 + $0x20] sm:$0xff] }
  0xf6   :  { %5060 = vmatpush3.xpose.msk.msra.mxu1 %vm552_vm1, %v1332_v29  ;;  %v363_v35 = vpop.f32.mrf.mxu0  ;;  %914 = vst.msk [vmem:[#allocation3 + $0x40] sm:$0xff] %vm552_vm1, %v707_v36 }
  0xf7   :  { %5061 = vmatprep.subr.msk.mxu1 %vm552_vm1, %v1331_v34  ;;  %563 = vst.msk [vmem:[#allocation2 + $0x50] sm:$0xff] %vm552_vm1, %v363_v35  ;;  %v4912_v38 = vpop.f32.mrf.mxu1 }
  0xf8   :  { %v4825_v37 = vpop.f32.mrf.mxu0  ;;  %917 = vst.msk [vmem:[#allocation3 + $0x58] sm:$0xff] %vm552_vm1, %v4912_v38 }
  0xf9   :  { %566 = vst.msk [vmem:[#allocation2 + $0x68] sm:$0xff] %vm552_vm1, %v4825_v37  ;;  %v717_v41 = vpop.f32.mrf.mxu1 }
  0xfa   :  { %5062 = vmatpush3.xpose.msk.msra.mxu1 %vm552_vm1, %v1331_v34  ;;  %v373_v40 = vpop.f32.mrf.mxu0  ;;  %916 = vst.msk [vmem:[#allocation3 + $0x50] sm:$0xff] %vm552_vm1, %v717_v41 }
  0xfb   :  { %5063 = vmatprep.subr.msk.mxu1 %vm552_vm1, %v1330_v39  ;;  %565 = vst.msk [vmem:[#allocation2 + $0x60] sm:$0xff] %vm552_vm1, %v373_v40  ;;  %v4915_v43 = vpop.f32.mrf.mxu1 }
  0xfc   :  { %v4828_v42 = vpop.f32.mrf.mxu0  ;;  %919 = vst.msk [vmem:[#allocation3 + $0x68] sm:$0xff] %vm552_vm1, %v4915_v43 }
  0xfd   :  { %568 = vst.msk [vmem:[#allocation2 + $0x78] sm:$0xff] %vm552_vm1, %v4828_v42  ;;  %v727_v46 = vpop.f32.mrf.mxu1 }
  0xfe   :  { %5064 = vmatpush3.xpose.msk.msra.mxu1 %vm552_vm1, %v1330_v39  ;;  %v383_v45 = vpop.f32.mrf.mxu0  ;;  %918 = vst.msk [vmem:[#allocation3 + $0x60] sm:$0xff] %vm552_vm1, %v727_v46 }
  0xff   :  { %5065 = vmatprep.subr.msk.mxu1 %vm552_vm1, %v1329_v44  ;;  %567 = vst.msk [vmem:[#allocation2 + $0x70] sm:$0xff] %vm552_vm1, %v383_v45  ;;  %v4918_v48 = vpop.f32.mrf.mxu1 }
 0x100   :  { %v4831_v47 = vpop.f32.mrf.mxu0  ;;  %921 = vst.msk [vmem:[#allocation3 + $0x78] sm:$0xff] %vm552_vm1, %v4918_v48 }
 0x101   :  { %570 = vst.msk [vmem:[#allocation2 + $0x88] sm:$0xff] %vm552_vm1, %v4831_v47  ;;  %v737_v51 = vpop.f32.mrf.mxu1 }
 0x102   :  { %5066 = vmatpush3.xpose.msk.msra.mxu1 %vm552_vm1, %v1329_v44  ;;  %v393_v50 = vpop.f32.mrf.mxu0  ;;  %920 = vst.msk [vmem:[#allocation3 + $0x70] sm:$0xff] %vm552_vm1, %v737_v51 }
 0x103   :  { %5067 = vmatprep.subr.msk.mxu1 %vm552_vm1, %v1328_v49  ;;  %569 = vst.msk [vmem:[#allocation2 + $0x80] sm:$0xff] %vm552_vm1, %v393_v50  ;;  %v4921_v53 = vpop.f32.mrf.mxu1 }
 0x104   :  { %v4834_v52 = vpop.f32.mrf.mxu0  ;;  %923 = vst.msk [vmem:[#allocation3 + $0x88] sm:$0xff] %vm552_vm1, %v4921_v53 }
 0x105   :  { %572 = vst.msk [vmem:[#allocation2 + $0x98] sm:$0xff] %vm552_vm1, %v4834_v52  ;;  %v747_v56 = vpop.f32.mrf.mxu1 }
 0x106   :  { %5068 = vmatpush3.xpose.msk.msra.mxu1 %vm552_vm1, %v1328_v49  ;;  %v403_v54 = vpop.f32.mrf.mxu0  ;;  %922 = vst.msk [vmem:[#allocation3 + $0x80] sm:$0xff] %vm552_vm1, %v747_v56 }
 0x107   :  { %571 = vst.msk [vmem:[#allocation2 + $0x90] sm:$0xff] %vm552_vm1, %v403_v54  ;;  %v4924_v59 = vpop.f32.mrf.mxu1 }
 0x108   :  { %v4837_v58 = vpop.f32.mrf.mxu0  ;;  %925 = vst.msk [vmem:[#allocation3 + $0x98] sm:$0xff] %vm552_vm1, %v4924_v59 }
 0x109   :  { %5070 = vmatmul.mubr.msk.f32.vlgmr.msra.gmra.mxu1 %vm552_vm1, %v1323_v57  ;;  %574 = vst.msk [vmem:[#allocation2 + $0xa8] sm:$0xff] %vm552_vm1, %v4837_v58  ;;  %v757_v63 = vpop.f32.mrf.mxu1 }
 0x10a   :  { %5072 = vmatprep.mubr.msk.f32.mxu1 %vm552_vm1, %v1324_v55  ;;  %v413_v61 = vpop.f32.mrf.mxu0  ;;  %924 = vst.msk [vmem:[#allocation3 + $0x90] sm:$0xff] %vm552_vm1, %v757_v63 }
 0x10b   :  { %573 = vst.msk [vmem:[#allocation2 + $0xa0] sm:$0xff] %vm552_vm1, %v413_v61  ;;  %v4927_v1 = vpop.f32.mrf.mxu1 }
 0x10c   :  { %v4840_v0 = vpop.f32.mrf.mxu0  ;;  %927 = vst.msk [vmem:[#allocation3 + $0xa8] sm:$0xff] %vm552_vm1, %v4927_v1  ;;  %v2360_v24 = vld [vmem:[#allocation2 + $0x98] sm:$0xff] }
 0x10d   :  { %5073 = vmatmul.mubr.msk.f32.gmra.mxu1 %vm552_vm1, %v1325_v60  ;;  %576 = vst.msk [vmem:[#allocation2 + $0xb8] sm:$0xff] %vm552_vm1, %v4840_v0  ;;  %v767_v5 = vpop.f32.mrf.mxu1 }
 0x10e   :  { %5075 = vmatprep.mubr.msk.f32.mxu1 %vm552_vm1, %v1326_v62  ;;  %v423_v4 = vpop.f32.mrf.mxu0  ;;  %926 = vst.msk [vmem:[#allocation3 + $0xa0] sm:$0xff] %vm552_vm1, %v767_v5  ;;  %v2359_v26 = vld [vmem:[#allocation2 + $0x90] sm:$0xff] }
 0x10f   :  { %575 = vst.msk [vmem:[#allocation2 + $0xb0] sm:$0xff] %vm552_vm1, %v423_v4  ;;  %v4930_v6 = vpop.f32.mrf.mxu1  ;;  %v2353_v31 = vld [vmem:[#allocation3 + $0x98] sm:$0xff] }
 0x110   :  { %v4843_v3 = vpop.f32.mrf.mxu0  ;;  %929 = vst.msk [vmem:[#allocation3 + $0xb8] sm:$0xff] %vm552_vm1, %v4930_v6  ;;  %v2362_v16 = vld [vmem:[#allocation2 + $0xa8] sm:$0xff] }
 0x111   :  { %5076 = vmatmul.mubr.msk.f32.gmra.mxu1 %vm552_vm1, %v1327_v2  ;;  %578 = vst.msk [vmem:[#allocation2 + $0xc8] sm:$0xff] %vm552_vm1, %v4843_v3  ;;  %v777_v8 = vpop.f32.mrf.mxu1  ;;  %v2352_v9 = vld [vmem:[#allocation3 + $0x90] sm:$0xff] }
 0x112   :  { %v433_v7 = vpop.f32.mrf.mxu0  ;;  %928 = vst.msk [vmem:[#allocation3 + $0xb0] sm:$0xff] %vm552_vm1, %v777_v8  ;;  %5195 = vmatprep.mubr.msk.f32.mxu0 %vm552_vm1, %v2352_v9  ;;  %v2361_v21 = vld [vmem:[#allocation2 + $0xa0] sm:$0xff] }
 0x113   :  { %577 = vst.msk [vmem:[#allocation2 + $0xc0] sm:$0xff] %vm552_vm1, %v433_v7  ;;  %v4933_v12 = vpop.f32.mrf.mxu1  ;;  %v2355_v36 = vld [vmem:[#allocation3 + $0xa8] sm:$0xff] }
 0x114   :  { %v2364_v10 = vld [vmem:[#allocation2 + $0xb8] sm:$0xff]  ;;  %v4846_v11 = vpop.f32.mrf.mxu0  ;;  %931 = vst.msk [vmem:[#allocation3 + $0xc8] sm:$0xff] %vm552_vm1, %v4933_v12 }
 0x115   :  { %5183 = vmatprep.subr.msk.mxu0 %vm552_vm1, %v2364_v10  ;;  %580 = vst.msk [vmem:[#allocation2 + $0xd8] sm:$0xff] %vm552_vm1, %v4846_v11  ;;  %v787_v15 = vpop.f32.mrf.mxu1  ;;  %v2354_v33 = vld [vmem:[#allocation3 + $0xa0] sm:$0xff] }
 0x116   :  { %5184 = vmatpush3.xpose.msk.msra.mxu0 %vm552_vm1, %v2364_v10  ;;  %v2363_v13 = vld [vmem:[#allocation2 + $0xb0] sm:$0xff]  ;;  %v443_v14 = vpop.f32.mrf.mxu0  ;;  %930 = vst.msk [vmem:[#allocation3 + $0xc0] sm:$0xff] %vm552_vm1, %v787_v15 }
 0x117   :  { %5185 = vmatprep.subr.msk.mxu0 %vm552_vm1, %v2363_v13  ;;  %579 = vst.msk [vmem:[#allocation2 + $0xd0] sm:$0xff] %vm552_vm1, %v443_v14  ;;  %v4936_v18 = vpop.f32.mrf.mxu1  ;;  %v2357_v41 = vld [vmem:[#allocation3 + $0xb8] sm:$0xff] }
 0x118   :  { %v4849_v17 = vpop.f32.mrf.mxu0  ;;  %933 = vst.msk [vmem:[#allocation3 + $0xd8] sm:$0xff] %vm552_vm1, %v4936_v18  ;;  %v2704_v47 = vld [vmem:[#allocation2 + $0xc8] sm:$0xff] }
 0x119   :  { %582 = vst.msk [vmem:[#allocation2 + $0xe8] sm:$0xff] %vm552_vm1, %v4849_v17  ;;  %v797_v20 = vpop.f32.mrf.mxu1  ;;  %v2356_v38 = vld [vmem:[#allocation3 + $0xb0] sm:$0xff] }
 0x11a   :  { %5186 = vmatpush3.xpose.msk.msra.mxu0 %vm552_vm1, %v2363_v13  ;;  %v453_v19 = vpop.f32.mrf.mxu0  ;;  %932 = vst.msk [vmem:[#allocation3 + $0xd0] sm:$0xff] %vm552_vm1, %v797_v20  ;;  %v2703_v50 = vld [vmem:[#allocation2 + $0xc0] sm:$0xff] }
 0x11b   :  { %5187 = vmatprep.subr.msk.mxu0 %vm552_vm1, %v2362_v16  ;;  %581 = vst.msk [vmem:[#allocation2 + $0xe0] sm:$0xff] %vm552_vm1, %v453_v19  ;;  %v4939_v22 = vpop.f32.mrf.mxu1  ;;  %v2697_v54 = vld [vmem:[#allocation3 + $0xc8] sm:$0xff] }
 0x11c   :  { %935 = vst.msk [vmem:[#allocation3 + $0xe8] sm:$0xff] %vm552_vm1, %v4939_v22  ;;  %v2706_v39 = vld [vmem:[#allocation2 + $0xd8] sm:$0xff]  ;;  %v4852_v61 = vpop.f32.mrf.mxu0 }
 0x11d   :  { %v807_v23 = vpop.f32.mrf.mxu1  ;;  %v2696_v43 = vld [vmem:[#allocation3 + $0xc0] sm:$0xff]  ;;  %584 = vst.msk [vmem:[#allocation2 + $0xf8] sm:$0xff] %vm552_vm1, %v4852_v61 }
 0x11e   :  { %5188 = vmatpush3.xpose.msk.msra.mxu0 %vm552_vm1, %v2362_v16  ;;  %934 = vst.msk [vmem:[#allocation3 + $0xe0] sm:$0xff] %vm552_vm1, %v807_v23  ;;  %v2705_v44 = vld [vmem:[#allocation2 + $0xd0] sm:$0xff]  ;;  %v463_v62 = vpop.f32.mrf.mxu0 }
 0x11f   :  { %5189 = vmatprep.subr.msk.mxu0 %vm552_vm1, %v2361_v21  ;;  %v4942_v25 = vpop.f32.mrf.mxu1  ;;  %v2699_v58 = vld [vmem:[#allocation3 + $0xd8] sm:$0xff]  ;;  %583 = vst.msk [vmem:[#allocation2 + $0xf0] sm:$0xff] %vm552_vm1, %v463_v62 }
 0x120   :  { %937 = vst.msk [vmem:[#allocation3 + $0xf8] sm:$0xff] %vm552_vm1, %v4942_v25  ;;  %v2708_v29 = vld [vmem:[#allocation2 + $0xe8] sm:$0xff]  ;;  %v4855_v63 = vpop.f32.mrf.mxu0 }
 0x121   :  { %v817_v27 = vpop.f32.mrf.mxu1  ;;  %v2698_v56 = vld [vmem:[#allocation3 + $0xd0] sm:$0xff]  ;;  %586 = vst.msk [vmem:[#allocation2 + $0x108] sm:$0xff] %vm552_vm1, %v4855_v63 }
 0x122   :  { %5190 = vmatpush3.xpose.msk.msra.mxu0 %vm552_vm1, %v2361_v21  ;;  %936 = vst.msk [vmem:[#allocation3 + $0xf0] sm:$0xff] %vm552_vm1, %v817_v27  ;;  %v2707_v34 = vld [vmem:[#allocation2 + $0xe0] sm:$0xff]  ;;  %v473_v0 = vpop.f32.mrf.mxu0 }
 0x123   :  { %5191 = vmatprep.subr.msk.mxu0 %vm552_vm1, %v2360_v24  ;;  %v4945_v28 = vpop.f32.mrf.mxu1  ;;  %v2701_v60 = vld [vmem:[#allocation3 + $0xe8] sm:$0xff]  ;;  %585 = vst.msk [vmem:[#allocation2 + $0x100] sm:$0xff] %vm552_vm1, %v473_v0 }
 0x124   :  { %939 = vst.msk [vmem:[#allocation3 + $0x108] sm:$0xff] %vm552_vm1, %v4945_v28  ;;  %v4858_v1 = vpop.f32.mrf.mxu0 }
 0x125   :  { %v827_v30 = vpop.f32.mrf.mxu1  ;;  %v2700_v59 = vld [vmem:[#allocation3 + $0xe0] sm:$0xff]  ;;  %588 = vst.msk [vmem:[#allocation2 + $0x118] sm:$0xff] %vm552_vm1, %v4858_v1 }
 0x126   :  { %5192 = vmatpush3.xpose.msk.msra.mxu0 %vm552_vm1, %v2360_v24  ;;  %938 = vst.msk [vmem:[#allocation3 + $0x100] sm:$0xff] %vm552_vm1, %v827_v30  ;;  %v483_v2 = vpop.f32.mrf.mxu0 }
 0x127   :  { %5193 = vmatprep.subr.msk.mxu0 %vm552_vm1, %v2359_v26  ;;  %v4948_v32 = vpop.f32.mrf.mxu1  ;;  %587 = vst.msk [vmem:[#allocation2 + $0x110] sm:$0xff] %vm552_vm1, %v483_v2 }
 0x128   :  { %941 = vst.msk [vmem:[#allocation3 + $0x118] sm:$0xff] %vm552_vm1, %v4948_v32  ;;  %v4861_v4 = vpop.f32.mrf.mxu0 }
 0x129   :  { %v837_v35 = vpop.f32.mrf.mxu1  ;;  %590 = vst.msk [vmem:[#allocation2 + $0x128] sm:$0xff] %vm552_vm1, %v4861_v4 }
 0x12a   :  { %5194 = vmatpush3.xpose.msk.msra.mxu0 %vm552_vm1, %v2359_v26  ;;  %940 = vst.msk [vmem:[#allocation3 + $0x110] sm:$0xff] %vm552_vm1, %v837_v35  ;;  %v493_v5 = vpop.f32.mrf.mxu0 }
 0x12b   :  { %5225 = vmatprep.subr.msk.mxu0 %vm552_vm1, %v2708_v29  ;;  %v4951_v37 = vpop.f32.mrf.mxu1  ;;  %589 = vst.msk [vmem:[#allocation2 + $0x120] sm:$0xff] %vm552_vm1, %v493_v5 }
 0x12c   :  { %943 = vst.msk [vmem:[#allocation3 + $0x128] sm:$0xff] %vm552_vm1, %v4951_v37  ;;  %v4864_v3 = vpop.f32.mrf.mxu0 }
 0x12d   :  { %5196 = vmatmul.mubr.msk.f32.vlgmr.msra.gmra.mxu0 %vm552_vm1, %v2353_v31  ;;  %v847_v40 = vpop.f32.mrf.mxu1  ;;  %592 = vst.msk [vmem:[#allocation2 + $0x138] sm:$0xff] %vm552_vm1, %v4864_v3 }
 0x12e   :  { %5226 = vmatpush3.xpose.msk.msra.mxu0 %vm552_vm1, %v2708_v29  ;;  %5198 = vmatprep.mubr.msk.f32.mxu0 %vm552_vm1, %v2354_v33  ;;  %942 = vst.msk [vmem:[#allocation3 + $0x120] sm:$0xff] %vm552_vm1, %v847_v40  ;;  %v503_v6 = vpop.f32.mrf.mxu0 }
 0x12f   :  { %5227 = vmatprep.subr.msk.mxu0 %vm552_vm1, %v2707_v34  ;;  %v4954_v42 = vpop.f32.mrf.mxu1  ;;  %591 = vst.msk [vmem:[#allocation2 + $0x130] sm:$0xff] %vm552_vm1, %v503_v6 }
 0x130   :  { %945 = vst.msk [vmem:[#allocation3 + $0x138] sm:$0xff] %vm552_vm1, %v4954_v42  ;;  %v4867_v7 = vpop.f32.mrf.mxu0 }
 0x131   :  { %5199 = vmatmul.mubr.msk.f32.gmra.mxu0 %vm552_vm1, %v2355_v36  ;;  %v857_v45 = vpop.f32.mrf.mxu1  ;;  %594 = vst.msk [vmem:[#allocation2 + $0x148] sm:$0xff] %vm552_vm1, %v4867_v7 }
 0x132   :  { %5228 = vmatpush3.xpose.msk.msra.mxu0 %vm552_vm1, %v2707_v34  ;;  %5201 = vmatprep.mubr.msk.f32.mxu0 %vm552_vm1, %v2356_v38  ;;  %944 = vst.msk [vmem:[#allocation3 + $0x130] sm:$0xff] %vm552_vm1, %v857_v45  ;;  %v513_v8 = vpop.f32.mrf.mxu0 }
 0x133   :  { %5229 = vmatprep.subr.msk.mxu0 %vm552_vm1, %v2706_v39  ;;  %v4957_v46 = vpop.f32.mrf.mxu1  ;;  %593 = vst.msk [vmem:[#allocation2 + $0x140] sm:$0xff] %vm552_vm1, %v513_v8 }
 0x134   :  { %947 = vst.msk [vmem:[#allocation3 + $0x148] sm:$0xff] %vm552_vm1, %v4957_v46  ;;  %v4870_v9 = vpop.f32.mrf.mxu0 }
 0x135   :  { %5202 = vmatmul.mubr.msk.f32.gmra.mxu0 %vm552_vm1, %v2357_v41  ;;  %v867_v48 = vpop.f32.mrf.mxu1  ;;  %596 = vst.msk [vmem:[#allocation2 + $0x158] sm:$0xff] %vm552_vm1, %v4870_v9 }
 0x136   :  { %5230 = vmatpush3.xpose.msk.msra.mxu0 %vm552_vm1, %v2706_v39  ;;  %5237 = vmatprep.mubr.msk.f32.mxu0 %vm552_vm1, %v2696_v43  ;;  %946 = vst.msk [vmem:[#allocation3 + $0x140] sm:$0xff] %vm552_vm1, %v867_v48  ;;  %v523_v10 = vpop.f32.mrf.mxu0 }
 0x137   :  { %5231 = vmatprep.subr.msk.mxu0 %vm552_vm1, %v2705_v44  ;;  %v4960_v49 = vpop.f32.mrf.mxu1  ;;  %595 = vst.msk [vmem:[#allocation2 + $0x150] sm:$0xff] %vm552_vm1, %v523_v10 }
 0x138   :  { %949 = vst.msk [vmem:[#allocation3 + $0x158] sm:$0xff] %vm552_vm1, %v4960_v49  ;;  %v4873_v11 = vpop.f32.mrf.mxu0 }
 0x139   :  { %v877_v51 = vpop.f32.mrf.mxu1  ;;  %598 = vst.msk [vmem:[#allocation2 + $0x168] sm:$0xff] %vm552_vm1, %v4873_v11 }
 0x13a   :  { %5232 = vmatpush3.xpose.msk.msra.mxu0 %vm552_vm1, %v2705_v44  ;;  %948 = vst.msk [vmem:[#allocation3 + $0x150] sm:$0xff] %vm552_vm1, %v877_v51  ;;  %v533_v12 = vpop.f32.mrf.mxu0 }
 0x13b   :  { %5233 = vmatprep.subr.msk.mxu0 %vm552_vm1, %v2704_v47  ;;  %v4963_v52 = vpop.f32.mrf.mxu1  ;;  %597 = vst.msk [vmem:[#allocation2 + $0x160] sm:$0xff] %vm552_vm1, %v533_v12 }
 0x13c   :  { %951 = vst.msk [vmem:[#allocation3 + $0x168] sm:$0xff] %vm552_vm1, %v4963_v52  ;;  %v4876_v13 = vpop.f32.mrf.mxu0  ;;  %v1307_v52 = vlaneseq }
 0x13d   :  { %v887_v53 = vpop.f32.mrf.mxu1  ;;  %600 = vst.msk [vmem:[#allocation2 + $0x178] sm:$0xff] %vm552_vm1, %v4876_v13 }
 0x13e   :  { %5234 = vmatpush3.xpose.msk.msra.mxu0 %vm552_vm1, %v2704_v47  ;;  %950 = vst.msk [vmem:[#allocation3 + $0x160] sm:$0xff] %vm552_vm1, %v887_v53  ;;  %v543_v14 = vpop.f32.mrf.mxu0 }
 0x13f   :  { %5235 = vmatprep.subr.msk.mxu0 %vm552_vm1, %v2703_v50  ;;  %v4966_v55 = vpop.f32.mrf.mxu1  ;;  %599 = vst.msk [vmem:[#allocation2 + $0x170] sm:$0xff] %vm552_vm1, %v543_v14 }
 0x140   :  { %953 = vst.msk [vmem:[#allocation3 + $0x178] sm:$0xff] %vm552_vm1, %v4966_v55  ;;  %v1308_v55 = vshrl.u32 %v1307_v52, 7 }
 0x141   :  { %v897_v57 = vpop.f32.mrf.mxu1 }
 0x142   :  { %5236 = vmatpush3.xpose.msk.msra.mxu0 %vm552_vm1, %v2703_v50  ;;  %952 = vst.msk [vmem:[#allocation3 + $0x170] sm:$0xff] %vm552_vm1, %v897_v57  ;;  %v1311_v61 = vadd.s32 24, %v1308_v55  ;;  %v1310_v0 = vadd.s32 16, %v1308_v55  ;;  %v1313_v10 = vadd.s32 40, %v1308_v55  ;;  %v1312_v11 = vadd.s32 32, %v1308_v55 }
 0x145   :  { %5238 = vmatmul.mubr.msk.f32.vlgmr.msra.gmra.mxu0 %vm552_vm1, %v2697_v54 }
 0x146   :  { %5240 = vmatprep.mubr.msk.f32.mxu0 %vm552_vm1, %v2698_v56 }
 0x149   :  { %5241 = vmatmul.mubr.msk.f32.gmra.mxu0 %vm552_vm1, %v2699_v58  ;;  %v1309_v58 = vadd.s32 8, %v1308_v55 }
 0x14a   :  { %5243 = vmatprep.mubr.msk.f32.mxu0 %vm552_vm1, %v2700_v59  ;;  %v4987_v15 = vpop.f32.mrf.mxu0  ;;  %v1315_v59 = vand.u32 127, %v1307_v52 }
 0x14b   :  { %1260 = vst.msk [vmem:[#allocation4 + $0x8] sm:$0xff] %vm552_vm1, %v4987_v15 }
 0x14c   :  { %v1020_v16 = vpop.f32.mrf.mxu0  ;;  %vm6289_vm2 = vcmp.le.s32.totalorder %v1315_v59, %v1308_v55  ;;  %vm6294_vm3 = vcmp.le.s32.totalorder %v1315_v59, %v1309_v58  ;;  %vm6300_vm4 = vcmp.le.s32.totalorder %v1315_v59, %v1311_v61  ;;  %vm6306_vm6 = vcmp.le.s32.totalorder %v1315_v59, %v1310_v0  ;;  %v3396_v61 = vld [vmem:[#allocation2 + $0x148] sm:$0xff] }
 0x14d   :  { %5244 = vmatmul.mubr.msk.f32.gmra.mxu0 %vm552_vm1, %v2701_v60  ;;  %1259 = vst.msk [vmem:[#allocation4] sm:$0xff] %vm552_vm1, %v1020_v16  ;;  %vm6322_vm7 = vcmp.le.s32.totalorder %v1315_v59, %v1313_v10  ;;  %vm6329_vm8 = vcmp.le.s32.totalorder %v1315_v59, %v1312_v11 }
 0x14e   :  { %v4990_v17 = vpop.f32.mrf.mxu0 }
 0x14f   :  { %1262 = vst.msk [vmem:[#allocation4 + $0x18] sm:$0xff] %vm552_vm1, %v4990_v17 }
 0x150   :  { %v1030_v18 = vpop.f32.mrf.mxu0 }
 0x151   :  { %1261 = vst.msk [vmem:[#allocation4 + $0x10] sm:$0xff] %vm552_vm1, %v1030_v18 }
 0x152   :  { %v4993_v19 = vpop.f32.mrf.mxu0 }
 0x153   :  { %1264 = vst.msk [vmem:[#allocation4 + $0x28] sm:$0xff] %vm552_vm1, %v4993_v19 }
 0x154   :  { %v1040_v20 = vpop.f32.mrf.mxu0 }
 0x155   :  { %1263 = vst.msk [vmem:[#allocation4 + $0x20] sm:$0xff] %vm552_vm1, %v1040_v20 }
 0x156   :  { %v4996_v21 = vpop.f32.mrf.mxu0 }
 0x157   :  { %1266 = vst.msk [vmem:[#allocation4 + $0x38] sm:$0xff] %vm552_vm1, %v4996_v21 }
 0x158   :  { %v1050_v22 = vpop.f32.mrf.mxu0 }
 0x159   :  { %1265 = vst.msk [vmem:[#allocation4 + $0x30] sm:$0xff] %vm552_vm1, %v1050_v22 }
 0x15a   :  { %v4999_v23 = vpop.f32.mrf.mxu0 }
 0x15b   :  { %1268 = vst.msk [vmem:[#allocation4 + $0x48] sm:$0xff] %vm552_vm1, %v4999_v23 }
 0x15c   :  { %v1060_v24 = vpop.f32.mrf.mxu0 }
 0x15d   :  { %1267 = vst.msk [vmem:[#allocation4 + $0x40] sm:$0xff] %vm552_vm1, %v1060_v24 }
 0x15e   :  { %v5002_v25 = vpop.f32.mrf.mxu0 }
 0x15f   :  { %1270 = vst.msk [vmem:[#allocation4 + $0x58] sm:$0xff] %vm552_vm1, %v5002_v25 }
 0x160   :  { %v1070_v26 = vpop.f32.mrf.mxu0 }
 0x161   :  { %1269 = vst.msk [vmem:[#allocation4 + $0x50] sm:$0xff] %vm552_vm1, %v1070_v26 }
 0x162   :  { %v5005_v27 = vpop.f32.mrf.mxu0 }
 0x163   :  { %1272 = vst.msk [vmem:[#allocation4 + $0x68] sm:$0xff] %vm552_vm1, %v5005_v27 }
 0x164   :  { %v1080_v28 = vpop.f32.mrf.mxu0 }
 0x165   :  { %1271 = vst.msk [vmem:[#allocation4 + $0x60] sm:$0xff] %vm552_vm1, %v1080_v28 }
 0x166   :  { %v5008_v29 = vpop.f32.mrf.mxu0 }
 0x167   :  { %1274 = vst.msk [vmem:[#allocation4 + $0x78] sm:$0xff] %vm552_vm1, %v5008_v29 }
 0x168   :  { %v1090_v30 = vpop.f32.mrf.mxu0 }
 0x169   :  { %1273 = vst.msk [vmem:[#allocation4 + $0x70] sm:$0xff] %vm552_vm1, %v1090_v30 }
 0x16a   :  { %v5011_v31 = vpop.f32.mrf.mxu0 }
 0x16b   :  { %1276 = vst.msk [vmem:[#allocation4 + $0x88] sm:$0xff] %vm552_vm1, %v5011_v31  ;;  %v1339_v31 = vld [vmem:[#allocation4 + $0x28] sm:$0xff] }
 0x16c   :  { %v1100_v32 = vpop.f32.mrf.mxu0  ;;  %5078 = vmatprep.subr.mxu1 %v1339_v31 }
 0x16d   :  { %1275 = vst.msk [vmem:[#allocation4 + $0x80] sm:$0xff] %vm552_vm1, %v1100_v32  ;;  %v1338_v32 = vld [vmem:[#allocation4 + $0x20] sm:$0xff]  ;;  %5079 = vmatpush3.msra.mxu1 %v1339_v31 }
 0x16e   :  { %v5014_v33 = vpop.f32.mrf.mxu0  ;;  %5080 = vmatprep.subr.mxu1 %v1338_v32 }
 0x16f   :  { %1278 = vst.msk [vmem:[#allocation4 + $0x98] sm:$0xff] %vm552_vm1, %v5014_v33  ;;  %v1337_v33 = vld [vmem:[#allocation4 + $0x18] sm:$0xff]  ;;  %5081 = vmatpush3.msra.mxu1 %v1338_v32 }
 0x170   :  { %v1110_v34 = vpop.f32.mrf.mxu0  ;;  %5082 = vmatprep.subr.mxu1 %v1337_v33 }
 0x171   :  { %1277 = vst.msk [vmem:[#allocation4 + $0x90] sm:$0xff] %vm552_vm1, %v1110_v34  ;;  %v1336_v34 = vld [vmem:[#allocation4 + $0x10] sm:$0xff]  ;;  %5083 = vmatpush3.msra.mxu1 %v1337_v33 }
 0x172   :  { %v5017_v35 = vpop.f32.mrf.mxu0  ;;  %5084 = vmatprep.subr.mxu1 %v1336_v34 }
 0x173   :  { %1280 = vst.msk [vmem:[#allocation4 + $0xa8] sm:$0xff] %vm552_vm1, %v5017_v35  ;;  %v1335_v35 = vld [vmem:[#allocation4 + $0x8] sm:$0xff]  ;;  %5085 = vmatpush3.msra.mxu1 %v1336_v34 }
 0x174   :  { %v1120_v36 = vpop.f32.mrf.mxu0  ;;  %5086 = vmatprep.subr.mxu1 %v1335_v35 }
 0x175   :  { %1279 = vst.msk [vmem:[#allocation4 + $0xa0] sm:$0xff] %vm552_vm1, %v1120_v36  ;;  %v1334_v36 = vld [vmem:[#allocation4] sm:$0xff]  ;;  %5087 = vmatpush3.msra.mxu1 %v1335_v35  ;;  %v1674_v35 = vld [vmem:[#allocation2 + $0x48] sm:$0xff] }
 0x176   :  { %v5020_v37 = vpop.f32.mrf.mxu0  ;;  %5088 = vmatprep.subr.mxu1 %v1334_v36 }
 0x177   :  { %1282 = vst.msk [vmem:[#allocation4 + $0xb8] sm:$0xff] %vm552_vm1, %v5020_v37  ;;  %v6346_v37 = vld [vmem:[#allocation2 + $0x58] sm:$0xff]  ;;  %5089 = vmatpush3.msra.mxu1 %v1334_v36 }
 0x178   :  { %v1130_v38 = vpop.f32.mrf.mxu0  ;;  %5099 = vmatprep.subr.msk.mxu1 %vm552_vm1, %v6346_v37 }
 0x179   :  { %1281 = vst.msk [vmem:[#allocation4 + $0xb0] sm:$0xff] %vm552_vm1, %v1130_v38 }
 0x17a   :  { %v5023_v39 = vpop.f32.mrf.mxu0 }
 0x17b   :  { %1284 = vst.msk [vmem:[#allocation4 + $0xc8] sm:$0xff] %vm552_vm1, %v5023_v39 }
 0x17c   :  { %v1140_v40 = vpop.f32.mrf.mxu0 }
 0x17d   :  { %1283 = vst.msk [vmem:[#allocation4 + $0xc0] sm:$0xff] %vm552_vm1, %v1140_v40 }
 0x17e   :  { %v5026_v41 = vpop.f32.mrf.mxu0 }
 0x17f   :  { %1286 = vst.msk [vmem:[#allocation4 + $0xd8] sm:$0xff] %vm552_vm1, %v5026_v41 }
 0x180   :  { %v1150_v42 = vpop.f32.mrf.mxu0 }
 0x181   :  { %1285 = vst.msk [vmem:[#allocation4 + $0xd0] sm:$0xff] %vm552_vm1, %v1150_v42 }
 0x182   :  { %v5029_v43 = vpop.f32.mrf.mxu0 }
 0x183   :  { %1288 = vst.msk [vmem:[#allocation4 + $0xe8] sm:$0xff] %vm552_vm1, %v5029_v43 }
 0x184   :  { %v1160_v44 = vpop.f32.mrf.mxu0 }
 0x185   :  { %1287 = vst.msk [vmem:[#allocation4 + $0xe0] sm:$0xff] %vm552_vm1, %v1160_v44 }
 0x186   :  { %v5032_v45 = vpop.f32.mrf.mxu0 }
 0x187   :  { %1290 = vst.msk [vmem:[#allocation4 + $0xf8] sm:$0xff] %vm552_vm1, %v5032_v45 }
 0x188   :  { %v1170_v46 = vpop.f32.mrf.mxu0 }
 0x189   :  { %1289 = vst.msk [vmem:[#allocation4 + $0xf0] sm:$0xff] %vm552_vm1, %v1170_v46 }
 0x18a   :  { %v5035_v47 = vpop.f32.mrf.mxu0 }
 0x18b   :  { %1292 = vst.msk [vmem:[#allocation4 + $0x108] sm:$0xff] %vm552_vm1, %v5035_v47 }
 0x18c   :  { %v1180_v48 = vpop.f32.mrf.mxu0 }
 0x18d   :  { %1291 = vst.msk [vmem:[#allocation4 + $0x100] sm:$0xff] %vm552_vm1, %v1180_v48 }
 0x18e   :  { %v5038_v49 = vpop.f32.mrf.mxu0  ;;  %v3055_v55 = vld [vmem:[#allocation4 + $0xf8] sm:$0xff] }
 0x18f   :  { %1294 = vst.msk [vmem:[#allocation4 + $0x118] sm:$0xff] %vm552_vm1, %v5038_v49 }
 0x190   :  { %v1190_v50 = vpop.f32.mrf.mxu0  ;;  %v3054_v58 = vld [vmem:[#allocation4 + $0xf0] sm:$0xff] }
 0x191   :  { %1293 = vst.msk [vmem:[#allocation4 + $0x110] sm:$0xff] %vm552_vm1, %v1190_v50 }
 0x192   :  { %v5041_v51 = vpop.f32.mrf.mxu0  ;;  %v3057_v47 = vld [vmem:[#allocation4 + $0x108] sm:$0xff] }
 0x193   :  { %1296 = vst.msk [vmem:[#allocation4 + $0x128] sm:$0xff] %vm552_vm1, %v5041_v51 }
 0x194   :  { %v1200_v53 = vpop.f32.mrf.mxu0  ;;  %v3056_v50 = vld [vmem:[#allocation4 + $0x100] sm:$0xff] }
 0x195   :  { %1295 = vst.msk [vmem:[#allocation4 + $0x120] sm:$0xff] %vm552_vm1, %v1200_v53 }
 0x196   :  { %v5044_v54 = vpop.f32.mrf.mxu0  ;;  %v3059_v40 = vld [vmem:[#allocation4 + $0x118] sm:$0xff] }
 0x197   :  { %1298 = vst.msk [vmem:[#allocation4 + $0x138] sm:$0xff] %vm552_vm1, %v5044_v54  ;;  %5288 = vmatprep.subr.mxu0 %v3059_v40 }
 0x198   :  { %v1210_v56 = vpop.f32.mrf.mxu0  ;;  %5289 = vmatpush3.msra.mxu0 %v3059_v40  ;;  %v3058_v42 = vld [vmem:[#allocation4 + $0x110] sm:$0xff] }
 0x199   :  { %1297 = vst.msk [vmem:[#allocation4 + $0x130] sm:$0xff] %vm552_vm1, %v1210_v56  ;;  %5290 = vmatprep.subr.mxu0 %v3058_v42  ;;  %v1671_v40 = vld [vmem:[#allocation2 + $0x30] sm:$0xff] }
 0x19a   :  { %v5047_v57 = vpop.f32.mrf.mxu0  ;;  %5291 = vmatpush3.msra.mxu0 %v3058_v42  ;;  %v1665_v42 = vld [vmem:[#allocation3 + $0x38] sm:$0xff] }
 0x19b   :  { %1300 = vst.msk [vmem:[#allocation4 + $0x148] sm:$0xff] %vm552_vm1, %v5047_v57  ;;  %5292 = vmatprep.subr.mxu0 %v3057_v47 }
 0x19c   :  { %v1220_v60 = vpop.f32.mrf.mxu0  ;;  %5293 = vmatpush3.msra.mxu0 %v3057_v47  ;;  %v1680_v47 = vld [vmem:[#allocation4 + $0x40] sm:$0xff] }
 0x19d   :  { %1299 = vst.msk [vmem:[#allocation4 + $0x140] sm:$0xff] %vm552_vm1, %v1220_v60  ;;  %5294 = vmatprep.subr.mxu0 %v3056_v50 }
 0x19e   :  { %v5050_v1 = vpop.f32.mrf.mxu0  ;;  %5295 = vmatpush3.msra.mxu0 %v3056_v50  ;;  %v1669_v50 = vld [vmem:[#allocation3 + $0x58] sm:$0xff] }
 0x19f   :  { %1302 = vst.msk [vmem:[#allocation4 + $0x158] sm:$0xff] %vm552_vm1, %v5050_v1  ;;  %5296 = vmatprep.subr.mxu0 %v3055_v55 }
 0x1a0   :  { %v1230_v5 = vpop.f32.mrf.mxu0  ;;  %5297 = vmatpush3.msra.mxu0 %v3055_v55 }
 0x1a1   :  { %1301 = vst.msk [vmem:[#allocation4 + $0x150] sm:$0xff] %vm552_vm1, %v1230_v5  ;;  %5298 = vmatprep.subr.mxu0 %v3054_v58 }
 0x1a2   :  { %v5053_v12 = vpop.f32.mrf.mxu0  ;;  %5299 = vmatpush3.msra.mxu0 %v3054_v58 }
 0x1a3   :  { %1304 = vst.msk [vmem:[#allocation4 + $0x168] sm:$0xff] %vm552_vm1, %v5053_v12  ;;  %5309 = vmatprep.subr.msk.mxu0 %vm552_vm1, %v3396_v61 }
 0x1a4   :  { %v1240_v15 = vpop.f32.mrf.mxu0 }
 0x1a5   :  { %1303 = vst.msk [vmem:[#allocation4 + $0x160] sm:$0xff] %vm552_vm1, %v1240_v15 }
 0x1a6   :  { %v5056_v23 = vpop.f32.mrf.mxu0 }
 0x1a7   :  { %1306 = vst.msk [vmem:[#allocation4 + $0x178] sm:$0xff] %vm552_vm1, %v5056_v23 }
 0x1a8   :  { %v1250_v26 = vpop.f32.mrf.mxu0 }
 0x1a9   :  { %1305 = vst.msk [vmem:[#allocation4 + $0x170] sm:$0xff] %vm552_vm1, %v1250_v26 }
 0x1c9   :  { %v5071_v62 = vpop.f32.mrf.mxu1 }
 0x1ca   :  { %v6312_v13 = vsel %vm6294_vm3, %v5071_v62, -inf }
 0x1cb   :  { %v1442_v4 = vpop.f32.mrf.mxu1  ;;  %v1481_v20 = vsel %vm1477_vm5, %v6312_v13, -inf }
 0x1cc   :  { %v1471_v3 = vsel %vm6289_vm2, %v1442_v4, -inf }
 0x1cd   :  { %v5074_v7 = vpop.f32.mrf.mxu1  ;;  %v1478_v8 = vsel %vm1477_vm5, %v1471_v3, -inf }
 0x1ce   :  { %1479 = vmax.xlane.f32.xlu0 %v1478_v8  ;;  %v6317_v16 = vsel %vm6300_vm4, %v5074_v7, -inf }
 0x1cf   :  { %v1452_v14 = vpop.f32.mrf.mxu1  ;;  %v1487_v25 = vsel %vm1477_vm5, %v6317_v16, -inf }
 0x1d0   :  { %v1473_v17 = vsel %vm6306_vm6, %v1452_v14, -inf }
 0x1d1   :  { %v5077_v19 = vpop.f32.mrf.mxu1  ;;  %v1484_v21 = vsel %vm1477_vm5, %v1473_v17, -inf }
 0x1d2   :  { %1482 = vmax.xlane.f32.xlu0 %v1481_v20  ;;  %1485 = vmax.xlane.f32.xlu1 %v1484_v21  ;;  %v6338_v27 = vsel %vm6322_vm7, %v5077_v19, -inf }
 0x1d3   :  { %v1462_v24 = vpop.f32.mrf.mxu1  ;;  %v1493_v30 = vsel %vm1477_vm5, %v6338_v27, -inf }
 0x1d4   :  { %v1475_v28 = vsel %vm6329_vm8, %v1462_v24, -inf }
 0x1d5   :  { %v1490_v29 = vsel %vm1477_vm5, %v1475_v28, -inf }
 0x1d6   :  { %1488 = vmax.xlane.f32.xlu1 %v1487_v25  ;;  %1491 = vmax.xlane.f32.xlu0 %v1490_v29 }
 0x1da   :  { %1494 = vmax.xlane.f32.xlu1 %v1493_v30  ;;  %v1675_v30 = vld [vmem:[#allocation2 + $0x50] sm:$0xff] }
 0x257   :  { %v1480_v38 = vpop.xlane.xlu0 %1479 }
 0x258   :  { %v1496_v39 = vsub.f32 %v1471_v3, %v1480_v38  ;;  %v1673_v38 = vld [vmem:[#allocation2 + $0x40] sm:$0xff] }
 0x25a   :  { %v1502_v41 = vmul.f32 1.442695, %v1496_v39  ;;  %v1672_v39 = vld [vmem:[#allocation2 + $0x38] sm:$0xff] }
 0x25b   :  { %v1483_v43 = vpop.xlane.xlu0 %1482  ;;  %v1486_v44 = vpop.xlane.xlu1 %1485 }
 0x25c   :  { %5396 = vpow2.f32 %v1502_v41  ;;  %v1497_v45 = vsub.f32 %v6312_v13, %v1483_v43  ;;  %v1498_v46 = vsub.f32 %v1473_v17, %v1486_v44  ;;  %v1683_v41 = vld [vmem:[#allocation4 + $0x58] sm:$0xff]  ;;  %v1682_v43 = vld [vmem:[#allocation4 + $0x50] sm:$0xff]  ;;  %v1666_v44 = vld [vmem:[#allocation3 + $0x40] sm:$0xff] }
 0x25e   :  { %v1504_v48 = vmul.f32 1.442695, %v1497_v45  ;;  %v1506_v49 = vmul.f32 1.442695, %v1498_v46  ;;  %v1681_v45 = vld [vmem:[#allocation4 + $0x48] sm:$0xff] }
 0x25f   :  { %v1489_v51 = vpop.xlane.xlu1 %1488  ;;  %v1492_v52 = vpop.xlane.xlu0 %1491  ;;  %v1667_v46 = vld [vmem:[#allocation3 + $0x48] sm:$0xff] }
 0x260   :  { %5398 = vpow2.f32 %v1504_v48  ;;  %v1499_v53 = vsub.f32 %v6317_v16, %v1489_v51  ;;  %v1500_v54 = vsub.f32 %v1475_v28, %v1492_v52  ;;  %v1668_v48 = vld [vmem:[#allocation3 + $0x50] sm:$0xff]  ;;  %v6384_v52 = vld [vmem:[#allocation2 + $0x88] sm:$0xff] }
 0x261   :  { %5400 = vpow2.f32 %v1506_v49  ;;  %v1679_v49 = vld [vmem:[#allocation4 + $0x38] sm:$0xff]  ;;  %v1678_v51 = vld [vmem:[#allocation4 + $0x30] sm:$0xff] }
 0x262   :  { %v1508_v56 = vmul.f32 1.442695, %v1499_v53  ;;  %v1510_v57 = vmul.f32 1.442695, %v1500_v54 }
 0x263   :  { %v1495_v59 = vpop.xlane.xlu1 %1494 }
 0x264   :  { %5402 = vpow2.f32 %v1508_v56  ;;  %v1501_v60 = vsub.f32 %v6338_v27, %v1495_v59 }
 0x265   :  { %5404 = vpow2.f32 %v1510_v57 }
 0x266   :  { %v1512_v62 = vmul.f32 1.442695, %v1501_v60 }
 0x268   :  { %5406 = vpow2.f32 %v1512_v62 }
 0x269   :  { %v5397_v0 = vpop.eup %5396 }
 0x26a   :  { %v1514_v1 = vsel %vm1477_vm5, %v5397_v0, 0.0 }
 0x26b   :  { %1515 = vadd.xlane.f32.xlu0 %v1514_v1 }
 0x26d   :  { %v5399_v4 = vpop.eup %5398 }
 0x26e   :  { %v5401_v5 = vpop.eup %5400  ;;  %v1517_v3 = vsel %vm1477_vm5, %v5399_v4, 0.0 }
 0x26f   :  { %1518 = vadd.xlane.f32.xlu1 %v1517_v3  ;;  %v1520_v7 = vsel %vm1477_vm5, %v5401_v5, 0.0 }
 0x270   :  { %1521 = vadd.xlane.f32.xlu0 %v1520_v7 }
 0x271   :  { %v5403_v8 = vpop.eup %5402 }
 0x272   :  { %v5405_v10 = vpop.eup %5404  ;;  %v1523_v11 = vsel %vm1477_vm5, %v5403_v8, 0.0 }
 0x273   :  { %1524 = vadd.xlane.f32.xlu1 %v1523_v11  ;;  %v1526_v12 = vsel %vm1477_vm5, %v5405_v10, 0.0 }
 0x274   :  { %1527 = vadd.xlane.f32.xlu0 %v1526_v12 }
 0x275   :  { %v5407_v13 = vpop.eup %5406 }
 0x276   :  { %v1529_v14 = vsel %vm1477_vm5, %v5407_v13, 0.0 }
 0x277   :  { %1530 = vadd.xlane.f32.xlu1 %v1529_v14 }
 0x2f4   :  { %v1516_v15 = vpop.xlane.xlu0 %1515 }
 0x2f5   :  { %5408 = vrcp.f32 %v1516_v15 }
 0x2f8   :  { %v1519_v16 = vpop.xlane.xlu1 %1518 }
 0x2f9   :  { %5410 = vrcp.f32 %v1519_v16  ;;  %v1522_v17 = vpop.xlane.xlu0 %1521 }
 0x2fa   :  { %5412 = vrcp.f32 %v1522_v17 }
 0x2fc   :  { %v1525_v19 = vpop.xlane.xlu1 %1524 }
 0x2fd   :  { %5414 = vrcp.f32 %v1525_v19  ;;  %v1528_v20 = vpop.xlane.xlu0 %1527 }
 0x2fe   :  { %5416 = vrcp.f32 %v1528_v20 }
 0x300   :  { %v1531_v21 = vpop.xlane.xlu1 %1530 }
 0x301   :  { %5418 = vrcp.f32 %v1531_v21 }
 0x302   :  { %v5409_v23 = vpop.eup %5408 }
 0x303   :  { %v1533_v24 = vmul.f32 %v5409_v23, %v5397_v0 }
 0x305   :  { %5090 = vmatprep.mubr.msk.f32.mxu1 %vm1477_vm5, %v1533_v24 }
 0x306   :  { %v5411_v25 = vpop.eup %5410 }
 0x307   :  { %v5413_v26 = vpop.eup %5412  ;;  %v1535_v27 = vmul.f32 %v5411_v25, %v5399_v4 }
 0x308   :  { %v1537_v28 = vmul.f32 %v5413_v26, %v5401_v5 }
 0x309   :  { %5091 = vmatmul.mubr.msk.f32.vlgmr.msra.gmra.mxu1 %vm1477_vm5, %v1535_v27 }
 0x30a   :  { %v5415_v29 = vpop.eup %5414  ;;  %5100 = vmatpush3.xpose.msk.msra.mxu1 %vm552_vm1, %v6346_v37  ;;  %5093 = vmatprep.mubr.msk.f32.mxu1 %vm1477_vm5, %v1537_v28  ;;  %v1664_v37 = vld [vmem:[#allocation3 + $0x30] sm:$0xff] }
 0x30b   :  { %v5417_v31 = vpop.eup %5416  ;;  %5101 = vmatprep.subr.msk.mxu1 %vm552_vm1, %v1675_v30  ;;  %v1539_v32 = vmul.f32 %v5415_v29, %v5403_v8 }
 0x30c   :  { %v1541_v33 = vmul.f32 %v5417_v31, %v5405_v10 }
 0x30d   :  { %5094 = vmatmul.mubr.msk.f32.gmra.mxu1 %vm1477_vm5, %v1539_v32 }
 0x30e   :  { %v5419_v34 = vpop.eup %5418  ;;  %5102 = vmatpush3.xpose.msk.msra.mxu1 %vm552_vm1, %v1675_v30  ;;  %5096 = vmatprep.mubr.msk.f32.mxu1 %vm1477_vm5, %v1541_v33 }
 0x30f   :  { %5103 = vmatprep.subr.msk.mxu1 %vm552_vm1, %v1674_v35  ;;  %v1543_v36 = vmul.f32 %v5419_v34, %v5407_v13 }
 0x311   :  { %5097 = vmatmul.mubr.msk.f32.gmra.mxu1 %vm1477_vm5, %v1543_v36 }
 0x312   :  { %5104 = vmatpush3.xpose.msk.msra.mxu1 %vm552_vm1, %v1674_v35  ;;  %5111 = vmatprep.mubr.msk.f32.mxu1 %vm552_vm1, %v1664_v37 }
 0x313   :  { %5105 = vmatprep.subr.msk.mxu1 %vm552_vm1, %v1673_v38 }
 0x316   :  { %5106 = vmatpush3.xpose.msk.msra.mxu1 %vm552_vm1, %v1673_v38 }
 0x317   :  { %5107 = vmatprep.subr.msk.mxu1 %vm552_vm1, %v1672_v39 }
 0x31a   :  { %5108 = vmatpush3.xpose.msk.msra.mxu1 %vm552_vm1, %v1672_v39 }
 0x31b   :  { %5109 = vmatprep.subr.msk.mxu1 %vm552_vm1, %v1671_v40 }
 0x31e   :  { %5110 = vmatpush3.xpose.msk.msra.mxu1 %vm552_vm1, %v1671_v40 }
 0x31f   :  { %5120 = vmatprep.subr.mxu1 %v1683_v41 }
 0x321   :  { %5112 = vmatmul.mubr.msk.f32.vlgmr.msra.gmra.mxu1 %vm552_vm1, %v1665_v42 }
 0x322   :  { %5114 = vmatprep.mubr.msk.f32.mxu1 %vm552_vm1, %v1666_v44  ;;  %5121 = vmatpush3.msra.mxu1 %v1683_v41 }
 0x323   :  { %5122 = vmatprep.subr.mxu1 %v1682_v43 }
 0x324   :  { %5123 = vmatpush3.msra.mxu1 %v1682_v43 }
 0x325   :  { %5115 = vmatmul.mubr.msk.f32.gmra.mxu1 %vm552_vm1, %v1667_v46  ;;  %5124 = vmatprep.subr.mxu1 %v1681_v45 }
 0x326   :  { %5117 = vmatprep.mubr.msk.f32.mxu1 %vm552_vm1, %v1668_v48  ;;  %5125 = vmatpush3.msra.mxu1 %v1681_v45 }
 0x327   :  { %5126 = vmatprep.subr.mxu1 %v1680_v47 }
 0x328   :  { %5127 = vmatpush3.msra.mxu1 %v1680_v47 }
 0x329   :  { %5118 = vmatmul.mubr.msk.f32.gmra.mxu1 %vm552_vm1, %v1669_v50  ;;  %5128 = vmatprep.subr.mxu1 %v1679_v49 }
 0x32a   :  { %5129 = vmatpush3.msra.mxu1 %v1679_v49 }
 0x32b   :  { %5130 = vmatprep.subr.mxu1 %v1678_v51 }
 0x32c   :  { %5131 = vmatpush3.msra.mxu1 %v1678_v51 }
 0x32d   :  { %5141 = vmatprep.subr.msk.mxu1 %vm552_vm1, %v6384_v52 }
 0x3c9   :  { %v5092_v53 = vpop.f32.mrf.mxu1 }
 0x3ca   :  { %1658 = vst.msk [vmem:[%s7015_s2 + $0x8] sm:$0xff] %vm552_vm1, %v5092_v53 }
 0x3cb   :  { %v1628_v54 = vpop.f32.mrf.mxu1 }
 0x3cc   :  { %1657 = vst.msk [vmem:[%s7015_s2] sm:$0xff] %vm552_vm1, %v1628_v54 }
 0x3cd   :  { %v5095_v55 = vpop.f32.mrf.mxu1 }
 0x3ce   :  { %1660 = vst.msk [vmem:[%s7015_s2 + $0x18] sm:$0xff] %vm552_vm1, %v5095_v55 }
 0x3cf   :  { %v1638_v56 = vpop.f32.mrf.mxu1 }
 0x3d0   :  { %1659 = vst.msk [vmem:[%s7015_s2 + $0x10] sm:$0xff] %vm552_vm1, %v1638_v56 }
 0x3d1   :  { %v5098_v57 = vpop.f32.mrf.mxu1 }
 0x3d2   :  { %1662 = vst.msk [vmem:[%s7015_s2 + $0x28] sm:$0xff] %vm552_vm1, %v5098_v57 }
 0x3d3   :  { %v1648_v58 = vpop.f32.mrf.mxu1 }
 0x3d4   :  { %1661 = vst.msk [vmem:[%s7015_s2 + $0x20] sm:$0xff] %vm552_vm1, %v1648_v58 }
 0x3e1   :  { %v5113_v59 = vpop.f32.mrf.mxu1 }
 0x3e2   :  { %v1816_v60 = vsel %vm6294_vm3, %v5113_v59, -inf }
 0x3e3   :  { %v1786_v61 = vpop.f32.mrf.mxu1  ;;  %v1824_v62 = vsel %vm1477_vm5, %v1816_v60, -inf }
 0x3e4   :  { %v1815_v0 = vsel %vm6289_vm2, %v1786_v61, -inf  ;;  %1825 = vmax.xlane.f32.xlu1 %v1824_v62  ;;  %v2019_v62 = vld [vmem:[#allocation2 + $0x80] sm:$0xff] }
 0x3e5   :  { %v5116_v1 = vpop.f32.mrf.mxu1  ;;  %v1821_v4 = vsel %vm1477_vm5, %v1815_v0, -inf }
 0x3e6   :  { %v1818_v5 = vsel %vm6300_vm4, %v5116_v1, -inf  ;;  %1822 = vmax.xlane.f32.xlu0 %v1821_v4 }
 0x3e7   :  { %v1796_v3 = vpop.f32.mrf.mxu1  ;;  %v1830_v7 = vsel %vm1477_vm5, %v1818_v5, -inf }
 0x3e8   :  { %v1817_v8 = vsel %vm6306_vm6, %v1796_v3, -inf  ;;  %1831 = vmax.xlane.f32.xlu1 %v1830_v7  ;;  %v2018_v3 = vld [vmem:[#allocation2 + $0x78] sm:$0xff] }
 0x3e9   :  { %v5119_v10 = vpop.f32.mrf.mxu1  ;;  %v1827_v11 = vsel %vm1477_vm5, %v1817_v8, -inf }
 0x3ea   :  { %v1820_v12 = vsel %vm6322_vm7, %v5119_v10, -inf  ;;  %1828 = vmax.xlane.f32.xlu0 %v1827_v11  ;;  %v2017_v10 = vld [vmem:[#allocation2 + $0x70] sm:$0xff]  ;;  %v2016_v11 = vld [vmem:[#allocation2 + $0x68] sm:$0xff] }
 0x3eb   :  { %v1806_v13 = vpop.f32.mrf.mxu1  ;;  %v1836_v14 = vsel %vm1477_vm5, %v1820_v12, -inf }
 0x3ec   :  { %v1819_v15 = vsel %vm6329_vm8, %v1806_v13, -inf  ;;  %1837 = vmax.xlane.f32.xlu1 %v1836_v14  ;;  %v2027_v13 = vld [vmem:[#allocation4 + $0x88] sm:$0xff] }
 0x3ed   :  { %v1833_v16 = vsel %vm1477_vm5, %v1819_v15, -inf  ;;  %v2009_v14 = vld [vmem:[#allocation3 + $0x68] sm:$0xff] }
 0x3ee   :  { %1834 = vmax.xlane.f32.xlu0 %v1833_v16  ;;  %v2010_v16 = vld [vmem:[#allocation3 + $0x70] sm:$0xff] }
 0x46d   :  { %v1826_v17 = vpop.xlane.xlu1 %1825 }
 0x46e   :  { %v1840_v19 = vsub.f32 %v1816_v60, %v1826_v17  ;;  %v2025_v17 = vld [vmem:[#allocation4 + $0x78] sm:$0xff] }
 0x46f   :  { %v1823_v20 = vpop.xlane.xlu0 %1822 }
 0x470   :  { %v1847_v21 = vmul.f32 1.442695, %v1840_v19  ;;  %v1839_v23 = vsub.f32 %v1815_v0, %v1823_v20  ;;  %v2011_v19 = vld [vmem:[#allocation3 + $0x78] sm:$0xff]  ;;  %v2024_v20 = vld [vmem:[#allocation4 + $0x70] sm:$0xff] }
 0x471   :  { %v1832_v24 = vpop.xlane.xlu1 %1831 }
 0x472   :  { %5420 = vpow2.f32 %v1847_v21  ;;  %v1845_v25 = vmul.f32 1.442695, %v1839_v23  ;;  %v1842_v26 = vsub.f32 %v1818_v5, %v1832_v24  ;;  %v2012_v21 = vld [vmem:[#allocation3 + $0x80] sm:$0xff]  ;;  %v2023_v23 = vld [vmem:[#allocation4 + $0x68] sm:$0xff] }
 0x473   :  { %v1829_v27 = vpop.xlane.xlu0 %1828  ;;  %v2013_v24 = vld [vmem:[#allocation3 + $0x88] sm:$0xff] }
 0x474   :  { %5422 = vpow2.f32 %v1845_v25  ;;  %v1851_v28 = vmul.f32 1.442695, %v1842_v26  ;;  %v1841_v29 = vsub.f32 %v1817_v8, %v1829_v27  ;;  %v2022_v25 = vld [vmem:[#allocation4 + $0x60] sm:$0xff]  ;;  %v6460_v26 = vld [vmem:[#allocation4 + $0xb8] sm:$0xff] }
 0x475   :  { %v1838_v30 = vpop.xlane.xlu1 %1837 }
 0x476   :  { %5424 = vpow2.f32 %v1851_v28  ;;  %v1849_v31 = vmul.f32 1.442695, %v1841_v29  ;;  %v1844_v32 = vsub.f32 %v1820_v12, %v1838_v30  ;;  %v2015_v12 = vld [vmem:[#allocation2 + $0x60] sm:$0xff] }
 0x477   :  { %v1835_v33 = vpop.xlane.xlu0 %1834 }
 0x478   :  { %5426 = vpow2.f32 %v1849_v31  ;;  %v1855_v34 = vmul.f32 1.442695, %v1844_v32  ;;  %v1843_v35 = vsub.f32 %v1819_v15, %v1835_v33  ;;  %v2026_v15 = vld [vmem:[#allocation4 + $0x80] sm:$0xff]  ;;  %v5197_v32 = vpop.f32.mrf.mxu0 }
 0x47a   :  { %5428 = vpow2.f32 %v1855_v34  ;;  %v1853_v36 = vmul.f32 1.442695, %v1843_v35  ;;  %v2474_v34 = vpop.f32.mrf.mxu0 }
 0x47c   :  { %5430 = vpow2.f32 %v1853_v36  ;;  %v5200_v35 = vpop.f32.mrf.mxu0 }
 0x47e   :  { %v2484_v36 = vpop.f32.mrf.mxu0 }
 0x47f   :  { %v5421_v37 = vpop.eup %5420 }
 0x480   :  { %v1860_v38 = vsel %vm1477_vm5, %v5421_v37, 0.0 }
 0x481   :  { %v5423_v39 = vpop.eup %5422  ;;  %1861 = vadd.xlane.f32.xlu1 %v1860_v38 }
 0x482   :  { %v1857_v40 = vsel %vm1477_vm5, %v5423_v39, 0.0 }
 0x483   :  { %v5425_v41 = vpop.eup %5424  ;;  %1858 = vadd.xlane.f32.xlu0 %v1857_v40 }
 0x484   :  { %v1866_v42 = vsel %vm1477_vm5, %v5425_v41, 0.0 }
 0x485   :  { %v5427_v43 = vpop.eup %5426  ;;  %1867 = vadd.xlane.f32.xlu1 %v1866_v42 }
 0x486   :  { %v1863_v44 = vsel %vm1477_vm5, %v5427_v43, 0.0 }
 0x487   :  { %v5429_v45 = vpop.eup %5428  ;;  %1864 = vadd.xlane.f32.xlu0 %v1863_v44 }
 0x488   :  { %v1872_v46 = vsel %vm1477_vm5, %v5429_v45, 0.0 }
 0x489   :  { %v5431_v47 = vpop.eup %5430  ;;  %1873 = vadd.xlane.f32.xlu1 %v1872_v46 }
 0x48a   :  { %v1869_v48 = vsel %vm1477_vm5, %v5431_v47, 0.0 }
 0x48b   :  { %1870 = vadd.xlane.f32.xlu0 %v1869_v48 }
 0x50a   :  { %v1862_v49 = vpop.xlane.xlu1 %1861 }
 0x50b   :  { %5432 = vrcp.f32 %v1862_v49 }
 0x50c   :  { %v1859_v50 = vpop.xlane.xlu0 %1858 }
 0x50d   :  { %5434 = vrcp.f32 %v1859_v50 }
 0x50e   :  { %v1868_v51 = vpop.xlane.xlu1 %1867 }
 0x50f   :  { %5436 = vrcp.f32 %v1868_v51 }
 0x510   :  { %v1865_v53 = vpop.xlane.xlu0 %1864 }
 0x511   :  { %5438 = vrcp.f32 %v1865_v53 }
 0x512   :  { %v1874_v54 = vpop.xlane.xlu1 %1873 }
 0x513   :  { %5440 = vrcp.f32 %v1874_v54 }
 0x514   :  { %v1871_v55 = vpop.xlane.xlu0 %1870 }
 0x515   :  { %5442 = vrcp.f32 %v1871_v55 }
 0x518   :  { %v5433_v56 = vpop.eup %5432 }
 0x519   :  { %v1878_v59 = vmul.f32 %v5433_v56, %v5421_v37 }
 0x51a   :  { %v5435_v57 = vpop.eup %5434 }
 0x51b   :  { %v1876_v58 = vmul.f32 %v5435_v57, %v5423_v39  ;;  %v5203_v39 = vpop.f32.mrf.mxu0  ;;  %v6519_v57 = vsel %vm6294_vm3, %v5197_v32, -inf }
 0x51c   :  { %v5437_v60 = vpop.eup %5436 }
 0x51d   :  { %5132 = vmatprep.mubr.msk.f32.mxu1 %vm1477_vm5, %v1876_v58  ;;  %v1882_v1 = vmul.f32 %v5437_v60, %v5425_v41  ;;  %v2494_v46 = vpop.f32.mrf.mxu0  ;;  %v6529_v60 = vsel %vm6289_vm2, %v2474_v34, -inf }
 0x51e   :  { %v5439_v61 = vpop.eup %5438  ;;  %5133 = vmatmul.mubr.msk.f32.vlgmr.msra.gmra.mxu1 %vm1477_vm5, %v1878_v59 }
 0x51f   :  { %5142 = vmatpush3.xpose.msk.msra.mxu1 %vm552_vm1, %v6384_v52  ;;  %v1880_v0 = vmul.f32 %v5439_v61, %v5427_v43  ;;  %v2008_v52 = vld [vmem:[#allocation3 + $0x60] sm:$0xff]  ;;  %v5239_v54 = vpop.f32.mrf.mxu0 }
 0x520   :  { %5143 = vmatprep.subr.msk.mxu1 %vm552_vm1, %v2019_v62  ;;  %v5441_v4 = vpop.eup %5440 }
 0x521   :  { %5135 = vmatprep.mubr.msk.f32.mxu1 %vm1477_vm5, %v1880_v0  ;;  %v1886_v8 = vmul.f32 %v5441_v4, %v5429_v45  ;;  %v2818_v61 = vpop.f32.mrf.mxu0  ;;  %v6535_v0 = vsel %vm6300_vm4, %v5200_v35, -inf  ;;  %v6541_v4 = vsel %vm6306_vm6, %v2484_v36, -inf }
 0x522   :  { %v5443_v5 = vpop.eup %5442  ;;  %5136 = vmatmul.mubr.msk.f32.gmra.mxu1 %vm1477_vm5, %v1882_v1  ;;  %v2509_v1 = vsel %vm1477_vm5, %v6529_v60, -inf }
 0x523   :  { %5144 = vmatpush3.xpose.msk.msra.mxu1 %vm552_vm1, %v2019_v62  ;;  %v1884_v7 = vmul.f32 %v5443_v5, %v5431_v47  ;;  %v2512_v62 = vsel %vm1477_vm5, %v6519_v57, -inf  ;;  %v5242_v5 = vpop.f32.mrf.mxu0 }
 0x524   :  { %5145 = vmatprep.subr.msk.mxu1 %vm552_vm1, %v2018_v3 }
 0x525   :  { %5138 = vmatprep.mubr.msk.f32.mxu1 %vm1477_vm5, %v1884_v7  ;;  %v6547_v7 = vsel %vm6322_vm7, %v5203_v39, -inf }
 0x526   :  { %5139 = vmatmul.mubr.msk.f32.gmra.mxu1 %vm1477_vm5, %v1886_v8  ;;  %v2515_v8 = vsel %vm1477_vm5, %v6541_v4, -inf }
 0x527   :  { %5146 = vmatpush3.xpose.msk.msra.mxu1 %vm552_vm1, %v2018_v3  ;;  %5153 = vmatprep.mubr.msk.f32.mxu1 %vm552_vm1, %v2008_v52  ;;  %v2518_v3 = vsel %vm1477_vm5, %v6535_v0, -inf  ;;  %v6553_v52 = vsel %vm6329_vm8, %v2494_v46, -inf }
 0x528   :  { %5147 = vmatprep.subr.msk.mxu1 %vm552_vm1, %v2017_v10 }
 0x52b   :  { %5148 = vmatpush3.xpose.msk.msra.mxu1 %vm552_vm1, %v2017_v10  ;;  %v2828_v10 = vpop.f32.mrf.mxu0 }
 0x52c   :  { %5149 = vmatprep.subr.msk.mxu1 %vm552_vm1, %v2016_v11 }
 0x52f   :  { %5150 = vmatpush3.xpose.msk.msra.mxu1 %vm552_vm1, %v2016_v11  ;;  %v2524_v11 = vsel %vm1477_vm5, %v6547_v7, -inf }
 0x530   :  { %5151 = vmatprep.subr.msk.mxu1 %vm552_vm1, %v2015_v12 }
 0x533   :  { %5152 = vmatpush3.xpose.msk.msra.mxu1 %vm552_vm1, %v2015_v12  ;;  %v6559_v12 = vsel %vm6294_vm3, %v5239_v54, -inf }
 0x534   :  { %5162 = vmatprep.subr.mxu1 %v2027_v13 }
 0x536   :  { %5154 = vmatmul.mubr.msk.f32.vlgmr.msra.gmra.mxu1 %vm552_vm1, %v2009_v14  ;;  %v6565_v14 = vsel %vm6289_vm2, %v2818_v61, -inf }
 0x537   :  { %5156 = vmatprep.mubr.msk.f32.mxu1 %vm552_vm1, %v2010_v16  ;;  %5163 = vmatpush3.msra.mxu1 %v2027_v13  ;;  %v2521_v13 = vsel %vm1477_vm5, %v6553_v52, -inf  ;;  %v2856_v16 = vsel %vm1477_vm5, %v6559_v12, -inf }
 0x538   :  { %5164 = vmatprep.subr.mxu1 %v2026_v15 }
 0x539   :  { %5165 = vmatpush3.msra.mxu1 %v2026_v15  ;;  %v5245_v15 = vpop.f32.mrf.mxu0 }
 0x53a   :  { %5157 = vmatmul.mubr.msk.f32.gmra.mxu1 %vm552_vm1, %v2011_v19  ;;  %5166 = vmatprep.subr.mxu1 %v2025_v17  ;;  %v2853_v19 = vsel %vm1477_vm5, %v6565_v14, -inf }
 0x53b   :  { %5159 = vmatprep.mubr.msk.f32.mxu1 %vm552_vm1, %v2012_v21  ;;  %5167 = vmatpush3.msra.mxu1 %v2025_v17  ;;  %v6571_v17 = vsel %vm6300_vm4, %v5242_v5, -inf  ;;  %v2838_v21 = vpop.f32.mrf.mxu0 }
 0x53c   :  { %5168 = vmatprep.subr.mxu1 %v2024_v20 }
 0x53d   :  { %5169 = vmatpush3.msra.mxu1 %v2024_v20  ;;  %v6577_v20 = vsel %vm6306_vm6, %v2828_v10, -inf }
 0x53e   :  { %5160 = vmatmul.mubr.msk.f32.gmra.mxu1 %vm552_vm1, %v2013_v24  ;;  %5170 = vmatprep.subr.mxu1 %v2023_v23  ;;  %v6583_v24 = vsel %vm6322_vm7, %v5245_v15, -inf }
 0x53f   :  { %5171 = vmatpush3.msra.mxu1 %v2023_v23  ;;  %v2862_v23 = vsel %vm1477_vm5, %v6571_v17, -inf }
 0x540   :  { %5172 = vmatprep.subr.mxu1 %v2022_v25 }
 0x541   :  { %5173 = vmatpush3.msra.mxu1 %v2022_v25  ;;  %v2859_v25 = vsel %vm1477_vm5, %v6577_v20, -inf }
 0x542   :  { %5204 = vmatprep.subr.mxu1 %v6460_v26 }
 0x5de   :  { %v5134_v27 = vpop.f32.mrf.mxu1 }
 0x5df   :  { %4275 = vst.msk [vmem:[%s7015_s2 + $0x38] sm:$0xff] %vm552_vm1, %v5134_v27  ;;  %v6589_v27 = vsel %vm6329_vm8, %v2838_v21, -inf }
 0x5e0   :  { %v1971_v28 = vpop.f32.mrf.mxu1 }
 0x5e1   :  { %4274 = vst.msk [vmem:[%s7015_s2 + $0x30] sm:$0xff] %vm552_vm1, %v1971_v28  ;;  %v2868_v28 = vsel %vm1477_vm5, %v6583_v24, -inf }
 0x5e2   :  { %v5137_v29 = vpop.f32.mrf.mxu1 }
 0x5e3   :  { %4277 = vst.msk [vmem:[%s7015_s2 + $0x48] sm:$0xff] %vm552_vm1, %v5137_v29  ;;  %v2865_v29 = vsel %vm1477_vm5, %v6589_v27, -inf }
 0x5e4   :  { %v1981_v30 = vpop.f32.mrf.mxu1 }
 0x5e5   :  { %4276 = vst.msk [vmem:[%s7015_s2 + $0x40] sm:$0xff] %vm552_vm1, %v1981_v30 }
 0x5e6   :  { %v5140_v31 = vpop.f32.mrf.mxu1 }
 0x5e7   :  { %4279 = vst.msk [vmem:[%s7015_s2 + $0x58] sm:$0xff] %vm552_vm1, %v5140_v31 }
 0x5e8   :  { %v1991_v33 = vpop.f32.mrf.mxu1 }
 0x5e9   :  { %4278 = vst.msk [vmem:[%s7015_s2 + $0x50] sm:$0xff] %vm552_vm1, %v1991_v33 }
 0x5f6   :  { %v5155_v37 = vpop.f32.mrf.mxu1 }
 0x5f7   :  { %v6489_v38 = vsel %vm6294_vm3, %v5155_v37, -inf }
 0x5f8   :  { %v2130_v40 = vpop.f32.mrf.mxu1  ;;  %v2168_v41 = vsel %vm1477_vm5, %v6489_v38, -inf }
 0x5f9   :  { %v6495_v42 = vsel %vm6289_vm2, %v2130_v40, -inf  ;;  %2169 = vmax.xlane.f32.xlu1 %v2168_v41 }
 0x5fa   :  { %v5158_v43 = vpop.f32.mrf.mxu1  ;;  %v2165_v44 = vsel %vm1477_vm5, %v6495_v42, -inf }
 0x5fb   :  { %v6501_v45 = vsel %vm6300_vm4, %v5158_v43, -inf  ;;  %2166 = vmax.xlane.f32.xlu0 %v2165_v44 }
 0x5fc   :  { %v2140_v47 = vpop.f32.mrf.mxu1  ;;  %v2174_v48 = vsel %vm1477_vm5, %v6501_v45, -inf }
 0x5fd   :  { %v6507_v49 = vsel %vm6306_vm6, %v2140_v47, -inf  ;;  %2175 = vmax.xlane.f32.xlu1 %v2174_v48 }
 0x5fe   :  { %v5161_v50 = vpop.f32.mrf.mxu1  ;;  %v2171_v51 = vsel %vm1477_vm5, %v6507_v49, -inf }
 0x5ff   :  { %v6513_v53 = vsel %vm6322_vm7, %v5161_v50, -inf  ;;  %2172 = vmax.xlane.f32.xlu0 %v2171_v51 }
 0x600   :  { %v2150_v55 = vpop.f32.mrf.mxu1  ;;  %v2180_v56 = vsel %vm1477_vm5, %v6513_v53, -inf }
 0x601   :  { %v6523_v58 = vsel %vm6329_vm8, %v2150_v55, -inf  ;;  %2181 = vmax.xlane.f32.xlu1 %v2180_v56 }
 0x602   :  { %v2177_v59 = vsel %vm1477_vm5, %v6523_v58, -inf }
 0x603   :  { %2178 = vmax.xlane.f32.xlu0 %v2177_v59 }
 0x605   :  { %2513 = vmax.xlane.f32.xlu1 %v2512_v62 }
 0x607   :  { %2510 = vmax.xlane.f32.xlu0 %v2509_v1 }
 0x609   :  { %2519 = vmax.xlane.f32.xlu1 %v2518_v3 }
 0x60b   :  { %2516 = vmax.xlane.f32.xlu0 %v2515_v8 }
 0x60d   :  { %2525 = vmax.xlane.f32.xlu1 %v2524_v11 }
 0x60f   :  { %2522 = vmax.xlane.f32.xlu0 %v2521_v13 }
 0x611   :  { %2857 = vmax.xlane.f32.xlu1 %v2856_v16 }
 0x613   :  { %2854 = vmax.xlane.f32.xlu0 %v2853_v19 }
 0x615   :  { %2863 = vmax.xlane.f32.xlu1 %v2862_v23 }
 0x617   :  { %2860 = vmax.xlane.f32.xlu0 %v2859_v25 }
 0x619   :  { %2869 = vmax.xlane.f32.xlu1 %v2868_v28 }
 0x61b   :  { %2866 = vmax.xlane.f32.xlu0 %v2865_v29 }
 0x682   :  { %v2170_v30 = vpop.xlane.xlu1 %2169 }
 0x683   :  { %v2184_v31 = vsub.f32 %v6489_v38, %v2170_v30 }
 0x684   :  { %v2167_v32 = vpop.xlane.xlu0 %2166 }
 0x685   :  { %v2191_v33 = vmul.f32 1.442695, %v2184_v31  ;;  %v2183_v34 = vsub.f32 %v6495_v42, %v2167_v32 }
 0x686   :  { %v2176_v35 = vpop.xlane.xlu1 %2175 }
 0x687   :  { %5444 = vpow2.f32 %v2191_v33  ;;  %v2189_v36 = vmul.f32 1.442695, %v2183_v34  ;;  %v2186_v37 = vsub.f32 %v6501_v45, %v2176_v35 }
 0x688   :  { %v2173_v39 = vpop.xlane.xlu0 %2172 }
 0x689   :  { %5446 = vpow2.f32 %v2189_v36  ;;  %v2195_v40 = vmul.f32 1.442695, %v2186_v37  ;;  %v2185_v41 = vsub.f32 %v6507_v49, %v2173_v39 }
 0x68a   :  { %v2182_v43 = vpop.xlane.xlu1 %2181 }
 0x68b   :  { %5448 = vpow2.f32 %v2195_v40  ;;  %v2193_v44 = vmul.f32 1.442695, %v2185_v41  ;;  %v2188_v46 = vsub.f32 %v6513_v53, %v2182_v43 }
 0x68c   :  { %v2179_v38 = vpop.xlane.xlu0 %2178 }
 0x68d   :  { %5450 = vpow2.f32 %v2193_v44  ;;  %v2199_v47 = vmul.f32 1.442695, %v2188_v46  ;;  %v2187_v42 = vsub.f32 %v6523_v58, %v2179_v38 }
 0x68e   :  { %v2514_v48 = vpop.xlane.xlu1 %2513 }
 0x68f   :  { %5452 = vpow2.f32 %v2199_v47  ;;  %v2197_v50 = vmul.f32 1.442695, %v2187_v42  ;;  %v2528_v45 = vsub.f32 %v6519_v57, %v2514_v48 }
 0x690   :  { %v2511_v51 = vpop.xlane.xlu0 %2510 }
 0x691   :  { %5454 = vpow2.f32 %v2197_v50  ;;  %v2535_v54 = vmul.f32 1.442695, %v2528_v45  ;;  %v2527_v49 = vsub.f32 %v6529_v60, %v2511_v51 }
 0x692   :  { %v2520_v55 = vpop.xlane.xlu1 %2519 }
 0x693   :  { %5456 = vpow2.f32 %v2535_v54  ;;  %v2533_v56 = vmul.f32 1.442695, %v2527_v49  ;;  %v2530_v53 = vsub.f32 %v6535_v0, %v2520_v55 }
 0x694   :  { %v6604_v59 = vpop.eup %5444  ;;  %v2517_v61 = vpop.xlane.xlu0 %2516 }
 0x695   :  { %5458 = vpow2.f32 %v2533_v56  ;;  %v2539_v58 = vmul.f32 1.442695, %v2530_v53  ;;  %v2529_v62 = vsub.f32 %v6541_v4, %v2517_v61  ;;  %v2204_v57 = vsel %vm1477_vm5, %v6604_v59, 0.0 }
 0x696   :  { %v6609_v1 = vpop.eup %5446  ;;  %v2526_v5 = vpop.xlane.xlu1 %2525  ;;  %2205 = vadd.xlane.f32.xlu1 %v2204_v57 }
 0x697   :  { %5460 = vpow2.f32 %v2539_v58  ;;  %v2537_v60 = vmul.f32 1.442695, %v2529_v62  ;;  %v2532_v3 = vsub.f32 %v6547_v7, %v2526_v5  ;;  %v2201_v0 = vsel %vm1477_vm5, %v6609_v1, 0.0 }
 0x698   :  { %v6614_v8 = vpop.eup %5448  ;;  %2202 = vadd.xlane.f32.xlu0 %v2201_v0  ;;  %v2523_v10 = vpop.xlane.xlu0 %2522 }
 0x699   :  { %5462 = vpow2.f32 %v2537_v60  ;;  %v2543_v4 = vmul.f32 1.442695, %v2532_v3  ;;  %v2531_v11 = vsub.f32 %v6553_v52, %v2523_v10  ;;  %v2210_v13 = vsel %vm1477_vm5, %v6614_v8, 0.0 }
 0x69a   :  { %v6619_v15 = vpop.eup %5450  ;;  %v2858_v16 = vpop.xlane.xlu1 %2857  ;;  %2211 = vadd.xlane.f32.xlu1 %v2210_v13 }
 0x69b   :  { %5464 = vpow2.f32 %v2543_v4  ;;  %v2541_v7 = vmul.f32 1.442695, %v2531_v11  ;;  %v2872_v19 = vsub.f32 %v6559_v12, %v2858_v16  ;;  %v2207_v21 = vsel %vm1477_vm5, %v6619_v15, 0.0 }
 0x69c   :  { %v6624_v23 = vpop.eup %5452  ;;  %2208 = vadd.xlane.f32.xlu0 %v2207_v21  ;;  %v2855_v25 = vpop.xlane.xlu0 %2854 }
 0x69d   :  { %5466 = vpow2.f32 %v2541_v7  ;;  %v2879_v52 = vmul.f32 1.442695, %v2872_v19  ;;  %v2871_v28 = vsub.f32 %v6565_v14, %v2855_v25  ;;  %v2216_v29 = vsel %vm1477_vm5, %v6624_v23, 0.0 }
 0x69e   :  { %v6629_v30 = vpop.eup %5454  ;;  %v2864_v31 = vpop.xlane.xlu1 %2863  ;;  %2217 = vadd.xlane.f32.xlu1 %v2216_v29 }
 0x69f   :  { %5468 = vpow2.f32 %v2879_v52  ;;  %v2877_v12 = vmul.f32 1.442695, %v2871_v28  ;;  %v2874_v32 = vsub.f32 %v6571_v17, %v2864_v31  ;;  %v2213_v33 = vsel %vm1477_vm5, %v6629_v30, 0.0 }
 0x6a0   :  { %v6634_v34 = vpop.eup %5456  ;;  %2214 = vadd.xlane.f32.xlu0 %v2213_v33  ;;  %v2861_v35 = vpop.xlane.xlu0 %2860 }
 0x6a1   :  { %5470 = vpow2.f32 %v2877_v12  ;;  %v2883_v14 = vmul.f32 1.442695, %v2874_v32  ;;  %v2873_v36 = vsub.f32 %v6577_v20, %v2861_v35  ;;  %v2548_v37 = vsel %vm1477_vm5, %v6634_v34, 0.0  ;;  %v2370_v35 = vld [vmem:[#allocation4 + $0xb0] sm:$0xff] }
 0x6a2   :  { %v6639_v39 = vpop.eup %5458  ;;  %2549 = vadd.xlane.f32.xlu1 %v2548_v37  ;;  %v2870_v40 = vpop.xlane.xlu1 %2869  ;;  %v2369_v37 = vld [vmem:[#allocation4 + $0xa8] sm:$0xff] }
 0x6a3   :  { %5472 = vpow2.f32 %v2883_v14  ;;  %v2881_v17 = vmul.f32 1.442695, %v2873_v36  ;;  %v2876_v41 = vsub.f32 %v6583_v24, %v2870_v40  ;;  %v2545_v43 = vsel %vm1477_vm5, %v6639_v39, 0.0 }
 0x6a4   :  { %v6644_v44 = vpop.eup %5460  ;;  %2546 = vadd.xlane.f32.xlu0 %v2545_v43  ;;  %v2867_v46 = vpop.xlane.xlu0 %2866 }
 0x6a5   :  { %5474 = vpow2.f32 %v2881_v17  ;;  %v2887_v20 = vmul.f32 1.442695, %v2876_v41  ;;  %v2875_v38 = vsub.f32 %v6589_v27, %v2867_v46  ;;  %v2554_v47 = vsel %vm1477_vm5, %v6644_v44, 0.0  ;;  %v2367_v46 = vld [vmem:[#allocation4 + $0x98] sm:$0xff] }
 0x6a6   :  { %v6649_v42 = vpop.eup %5462  ;;  %2555 = vadd.xlane.f32.xlu1 %v2554_v47  ;;  %v2366_v47 = vld [vmem:[#allocation4 + $0x90] sm:$0xff] }
 0x6a7   :  { %5476 = vpow2.f32 %v2887_v20  ;;  %v2885_v48 = vmul.f32 1.442695, %v2875_v38  ;;  %v2551_v24 = vsel %vm1477_vm5, %v6649_v42, 0.0 }
 0x6a8   :  { %v6653_v50 = vpop.eup %5464  ;;  %2552 = vadd.xlane.f32.xlu0 %v2551_v24 }
 0x6a9   :  { %5478 = vpow2.f32 %v2885_v48  ;;  %v2560_v45 = vsel %vm1477_vm5, %v6653_v50, 0.0 }
 0x6aa   :  { %v6657_v51 = vpop.eup %5466  ;;  %2561 = vadd.xlane.f32.xlu1 %v2560_v45  ;;  %v2715_v45 = vld [vmem:[#allocation4 + $0xe8] sm:$0xff] }
 0x6ab   :  { %v2557_v27 = vsel %vm1477_vm5, %v6657_v51, 0.0 }
 0x6ac   :  { %v6661_v54 = vpop.eup %5468  ;;  %2558 = vadd.xlane.f32.xlu0 %v2557_v27 }
 0x6ad   :  { %v2892_v49 = vsel %vm1477_vm5, %v6661_v54, 0.0 }
 0x6ae   :  { %v6665_v55 = vpop.eup %5470  ;;  %2893 = vadd.xlane.f32.xlu1 %v2892_v49 }
 0x6af   :  { %v2889_v56 = vsel %vm1477_vm5, %v6665_v55, 0.0 }
 0x6b0   :  { %v6669_v53 = vpop.eup %5472  ;;  %2890 = vadd.xlane.f32.xlu0 %v2889_v56  ;;  %v2714_v56 = vld [vmem:[#allocation4 + $0xe0] sm:$0xff] }
 0x6b1   :  { %v2898_v61 = vsel %vm1477_vm5, %v6669_v53, 0.0 }
 0x6b2   :  { %v6673_v58 = vpop.eup %5474  ;;  %2899 = vadd.xlane.f32.xlu1 %v2898_v61 }
 0x6b3   :  { %v2895_v62 = vsel %vm1477_vm5, %v6673_v58, 0.0 }
 0x6b4   :  { %v6677_v57 = vpop.eup %5476  ;;  %2896 = vadd.xlane.f32.xlu0 %v2895_v62 }
 0x6b5   :  { %v2904_v5 = vsel %vm1477_vm5, %v6677_v57, 0.0 }
 0x6b6   :  { %v6681_v60 = vpop.eup %5478  ;;  %2905 = vadd.xlane.f32.xlu1 %v2904_v5  ;;  %v2713_v5 = vld [vmem:[#allocation4 + $0xd8] sm:$0xff] }
 0x6b7   :  { %v2901_v3 = vsel %vm1477_vm5, %v6681_v60, 0.0 }
 0x6b8   :  { %2902 = vadd.xlane.f32.xlu0 %v2901_v3 }
 0x71f   :  { %v2206_v0 = vpop.xlane.xlu1 %2205 }
 0x720   :  { %5480 = vrcp.f32 %v2206_v0  ;;  %v2712_v0 = vld [vmem:[#allocation4 + $0xd0] sm:$0xff] }
 0x721   :  { %v2203_v10 = vpop.xlane.xlu0 %2202 }
 0x722   :  { %5482 = vrcp.f32 %v2203_v10 }
 0x723   :  { %v2212_v4 = vpop.xlane.xlu1 %2211 }
 0x724   :  { %5484 = vrcp.f32 %v2212_v4 }
 0x725   :  { %v2209_v11 = vpop.xlane.xlu0 %2208 }
 0x726   :  { %5486 = vrcp.f32 %v2209_v11 }
 0x727   :  { %v2218_v13 = vpop.xlane.xlu1 %2217 }
 0x728   :  { %5488 = vrcp.f32 %v2218_v13  ;;  %v2710_v13 = vld [vmem:[#allocation4 + $0xc0] sm:$0xff] }
 0x729   :  { %v2215_v16 = vpop.xlane.xlu0 %2214 }
 0x72a   :  { %5490 = vrcp.f32 %v2215_v16 }
 0x72b   :  { %v2550_v7 = vpop.xlane.xlu1 %2549 }
 0x72c   :  { %5492 = vrcp.f32 %v2550_v7 }
 0x72d   :  { %v2547_v19 = vpop.xlane.xlu0 %2546  ;;  %v5481_v21 = vpop.eup %5480 }
 0x72e   :  { %5494 = vrcp.f32 %v2547_v19  ;;  %v2222_v29 = vmul.f32 %v5481_v21, %v6604_v59  ;;  %v3051_v21 = vld [vmem:[#allocation2 + $0x110] sm:$0xff] }
 0x72f   :  { %v5483_v25 = vpop.eup %5482  ;;  %v2556_v52 = vpop.xlane.xlu1 %2555 }
 0x730   :  { %v2220_v28 = vmul.f32 %v5483_v25, %v6609_v1  ;;  %5496 = vrcp.f32 %v2556_v52 }
 0x731   :  { %v2553_v31 = vpop.xlane.xlu0 %2552  ;;  %v5485_v12 = vpop.eup %5484 }
 0x732   :  { %5498 = vrcp.f32 %v2553_v31  ;;  %5174 = vmatprep.mubr.msk.f32.mxu1 %vm1477_vm5, %v2220_v28  ;;  %v2226_v59 = vmul.f32 %v5485_v12, %v6614_v8  ;;  %v3050_v28 = vld [vmem:[#allocation2 + $0x108] sm:$0xff]  ;;  %v3048_v12 = vld [vmem:[#allocation2 + $0xf8] sm:$0xff] }
 0x733   :  { %v5487_v32 = vpop.eup %5486  ;;  %v2562_v33 = vpop.xlane.xlu1 %2561  ;;  %5175 = vmatmul.mubr.msk.f32.vlgmr.msra.gmra.mxu1 %vm1477_vm5, %v2222_v29 }
 0x734   :  { %5205 = vmatpush3.msra.mxu1 %v6460_v26  ;;  %v2224_v14 = vmul.f32 %v5487_v32, %v6619_v15  ;;  %5500 = vrcp.f32 %v2562_v33  ;;  %v2368_v26 = vld [vmem:[#allocation4 + $0xa0] sm:$0xff]  ;;  %v3041_v32 = vld [vmem:[#allocation3 + $0xf8] sm:$0xff] }
 0x735   :  { %5206 = vmatprep.subr.mxu1 %v2370_v35  ;;  %v2559_v1 = vpop.xlane.xlu0 %2558  ;;  %v5489_v36 = vpop.eup %5488  ;;  %v3042_v33 = vld [vmem:[#allocation3 + $0x100] sm:$0xff] }
 0x736   :  { %5207 = vmatpush3.msra.mxu1 %v2370_v35  ;;  %5502 = vrcp.f32 %v2559_v1  ;;  %5177 = vmatprep.mubr.msk.f32.mxu1 %vm1477_vm5, %v2224_v14  ;;  %v2230_v8 = vmul.f32 %v5489_v36, %v6624_v23  ;;  %v3402_v35 = vld [vmem:[#allocation4 + $0x140] sm:$0xff]  ;;  %v3043_v14 = vld [vmem:[#allocation3 + $0x108] sm:$0xff]  ;;  %v3401_v1 = vld [vmem:[#allocation4 + $0x138] sm:$0xff] }
 0x737   :  { %v5491_v40 = vpop.eup %5490  ;;  %5208 = vmatprep.subr.mxu1 %v2369_v37  ;;  %v2894_v17 = vpop.xlane.xlu1 %2893  ;;  %5178 = vmatmul.mubr.msk.f32.gmra.mxu1 %vm1477_vm5, %v2226_v59  ;;  %v3044_v59 = vld [vmem:[#allocation3 + $0x110] sm:$0xff] }
 0x738   :  { %5209 = vmatpush3.msra.mxu1 %v2369_v37  ;;  %v2228_v15 = vmul.f32 %v5491_v40, %v6629_v30  ;;  %5504 = vrcp.f32 %v2894_v17  ;;  %v3400_v36 = vld [vmem:[#allocation4 + $0x130] sm:$0xff]  ;;  %v3045_v37 = vld [vmem:[#allocation3 + $0x118] sm:$0xff]  ;;  %v3399_v40 = vld [vmem:[#allocation4 + $0x128] sm:$0xff] }
 0x739   :  { %5210 = vmatprep.subr.mxu1 %v2368_v26  ;;  %v2891_v41 = vpop.xlane.xlu0 %2890  ;;  %v5493_v43 = vpop.eup %5492  ;;  %v3398_v17 = vld [vmem:[#allocation4 + $0x120] sm:$0xff] }
 0x73a   :  { %5211 = vmatpush3.msra.mxu1 %v2368_v26  ;;  %5506 = vrcp.f32 %v2891_v41  ;;  %5180 = vmatprep.mubr.msk.f32.mxu1 %vm1477_vm5, %v2228_v15  ;;  %v2566_v48 = vmul.f32 %v5493_v43, %v6634_v34  ;;  %v6740_v26 = vld [vmem:[#allocation2 + $0x178] sm:$0xff] }
 0x73b   :  { %v5495_v20 = vpop.eup %5494  ;;  %5212 = vmatprep.subr.mxu1 %v2367_v46  ;;  %v2900_v38 = vpop.xlane.xlu1 %2899  ;;  %5181 = vmatmul.mubr.msk.f32.gmra.mxu1 %vm1477_vm5, %v2230_v8 }
 0x73c   :  { %5213 = vmatpush3.msra.mxu1 %v2367_v46  ;;  %v2564_v30 = vmul.f32 %v5495_v20, %v6639_v39  ;;  %5508 = vrcp.f32 %v2900_v38 }
 0x73d   :  { %5214 = vmatprep.subr.mxu1 %v2366_v47  ;;  %v2897_v23 = vpop.xlane.xlu0 %2896  ;;  %v5497_v24 = vpop.eup %5496 }
 0x73e   :  { %5215 = vmatpush3.msra.mxu1 %v2366_v47  ;;  %5510 = vrcp.f32 %v2897_v23  ;;  %5216 = vmatprep.mubr.msk.f32.mxu1 %vm1477_vm5, %v2564_v30  ;;  %v2570_v61 = vmul.f32 %v5497_v24, %v6644_v44  ;;  %v2711_v44 = vld [vmem:[#allocation4 + $0xc8] sm:$0xff] }
 0x73f   :  { %v5499_v27 = vpop.eup %5498  ;;  %5246 = vmatprep.subr.mxu1 %v2715_v45  ;;  %v2906_v49 = vpop.xlane.xlu1 %2905  ;;  %5217 = vmatmul.mubr.msk.f32.vlgmr.msra.gmra.mxu1 %vm1477_vm5, %v2566_v48 }
 0x740   :  { %5247 = vmatpush3.msra.mxu1 %v2715_v45  ;;  %v2568_v39 = vmul.f32 %v5499_v27, %v6649_v42  ;;  %5512 = vrcp.f32 %v2906_v49 }
 0x741   :  { %5248 = vmatprep.subr.mxu1 %v2714_v56  ;;  %v2903_v34 = vpop.xlane.xlu0 %2902  ;;  %v5501_v62 = vpop.eup %5500 }
 0x742   :  { %5249 = vmatpush3.msra.mxu1 %v2714_v56  ;;  %5514 = vrcp.f32 %v2903_v34  ;;  %5219 = vmatprep.mubr.msk.f32.mxu1 %vm1477_vm5, %v2568_v39  ;;  %v2574_v42 = vmul.f32 %v5501_v62, %v6653_v50  ;;  %v3052_v50 = vld [vmem:[#allocation2 + $0x118] sm:$0xff] }
 0x743   :  { %v5503_v3 = vpop.eup %5502  ;;  %5250 = vmatprep.subr.mxu1 %v2713_v5  ;;  %5220 = vmatmul.mubr.msk.f32.gmra.mxu1 %vm1477_vm5, %v2570_v61 }
 0x744   :  { %5251 = vmatpush3.msra.mxu1 %v2713_v5  ;;  %v2572_v10 = vmul.f32 %v5503_v3, %v6657_v51 }
 0x745   :  { %5252 = vmatprep.subr.mxu1 %v2712_v0  ;;  %v5505_v4 = vpop.eup %5504 }
 0x746   :  { %5253 = vmatpush3.msra.mxu1 %v2712_v0  ;;  %5222 = vmatprep.mubr.msk.f32.mxu1 %vm1477_vm5, %v2572_v10  ;;  %v2910_v7 = vmul.f32 %v5505_v4, %v6661_v54 }
 0x747   :  { %v5507_v11 = vpop.eup %5506  ;;  %5254 = vmatprep.subr.mxu1 %v2711_v44  ;;  %5223 = vmatmul.mubr.msk.f32.gmra.mxu1 %vm1477_vm5, %v2574_v42 }
 0x748   :  { %5255 = vmatpush3.msra.mxu1 %v2711_v44  ;;  %v2908_v16 = vmul.f32 %v5507_v11, %v6665_v55 }
 0x749   :  { %5256 = vmatprep.subr.mxu1 %v2710_v13  ;;  %v5509_v51 = vpop.eup %5508 }
 0x74a   :  { %5257 = vmatpush3.msra.mxu1 %v2710_v13  ;;  %5258 = vmatprep.mubr.msk.f32.mxu1 %vm1477_vm5, %v2908_v16  ;;  %v2914_v54 = vmul.f32 %v5509_v51, %v6669_v53  ;;  %v3040_v53 = vld [vmem:[#allocation3 + $0xf0] sm:$0xff] }
 0x74b   :  { %v5511_v19 = vpop.eup %5510  ;;  %5267 = vmatprep.subr.msk.mxu1 %vm552_vm1, %v3052_v50  ;;  %5259 = vmatmul.mubr.msk.f32.vlgmr.msra.gmra.mxu1 %vm1477_vm5, %v2910_v7 }
 0x74c   :  { %5268 = vmatpush3.xpose.msk.msra.mxu1 %vm552_vm1, %v3052_v50  ;;  %v2912_v25 = vmul.f32 %v5511_v19, %v6673_v58  ;;  %v3049_v58 = vld [vmem:[#allocation2 + $0x100] sm:$0xff] }
 0x74d   :  { %5269 = vmatprep.subr.msk.mxu1 %vm552_vm1, %v3051_v21  ;;  %v5513_v55 = vpop.eup %5512 }
 0x74e   :  { %5261 = vmatprep.mubr.msk.f32.mxu1 %vm1477_vm5, %v2912_v25  ;;  %v2918_v31 = vmul.f32 %v5513_v55, %v6677_v57  ;;  %v3047_v57 = vld [vmem:[#allocation2 + $0xf0] sm:$0xff] }
 0x74f   :  { %v5515_v52 = vpop.eup %5514  ;;  %5262 = vmatmul.mubr.msk.f32.gmra.mxu1 %vm1477_vm5, %v2914_v54 }
 0x750   :  { %5270 = vmatpush3.xpose.msk.msra.mxu1 %vm552_vm1, %v3051_v21  ;;  %v2916_v29 = vmul.f32 %v5515_v52, %v6681_v60  ;;  %v3403_v60 = vld [vmem:[#allocation4 + $0x148] sm:$0xff] }
 0x751   :  { %5271 = vmatprep.subr.msk.mxu1 %vm552_vm1, %v3050_v28 }
 0x752   :  { %5264 = vmatprep.mubr.msk.f32.mxu1 %vm1477_vm5, %v2916_v29 }
 0x753   :  { %5265 = vmatmul.mubr.msk.f32.gmra.mxu1 %vm1477_vm5, %v2918_v31 }
 0x754   :  { %5272 = vmatpush3.xpose.msk.msra.mxu1 %vm552_vm1, %v3050_v28  ;;  %5279 = vmatprep.mubr.msk.f32.mxu1 %vm552_vm1, %v3040_v53 }
 0x755   :  { %5273 = vmatprep.subr.msk.mxu1 %vm552_vm1, %v3049_v58 }
 0x758   :  { %5274 = vmatpush3.xpose.msk.msra.mxu1 %vm552_vm1, %v3049_v58 }
 0x759   :  { %5275 = vmatprep.subr.msk.mxu1 %vm552_vm1, %v3048_v12 }
 0x75c   :  { %5276 = vmatpush3.xpose.msk.msra.mxu1 %vm552_vm1, %v3048_v12 }
 0x75d   :  { %5277 = vmatprep.subr.msk.mxu1 %vm552_vm1, %v3047_v57 }
 0x760   :  { %5278 = vmatpush3.xpose.msk.msra.mxu1 %vm552_vm1, %v3047_v57 }
 0x761   :  { %5330 = vmatprep.subr.mxu1 %v3403_v60 }
 0x763   :  { %5280 = vmatmul.mubr.msk.f32.vlgmr.msra.gmra.mxu1 %vm552_vm1, %v3041_v32 }
 0x764   :  { %5282 = vmatprep.mubr.msk.f32.mxu1 %vm552_vm1, %v3042_v33  ;;  %5331 = vmatpush3.msra.mxu1 %v3403_v60 }
 0x765   :  { %5332 = vmatprep.subr.mxu1 %v3402_v35 }
 0x766   :  { %5333 = vmatpush3.msra.mxu1 %v3402_v35 }
 0x767   :  { %5283 = vmatmul.mubr.msk.f32.gmra.mxu1 %vm552_vm1, %v3043_v14  ;;  %5334 = vmatprep.subr.mxu1 %v3401_v1 }
 0x768   :  { %5285 = vmatprep.mubr.msk.f32.mxu1 %vm552_vm1, %v3044_v59  ;;  %5335 = vmatpush3.msra.mxu1 %v3401_v1 }
 0x769   :  { %5336 = vmatprep.subr.mxu1 %v3400_v36 }
 0x76a   :  { %5337 = vmatpush3.msra.mxu1 %v3400_v36 }
 0x76b   :  { %5286 = vmatmul.mubr.msk.f32.gmra.mxu1 %vm552_vm1, %v3045_v37  ;;  %5338 = vmatprep.subr.mxu1 %v3399_v40 }
 0x76c   :  { %5339 = vmatpush3.msra.mxu1 %v3399_v40 }
 0x76d   :  { %5340 = vmatprep.subr.mxu1 %v3398_v17 }
 0x76e   :  { %5341 = vmatpush3.msra.mxu1 %v3398_v17 }
 0x76f   :  { %5351 = vmatprep.subr.msk.mxu1 %vm552_vm1, %v6740_v26 }
 0x7f3   :  { %v5176_v15 = vpop.f32.mrf.mxu1 }
 0x7f4   :  { %4299 = vst.msk [vmem:[%s7015_s2 + $0x68] sm:$0xff] %vm552_vm1, %v5176_v15 }
 0x7f5   :  { %v2315_v41 = vpop.f32.mrf.mxu1 }
 0x7f6   :  { %4298 = vst.msk [vmem:[%s7015_s2 + $0x60] sm:$0xff] %vm552_vm1, %v2315_v41 }
 0x7f7   :  { %v5179_v8 = vpop.f32.mrf.mxu1 }
 0x7f8   :  { %4301 = vst.msk [vmem:[%s7015_s2 + $0x78] sm:$0xff] %vm552_vm1, %v5179_v8 }
 0x7f9   :  { %v2325_v43 = vpop.f32.mrf.mxu1 }
 0x7fa   :  { %4300 = vst.msk [vmem:[%s7015_s2 + $0x70] sm:$0xff] %vm552_vm1, %v2325_v43 }
 0x7fb   :  { %v5182_v46 = vpop.f32.mrf.mxu1 }
 0x7fc   :  { %4303 = vst.msk [vmem:[%s7015_s2 + $0x88] sm:$0xff] %vm552_vm1, %v5182_v46 }
 0x7fd   :  { %v2335_v20 = vpop.f32.mrf.mxu1 }
 0x7fe   :  { %4302 = vst.msk [vmem:[%s7015_s2 + $0x80] sm:$0xff] %vm552_vm1, %v2335_v20 }
 0x7ff   :  { %v5218_v38 = vpop.f32.mrf.mxu1 }
 0x800   :  { %4323 = vst.msk [vmem:[%s7015_s2 + $0x98] sm:$0xff] %vm552_vm1, %v5218_v38 }
 0x801   :  { %v2659_v47 = vpop.f32.mrf.mxu1 }
 0x802   :  { %4322 = vst.msk [vmem:[%s7015_s2 + $0x90] sm:$0xff] %vm552_vm1, %v2659_v47 }
 0x803   :  { %v5221_v30 = vpop.f32.mrf.mxu1 }
 0x804   :  { %4325 = vst.msk [vmem:[%s7015_s2 + $0xa8] sm:$0xff] %vm552_vm1, %v5221_v30 }
 0x805   :  { %v2669_v48 = vpop.f32.mrf.mxu1 }
 0x806   :  { %4324 = vst.msk [vmem:[%s7015_s2 + $0xa0] sm:$0xff] %vm552_vm1, %v2669_v48 }
 0x807   :  { %v5224_v23 = vpop.f32.mrf.mxu1 }
 0x808   :  { %4327 = vst.msk [vmem:[%s7015_s2 + $0xb8] sm:$0xff] %vm552_vm1, %v5224_v23 }
 0x809   :  { %v2679_v24 = vpop.f32.mrf.mxu1 }
 0x80a   :  { %4326 = vst.msk [vmem:[%s7015_s2 + $0xb0] sm:$0xff] %vm552_vm1, %v2679_v24 }
 0x80b   :  { %v5260_v45 = vpop.f32.mrf.mxu1 }
 0x80c   :  { %4347 = vst.msk [vmem:[%s7015_s2 + $0xc8] sm:$0xff] %vm552_vm1, %v5260_v45 }
 0x80d   :  { %v3003_v27 = vpop.f32.mrf.mxu1 }
 0x80e   :  { %4346 = vst.msk [vmem:[%s7015_s2 + $0xc0] sm:$0xff] %vm552_vm1, %v3003_v27 }
 0x80f   :  { %v5263_v49 = vpop.f32.mrf.mxu1 }
 0x810   :  { %4349 = vst.msk [vmem:[%s7015_s2 + $0xd8] sm:$0xff] %vm552_vm1, %v5263_v49 }
 0x811   :  { %v3013_v56 = vpop.f32.mrf.mxu1 }
 0x812   :  { %4348 = vst.msk [vmem:[%s7015_s2 + $0xd0] sm:$0xff] %vm552_vm1, %v3013_v56 }
 0x813   :  { %v5266_v39 = vpop.f32.mrf.mxu1 }
 0x814   :  { %4351 = vst.msk [vmem:[%s7015_s2 + $0xe8] sm:$0xff] %vm552_vm1, %v5266_v39 }
 0x815   :  { %v3023_v34 = vpop.f32.mrf.mxu1 }
 0x816   :  { %4350 = vst.msk [vmem:[%s7015_s2 + $0xe0] sm:$0xff] %vm552_vm1, %v3023_v34 }
 0x823   :  { %v5281_v61 = vpop.f32.mrf.mxu1 }
 0x824   :  { %v3192_v62 = vsel %vm6294_vm3, %v5281_v61, -inf }
 0x825   :  { %v3162_v5 = vpop.f32.mrf.mxu1  ;;  %v3200_v3 = vsel %vm1477_vm5, %v3192_v62, -inf }
 0x826   :  { %v3191_v0 = vsel %vm6289_vm2, %v3162_v5, -inf  ;;  %3201 = vmax.xlane.f32.xlu1 %v3200_v3  ;;  %v5588_v3 = vld [vmem:[#allocation2 + $0x148] sm:$0xff] }
 0x827   :  { %v5284_v10 = vpop.f32.mrf.mxu1  ;;  %v3197_v42 = vsel %vm1477_vm5, %v3191_v0, -inf }
 0x828   :  { %v3194_v4 = vsel %vm6300_vm4, %v5284_v10, -inf  ;;  %3198 = vmax.xlane.f32.xlu0 %v3197_v42 }
 0x829   :  { %v3172_v44 = vpop.f32.mrf.mxu1  ;;  %v3206_v11 = vsel %vm1477_vm5, %v3194_v4, -inf }
 0x82a   :  { %v3193_v13 = vsel %vm6306_vm6, %v3172_v44, -inf  ;;  %3207 = vmax.xlane.f32.xlu1 %v3206_v11  ;;  %v3394_v11 = vld [vmem:[#allocation2 + $0x138] sm:$0xff] }
 0x82b   :  { %v5287_v16 = vpop.f32.mrf.mxu1  ;;  %v3203_v7 = vsel %vm1477_vm5, %v3193_v13, -inf }
 0x82c   :  { %v3196_v51 = vsel %vm6322_vm7, %v5287_v16, -inf  ;;  %3204 = vmax.xlane.f32.xlu0 %v3203_v7  ;;  %v3384_v7 = vld [vmem:[#allocation3 + $0x120] sm:$0xff] }
 0x82d   :  { %v3182_v50 = vpop.f32.mrf.mxu1  ;;  %v3212_v19 = vsel %vm1477_vm5, %v3196_v51, -inf }
 0x82e   :  { %v3195_v21 = vsel %vm6329_vm8, %v3182_v50, -inf  ;;  %3213 = vmax.xlane.f32.xlu1 %v3212_v19  ;;  %v3392_v50 = vld [vmem:[#allocation2 + $0x128] sm:$0xff]  ;;  %v3391_v19 = vld [vmem:[#allocation2 + $0x120] sm:$0xff] }
 0x82f   :  { %v3209_v25 = vsel %vm1477_vm5, %v3195_v21, -inf }
 0x830   :  { %3210 = vmax.xlane.f32.xlu0 %v3209_v25  ;;  %v3385_v25 = vld [vmem:[#allocation3 + $0x128] sm:$0xff] }
 0x8af   :  { %v3202_v54 = vpop.xlane.xlu1 %3201 }
 0x8b0   :  { %v3216_v55 = vsub.f32 %v3192_v62, %v3202_v54  ;;  %v3386_v54 = vld [vmem:[#allocation3 + $0x130] sm:$0xff] }
 0x8b1   :  { %v3199_v52 = vpop.xlane.xlu0 %3198 }
 0x8b2   :  { %v3223_v28 = vmul.f32 1.442695, %v3216_v55  ;;  %v3215_v29 = vsub.f32 %v3191_v0, %v3199_v52  ;;  %v3395_v0 = vld [vmem:[#allocation2 + $0x140] sm:$0xff]  ;;  %v3746_v55 = vld [vmem:[#allocation4 + $0x170] sm:$0xff]  ;;  %v3387_v52 = vld [vmem:[#allocation3 + $0x138] sm:$0xff] }
 0x8b3   :  { %v3208_v31 = vpop.xlane.xlu1 %3207 }
 0x8b4   :  { %5516 = vpow2.f32 %v3223_v28  ;;  %v3221_v53 = vmul.f32 1.442695, %v3215_v29  ;;  %v3218_v58 = vsub.f32 %v3194_v4, %v3208_v31  ;;  %v3745_v28 = vld [vmem:[#allocation4 + $0x168] sm:$0xff]  ;;  %v3388_v29 = vld [vmem:[#allocation3 + $0x140] sm:$0xff] }
 0x8b5   :  { %v3205_v12 = vpop.xlane.xlu0 %3204  ;;  %v3744_v31 = vld [vmem:[#allocation4 + $0x160] sm:$0xff] }
 0x8b6   :  { %5518 = vpow2.f32 %v3221_v53  ;;  %v3227_v57 = vmul.f32 1.442695, %v3218_v58  ;;  %v3217_v60 = vsub.f32 %v3193_v13, %v3205_v12  ;;  %v3389_v53 = vld [vmem:[#allocation3 + $0x148] sm:$0xff]  ;;  %v3743_v58 = vld [vmem:[#allocation4 + $0x158] sm:$0xff]  ;;  %v3742_v12 = vld [vmem:[#allocation4 + $0x150] sm:$0xff] }
 0x8b7   :  { %v3214_v32 = vpop.xlane.xlu1 %3213 }
 0x8b8   :  { %5520 = vpow2.f32 %v3227_v57  ;;  %v3225_v33 = vmul.f32 1.442695, %v3217_v60  ;;  %v3220_v35 = vsub.f32 %v3196_v51, %v3214_v32  ;;  %v3393_v51 = vld [vmem:[#allocation2 + $0x130] sm:$0xff] }
 0x8b9   :  { %v3211_v14 = vpop.xlane.xlu0 %3210 }
 0x8ba   :  { %5522 = vpow2.f32 %v3225_v33  ;;  %v3231_v1 = vmul.f32 1.442695, %v3220_v35  ;;  %v3219_v59 = vsub.f32 %v3195_v21, %v3211_v14  ;;  %v3747_v21 = vld [vmem:[#allocation4 + $0x178] sm:$0xff] }
 0x8bc   :  { %5524 = vpow2.f32 %v3231_v1  ;;  %v3229_v36 = vmul.f32 1.442695, %v3219_v59 }
 0x8be   :  { %5526 = vpow2.f32 %v3229_v36 }
 0x8c1   :  { %v5517_v37 = vpop.eup %5516 }
 0x8c2   :  { %v3236_v40 = vsel %vm1477_vm5, %v5517_v37, 0.0 }
 0x8c3   :  { %v5519_v17 = vpop.eup %5518  ;;  %3237 = vadd.xlane.f32.xlu1 %v3236_v40 }
 0x8c4   :  { %v3233_v15 = vsel %vm1477_vm5, %v5519_v17, 0.0 }
 0x8c5   :  { %v5521_v41 = vpop.eup %5520  ;;  %3234 = vadd.xlane.f32.xlu0 %v3233_v15 }
 0x8c6   :  { %v3242_v8 = vsel %vm1477_vm5, %v5521_v41, 0.0 }
 0x8c7   :  { %v5523_v43 = vpop.eup %5522  ;;  %3243 = vadd.xlane.f32.xlu1 %v3242_v8 }
 0x8c8   :  { %v3239_v46 = vsel %vm1477_vm5, %v5523_v43, 0.0 }
 0x8c9   :  { %v5525_v20 = vpop.eup %5524  ;;  %3240 = vadd.xlane.f32.xlu0 %v3239_v46 }
 0x8ca   :  { %v3248_v38 = vsel %vm1477_vm5, %v5525_v20, 0.0 }
 0x8cb   :  { %v5527_v47 = vpop.eup %5526  ;;  %3249 = vadd.xlane.f32.xlu1 %v3248_v38 }
 0x8cc   :  { %v3245_v30 = vsel %vm1477_vm5, %v5527_v47, 0.0 }
 0x8cd   :  { %3246 = vadd.xlane.f32.xlu0 %v3245_v30 }
 0x94c   :  { %v3238_v48 = vpop.xlane.xlu1 %3237 }
 0x94d   :  { %5528 = vrcp.f32 %v3238_v48 }
 0x94e   :  { %v3235_v23 = vpop.xlane.xlu0 %3234 }
 0x94f   :  { %5530 = vrcp.f32 %v3235_v23 }
 0x950   :  { %v3244_v24 = vpop.xlane.xlu1 %3243 }
 0x951   :  { %5532 = vrcp.f32 %v3244_v24 }
 0x952   :  { %v3241_v45 = vpop.xlane.xlu0 %3240 }
 0x953   :  { %5534 = vrcp.f32 %v3241_v45 }
 0x954   :  { %v3250_v27 = vpop.xlane.xlu1 %3249 }
 0x955   :  { %5536 = vrcp.f32 %v3250_v27 }
 0x956   :  { %v3247_v49 = vpop.xlane.xlu0 %3246 }
 0x957   :  { %5538 = vrcp.f32 %v3247_v49 }
 0x95a   :  { %v5529_v56 = vpop.eup %5528 }
 0x95b   :  { %v3254_v61 = vmul.f32 %v5529_v56, %v5517_v37 }
 0x95c   :  { %v5531_v39 = vpop.eup %5530 }
 0x95d   :  { %v3252_v34 = vmul.f32 %v5531_v39, %v5519_v17 }
 0x95e   :  { %v5533_v62 = vpop.eup %5532 }
 0x95f   :  { %5300 = vmatprep.mubr.msk.f32.mxu0 %vm1477_vm5, %v3252_v34  ;;  %v3258_v42 = vmul.f32 %v5533_v62, %v5521_v41 }
 0x960   :  { %v5535_v5 = vpop.eup %5534  ;;  %5301 = vmatmul.mubr.msk.f32.vlgmr.msra.gmra.mxu0 %vm1477_vm5, %v3254_v61 }
 0x961   :  { %5310 = vmatpush3.xpose.msk.msra.mxu0 %vm552_vm1, %v5588_v3  ;;  %v3256_v10 = vmul.f32 %v5535_v5, %v5523_v43 }
 0x962   :  { %5311 = vmatprep.subr.msk.mxu0 %vm552_vm1, %v3395_v0  ;;  %v5537_v4 = vpop.eup %5536 }
 0x963   :  { %5303 = vmatprep.mubr.msk.f32.mxu0 %vm1477_vm5, %v3256_v10  ;;  %v3262_v16 = vmul.f32 %v5537_v4, %v5525_v20 }
 0x964   :  { %v5539_v44 = vpop.eup %5538  ;;  %5304 = vmatmul.mubr.msk.f32.gmra.mxu0 %vm1477_vm5, %v3258_v42 }
 0x965   :  { %5312 = vmatpush3.xpose.msk.msra.mxu0 %vm552_vm1, %v3395_v0  ;;  %v3260_v13 = vmul.f32 %v5539_v44, %v5527_v47 }
 0x966   :  { %5313 = vmatprep.subr.msk.mxu0 %vm552_vm1, %v3394_v11 }
 0x967   :  { %5306 = vmatprep.mubr.msk.f32.mxu0 %vm1477_vm5, %v3260_v13 }
 0x968   :  { %5307 = vmatmul.mubr.msk.f32.gmra.mxu0 %vm1477_vm5, %v3262_v16 }
 0x969   :  { %5314 = vmatpush3.xpose.msk.msra.mxu0 %vm552_vm1, %v3394_v11  ;;  %5321 = vmatprep.mubr.msk.f32.mxu0 %vm552_vm1, %v3384_v7 }
 0x96a   :  { %5315 = vmatprep.subr.msk.mxu0 %vm552_vm1, %v3393_v51 }
 0x96d   :  { %5316 = vmatpush3.xpose.msk.msra.mxu0 %vm552_vm1, %v3393_v51 }
 0x96e   :  { %5317 = vmatprep.subr.msk.mxu0 %vm552_vm1, %v3392_v50 }
 0x971   :  { %5318 = vmatpush3.xpose.msk.msra.mxu0 %vm552_vm1, %v3392_v50 }
 0x972   :  { %5319 = vmatprep.subr.msk.mxu0 %vm552_vm1, %v3391_v19 }
 0x975   :  { %5320 = vmatpush3.xpose.msk.msra.mxu0 %vm552_vm1, %v3391_v19 }
 0x976   :  { %5372 = vmatprep.subr.mxu0 %v3747_v21 }
 0x978   :  { %5322 = vmatmul.mubr.msk.f32.vlgmr.msra.gmra.mxu0 %vm552_vm1, %v3385_v25 }
 0x979   :  { %5324 = vmatprep.mubr.msk.f32.mxu0 %vm552_vm1, %v3386_v54  ;;  %5373 = vmatpush3.msra.mxu0 %v3747_v21 }
 0x97a   :  { %5374 = vmatprep.subr.mxu0 %v3746_v55 }
 0x97b   :  { %5375 = vmatpush3.msra.mxu0 %v3746_v55 }
 0x97c   :  { %5325 = vmatmul.mubr.msk.f32.gmra.mxu0 %vm552_vm1, %v3387_v52  ;;  %5376 = vmatprep.subr.mxu0 %v3745_v28 }
 0x97d   :  { %5327 = vmatprep.mubr.msk.f32.mxu0 %vm552_vm1, %v3388_v29  ;;  %5377 = vmatpush3.msra.mxu0 %v3745_v28 }
 0x97e   :  { %5378 = vmatprep.subr.mxu0 %v3744_v31 }
 0x97f   :  { %5379 = vmatpush3.msra.mxu0 %v3744_v31 }
 0x980   :  { %5328 = vmatmul.mubr.msk.f32.gmra.mxu0 %vm552_vm1, %v3389_v53  ;;  %5380 = vmatprep.subr.mxu0 %v3743_v58 }
 0x981   :  { %5381 = vmatpush3.msra.mxu0 %v3743_v58 }
 0x982   :  { %5382 = vmatprep.subr.mxu0 %v3742_v12 }
 0x983   :  { %5383 = vmatpush3.msra.mxu0 %v3742_v12 }
 0xa20   :  { %v5302_v57 = vpop.f32.mrf.mxu0 }
 0xa21   :  { %4371 = vst.msk [vmem:[%s7015_s2 + $0xf8] sm:$0xff] %vm552_vm1, %v5302_v57 }
 0xa22   :  { %v3347_v60 = vpop.f32.mrf.mxu0 }
 0xa23   :  { %4370 = vst.msk [vmem:[%s7015_s2 + $0xf0] sm:$0xff] %vm552_vm1, %v3347_v60 }
 0xa24   :  { %v5305_v32 = vpop.f32.mrf.mxu0 }
 0xa25   :  { %4373 = vst.msk [vmem:[%s7015_s2 + $0x108] sm:$0xff] %vm552_vm1, %v5305_v32 }
 0xa26   :  { %v3357_v33 = vpop.f32.mrf.mxu0 }
 0xa27   :  { %4372 = vst.msk [vmem:[%s7015_s2 + $0x100] sm:$0xff] %vm552_vm1, %v3357_v33 }
 0xa28   :  { %v5308_v35 = vpop.f32.mrf.mxu0 }
 0xa29   :  { %4375 = vst.msk [vmem:[%s7015_s2 + $0x118] sm:$0xff] %vm552_vm1, %v5308_v35 }
 0xa2a   :  { %v3367_v14 = vpop.f32.mrf.mxu0 }
 0xa2b   :  { %4374 = vst.msk [vmem:[%s7015_s2 + $0x110] sm:$0xff] %vm552_vm1, %v3367_v14 }
 0xa38   :  { %v5323_v1 = vpop.f32.mrf.mxu0 }
 0xa39   :  { %v3536_v59 = vsel %vm6294_vm3, %v5323_v1, -inf }
 0xa3a   :  { %v3506_v36 = vpop.f32.mrf.mxu0  ;;  %v3544_v37 = vsel %vm1477_vm5, %v3536_v59, -inf }
 0xa3b   :  { %v3535_v40 = vsel %vm6289_vm2, %v3506_v36, -inf  ;;  %3545 = vmax.xlane.f32.xlu1 %v3544_v37  ;;  %v3739_v37 = vld [vmem:[#allocation2 + $0x170] sm:$0xff] }
 0xa3c   :  { %v5326_v17 = vpop.f32.mrf.mxu0  ;;  %v3541_v15 = vsel %vm1477_vm5, %v3535_v40, -inf }
 0xa3d   :  { %v3538_v41 = vsel %vm6300_vm4, %v5326_v17, -inf  ;;  %3542 = vmax.xlane.f32.xlu0 %v3541_v15 }
 0xa3e   :  { %v3516_v8 = vpop.f32.mrf.mxu0  ;;  %v3550_v43 = vsel %vm1477_vm5, %v3538_v41, -inf }
 0xa3f   :  { %v3537_v46 = vsel %vm6306_vm6, %v3516_v8, -inf  ;;  %3551 = vmax.xlane.f32.xlu1 %v3550_v43  ;;  %v3738_v8 = vld [vmem:[#allocation2 + $0x168] sm:$0xff] }
 0xa40   :  { %v5329_v20 = vpop.f32.mrf.mxu0  ;;  %v3547_v38 = vsel %vm1477_vm5, %v3537_v46, -inf }
 0xa41   :  { %v3540_v47 = vsel %vm6322_vm7, %v5329_v20, -inf  ;;  %3548 = vmax.xlane.f32.xlu0 %v3547_v38  ;;  %v3737_v20 = vld [vmem:[#allocation2 + $0x160] sm:$0xff]  ;;  %v3736_v38 = vld [vmem:[#allocation2 + $0x158] sm:$0xff] }
 0xa42   :  { %v3526_v30 = vpop.f32.mrf.mxu0  ;;  %v3556_v48 = vsel %vm1477_vm5, %v3540_v47, -inf }
 0xa43   :  { %v3539_v23 = vsel %vm6329_vm8, %v3526_v30, -inf  ;;  %3557 = vmax.xlane.f32.xlu1 %v3556_v48  ;;  %v3729_v30 = vld [vmem:[#allocation3 + $0x158] sm:$0xff]  ;;  %v3730_v48 = vld [vmem:[#allocation3 + $0x160] sm:$0xff] }
 0xa44   :  { %v3553_v24 = vsel %vm1477_vm5, %v3539_v23, -inf }
 0xa45   :  { %3554 = vmax.xlane.f32.xlu0 %v3553_v24  ;;  %v3732_v24 = vld [vmem:[#allocation3 + $0x170] sm:$0xff] }
 0xac4   :  { %v3546_v45 = vpop.xlane.xlu1 %3545 }
 0xac5   :  { %v3560_v27 = vsub.f32 %v3536_v59, %v3546_v45  ;;  %v3733_v45 = vld [vmem:[#allocation3 + $0x178] sm:$0xff] }
 0xac6   :  { %v3543_v49 = vpop.xlane.xlu0 %3542 }
 0xac7   :  { %v3567_v56 = vmul.f32 1.442695, %v3560_v27  ;;  %v3559_v39 = vsub.f32 %v3535_v40, %v3543_v49 }
 0xac8   :  { %v3552_v34 = vpop.xlane.xlu1 %3551 }
 0xac9   :  { %5540 = vpow2.f32 %v3567_v56  ;;  %v3565_v61 = vmul.f32 1.442695, %v3559_v39  ;;  %v3562_v62 = vsub.f32 %v3538_v41, %v3552_v34 }
 0xaca   :  { %v3549_v5 = vpop.xlane.xlu0 %3548 }
 0xacb   :  { %5542 = vpow2.f32 %v3565_v61  ;;  %v3571_v3 = vmul.f32 1.442695, %v3562_v62  ;;  %v3561_v0 = vsub.f32 %v3537_v46, %v3549_v5 }
 0xacc   :  { %v3558_v10 = vpop.xlane.xlu1 %3557 }
 0xacd   :  { %5544 = vpow2.f32 %v3571_v3  ;;  %v3569_v42 = vmul.f32 1.442695, %v3561_v0  ;;  %v3564_v4 = vsub.f32 %v3540_v47, %v3558_v10  ;;  %v3735_v47 = vld [vmem:[#allocation2 + $0x150] sm:$0xff] }
 0xace   :  { %v3555_v44 = vpop.xlane.xlu0 %3554 }
 0xacf   :  { %5546 = vpow2.f32 %v3569_v42  ;;  %v3575_v11 = vmul.f32 1.442695, %v3564_v4  ;;  %v3563_v13 = vsub.f32 %v3539_v23, %v3555_v44  ;;  %v3731_v23 = vld [vmem:[#allocation3 + $0x168] sm:$0xff] }
 0xad1   :  { %5548 = vpow2.f32 %v3575_v11  ;;  %v3573_v16 = vmul.f32 1.442695, %v3563_v13 }
 0xad3   :  { %5550 = vpow2.f32 %v3573_v16 }
 0xad6   :  { %v5541_v7 = vpop.eup %5540 }
 0xad7   :  { %v3580_v51 = vsel %vm1477_vm5, %v5541_v7, 0.0 }
 0xad8   :  { %v5543_v50 = vpop.eup %5542  ;;  %3581 = vadd.xlane.f32.xlu1 %v3580_v51 }
 0xad9   :  { %v3577_v19 = vsel %vm1477_vm5, %v5543_v50, 0.0 }
 0xada   :  { %v5545_v21 = vpop.eup %5544  ;;  %3578 = vadd.xlane.f32.xlu0 %v3577_v19 }
 0xadb   :  { %v3586_v25 = vsel %vm1477_vm5, %v5545_v21, 0.0 }
 0xadc   :  { %v5547_v54 = vpop.eup %5546  ;;  %3587 = vadd.xlane.f32.xlu1 %v3586_v25 }
 0xadd   :  { %v3583_v55 = vsel %vm1477_vm5, %v5547_v54, 0.0 }
 0xade   :  { %v5549_v52 = vpop.eup %5548  ;;  %3584 = vadd.xlane.f32.xlu0 %v3583_v55 }
 0xadf   :  { %v3592_v28 = vsel %vm1477_vm5, %v5549_v52, 0.0 }
 0xae0   :  { %v5551_v29 = vpop.eup %5550  ;;  %3593 = vadd.xlane.f32.xlu1 %v3592_v28 }
 0xae1   :  { %v3589_v31 = vsel %vm1477_vm5, %v5551_v29, 0.0 }
 0xae2   :  { %3590 = vadd.xlane.f32.xlu0 %v3589_v31 }
 0xb61   :  { %v3582_v53 = vpop.xlane.xlu1 %3581 }
 0xb62   :  { %5552 = vrcp.f32 %v3582_v53 }
 0xb63   :  { %v3579_v58 = vpop.xlane.xlu0 %3578 }
 0xb64   :  { %5554 = vrcp.f32 %v3579_v58 }
 0xb65   :  { %v3588_v12 = vpop.xlane.xlu1 %3587 }
 0xb66   :  { %5556 = vrcp.f32 %v3588_v12 }
 0xb67   :  { %v3585_v57 = vpop.xlane.xlu0 %3584 }
 0xb68   :  { %5558 = vrcp.f32 %v3585_v57 }
 0xb69   :  { %v3594_v60 = vpop.xlane.xlu1 %3593 }
 0xb6a   :  { %5560 = vrcp.f32 %v3594_v60 }
 0xb6b   :  { %v3591_v32 = vpop.xlane.xlu0 %3590 }
 0xb6c   :  { %5562 = vrcp.f32 %v3591_v32 }
 0xb6f   :  { %v5553_v33 = vpop.eup %5552 }
 0xb70   :  { %v3598_v1 = vmul.f32 %v5553_v33, %v5541_v7 }
 0xb71   :  { %v5555_v35 = vpop.eup %5554 }
 0xb72   :  { %v3596_v14 = vmul.f32 %v5555_v35, %v5543_v50 }
 0xb73   :  { %v5557_v59 = vpop.eup %5556 }
 0xb74   :  { %5342 = vmatprep.mubr.msk.f32.mxu1 %vm1477_vm5, %v3596_v14  ;;  %v3602_v17 = vmul.f32 %v5557_v59, %v5545_v21 }
 0xb75   :  { %v5559_v36 = vpop.eup %5558  ;;  %5343 = vmatmul.mubr.msk.f32.vlgmr.msra.gmra.mxu1 %vm1477_vm5, %v3598_v1 }
 0xb76   :  { %5352 = vmatpush3.xpose.msk.msra.mxu1 %vm552_vm1, %v6740_v26  ;;  %v3600_v40 = vmul.f32 %v5559_v36, %v5547_v54  ;;  %v3728_v26 = vld [vmem:[#allocation3 + $0x150] sm:$0xff] }
 0xb77   :  { %5353 = vmatprep.subr.msk.mxu1 %vm552_vm1, %v3739_v37  ;;  %v5561_v15 = vpop.eup %5560 }
 0xb78   :  { %5345 = vmatprep.mubr.msk.f32.mxu1 %vm1477_vm5, %v3600_v40  ;;  %v3606_v46 = vmul.f32 %v5561_v15, %v5549_v52 }
 0xb79   :  { %v5563_v41 = vpop.eup %5562  ;;  %5346 = vmatmul.mubr.msk.f32.gmra.mxu1 %vm1477_vm5, %v3602_v17 }
 0xb7a   :  { %5354 = vmatpush3.xpose.msk.msra.mxu1 %vm552_vm1, %v3739_v37  ;;  %v3604_v43 = vmul.f32 %v5563_v41, %v5551_v29 }
 0xb7b   :  { %5355 = vmatprep.subr.msk.mxu1 %vm552_vm1, %v3738_v8 }
 0xb7c   :  { %5348 = vmatprep.mubr.msk.f32.mxu1 %vm1477_vm5, %v3604_v43 }
 0xb7d   :  { %5349 = vmatmul.mubr.msk.f32.gmra.mxu1 %vm1477_vm5, %v3606_v46 }
 0xb7e   :  { %5356 = vmatpush3.xpose.msk.msra.mxu1 %vm552_vm1, %v3738_v8  ;;  %5363 = vmatprep.mubr.msk.f32.mxu1 %vm552_vm1, %v3728_v26 }
 0xb7f   :  { %5357 = vmatprep.subr.msk.mxu1 %vm552_vm1, %v3737_v20 }
 0xb82   :  { %5358 = vmatpush3.xpose.msk.msra.mxu1 %vm552_vm1, %v3737_v20 }
 0xb83   :  { %5359 = vmatprep.subr.msk.mxu1 %vm552_vm1, %v3736_v38 }
 0xb86   :  { %5360 = vmatpush3.xpose.msk.msra.mxu1 %vm552_vm1, %v3736_v38 }
 0xb87   :  { %5361 = vmatprep.subr.msk.mxu1 %vm552_vm1, %v3735_v47 }
 0xb8a   :  { %5362 = vmatpush3.xpose.msk.msra.mxu1 %vm552_vm1, %v3735_v47 }
 0xb8d   :  { %5364 = vmatmul.mubr.msk.f32.vlgmr.msra.gmra.mxu1 %vm552_vm1, %v3729_v30 }
 0xb8e   :  { %5366 = vmatprep.mubr.msk.f32.mxu1 %vm552_vm1, %v3730_v48 }
 0xb91   :  { %5367 = vmatmul.mubr.msk.f32.gmra.mxu1 %vm552_vm1, %v3731_v23 }
 0xb92   :  { %5369 = vmatprep.mubr.msk.f32.mxu1 %vm552_vm1, %v3732_v24 }
 0xb95   :  { %5370 = vmatmul.mubr.msk.f32.gmra.mxu1 %vm552_vm1, %v3733_v45 }
 0xc35   :  { %v5344_v27 = vpop.f32.mrf.mxu1 }
 0xc36   :  { %4395 = vst.msk [vmem:[%s7015_s2 + $0x128] sm:$0xff] %vm552_vm1, %v5344_v27 }
 0xc37   :  { %v3691_v49 = vpop.f32.mrf.mxu1 }
 0xc38   :  { %4394 = vst.msk [vmem:[%s7015_s2 + $0x120] sm:$0xff] %vm552_vm1, %v3691_v49 }
 0xc39   :  { %v5347_v56 = vpop.f32.mrf.mxu1 }
 0xc3a   :  { %4397 = vst.msk [vmem:[%s7015_s2 + $0x138] sm:$0xff] %vm552_vm1, %v5347_v56 }
 0xc3b   :  { %v3701_v39 = vpop.f32.mrf.mxu1 }
 0xc3c   :  { %4396 = vst.msk [vmem:[%s7015_s2 + $0x130] sm:$0xff] %vm552_vm1, %v3701_v39 }
 0xc3d   :  { %v5350_v34 = vpop.f32.mrf.mxu1 }
 0xc3e   :  { %4399 = vst.msk [vmem:[%s7015_s2 + $0x148] sm:$0xff] %vm552_vm1, %v5350_v34 }
 0xc3f   :  { %v3711_v61 = vpop.f32.mrf.mxu1 }
 0xc40   :  { %4398 = vst.msk [vmem:[%s7015_s2 + $0x140] sm:$0xff] %vm552_vm1, %v3711_v61 }
 0xc4d   :  { %v5365_v62 = vpop.f32.mrf.mxu1 }
 0xc4e   :  { %v3880_v5 = vsel %vm6294_vm3, %v5365_v62, -inf }
 0xc4f   :  { %v3850_v3 = vpop.f32.mrf.mxu1  ;;  %v3888_v0 = vsel %vm1477_vm5, %v3880_v5, -inf }
 0xc50   :  { %v3879_v10 = vsel %vm6289_vm2, %v3850_v3, -inf  ;;  %3889 = vmax.xlane.f32.xlu1 %v3888_v0 }
 0xc51   :  { %v5368_v42 = vpop.f32.mrf.mxu1  ;;  %v3885_v4 = vsel %vm1477_vm5, %v3879_v10, -inf }
 0xc52   :  { %v3882_v44 = vsel %vm6300_vm4, %v5368_v42, -inf  ;;  %3886 = vmax.xlane.f32.xlu0 %v3885_v4 }
 0xc53   :  { %v3860_v11 = vpop.f32.mrf.mxu1  ;;  %v3894_v13 = vsel %vm1477_vm5, %v3882_v44, -inf }
 0xc54   :  { %v3881_v2 = vsel %vm6306_vm6, %v3860_v11, -inf  ;;  %3895 = vmax.xlane.f32.xlu1 %v3894_v13 }
 0xc55   :  { %v5371_v16 = vpop.f32.mrf.mxu1  ;;  %v3891_v7 = vsel %vm1477_vm5, %v3881_v2, -inf }
 0xc56   :  { %v3884_v63 = vsel %vm6322_vm7, %v5371_v16, -inf  ;;  %3892 = vmax.xlane.f32.xlu0 %v3891_v7 }
 0xc57   :  { %v3870_v51 = vpop.f32.mrf.mxu1  ;;  %v3900_v50 = vsel %vm1477_vm5, %v3884_v63, -inf }
 0xc58   :  { %v3883_v6 = vsel %vm6329_vm8, %v3870_v51, -inf  ;;  %3901 = vmax.xlane.f32.xlu1 %v3900_v50 }
 0xc59   :  { %v3897_v19 = vsel %vm1477_vm5, %v3883_v6, -inf }
 0xc5a   :  { %3898 = vmax.xlane.f32.xlu0 %v3897_v19 }
 0xcd9   :  { %v3890_v9 = vpop.xlane.xlu1 %3889 }
 0xcda   :  { %v3904_v21 = vsub.f32 %v3880_v5, %v3890_v9 }
 0xcdb   :  { %v3887_v25 = vpop.xlane.xlu0 %3886 }
 0xcdc   :  { %v3911_v54 = vmul.f32 1.442695, %v3904_v21  ;;  %v3903_v55 = vsub.f32 %v3879_v10, %v3887_v25 }
 0xcdd   :  { %v3896_v52 = vpop.xlane.xlu1 %3895 }
 0xcde   :  { %5564 = vpow2.f32 %v3911_v54  ;;  %v3909_v18 = vmul.f32 1.442695, %v3903_v55  ;;  %v3906_v28 = vsub.f32 %v3882_v44, %v3896_v52 }
 0xcdf   :  { %v3893_v29 = vpop.xlane.xlu0 %3892 }
 0xce0   :  { %5566 = vpow2.f32 %v3909_v18  ;;  %v3915_v31 = vmul.f32 1.442695, %v3906_v28  ;;  %v3905_v53 = vsub.f32 %v3881_v2, %v3893_v29 }
 0xce1   :  { %v3902_v58 = vpop.xlane.xlu1 %3901 }
 0xce2   :  { %5568 = vpow2.f32 %v3915_v31  ;;  %v3913_v22 = vmul.f32 1.442695, %v3905_v53  ;;  %v3908_v12 = vsub.f32 %v3884_v63, %v3902_v58 }
 0xce3   :  { %v3899_v57 = vpop.xlane.xlu0 %3898 }
 0xce4   :  { %5570 = vpow2.f32 %v3913_v22  ;;  %v3919_v60 = vmul.f32 1.442695, %v3908_v12  ;;  %v3907_v32 = vsub.f32 %v3883_v6, %v3899_v57 }
 0xce6   :  { %5572 = vpow2.f32 %v3919_v60  ;;  %v3917_v33 = vmul.f32 1.442695, %v3907_v32 }
 0xce8   :  { %5574 = vpow2.f32 %v3917_v33 }
 0xceb   :  { %v5565_v35 = vpop.eup %5564 }
 0xcec   :  { %v3924_v14 = vsel %vm1477_vm5, %v5565_v35, 0.0 }
 0xced   :  { %v5567_v1 = vpop.eup %5566  ;;  %3925 = vadd.xlane.f32.xlu1 %v3924_v14 }
 0xcee   :  { %v3921_v59 = vsel %vm1477_vm5, %v5567_v1, 0.0 }
 0xcef   :  { %v5569_v36 = vpop.eup %5568  ;;  %3922 = vadd.xlane.f32.xlu0 %v3921_v59 }
 0xcf0   :  { %v3930_v37 = vsel %vm1477_vm5, %v5569_v36, 0.0 }
 0xcf1   :  { %v5571_v40 = vpop.eup %5570  ;;  %3931 = vadd.xlane.f32.xlu1 %v3930_v37 }
 0xcf2   :  { %v3927_v17 = vsel %vm1477_vm5, %v5571_v40, 0.0 }
 0xcf3   :  { %v5573_v15 = vpop.eup %5572  ;;  %3928 = vadd.xlane.f32.xlu0 %v3927_v17 }
 0xcf4   :  { %v3936_v41 = vsel %vm1477_vm5, %v5573_v15, 0.0 }
 0xcf5   :  { %v5575_v8 = vpop.eup %5574  ;;  %3937 = vadd.xlane.f32.xlu1 %v3936_v41 }
 0xcf6   :  { %v3933_v43 = vsel %vm1477_vm5, %v5575_v8, 0.0 }
 0xcf7   :  { %3934 = vadd.xlane.f32.xlu0 %v3933_v43 }
 0xd76   :  { %v3926_v46 = vpop.xlane.xlu1 %3925 }
 0xd77   :  { %5576 = vrcp.f32 %v3926_v46 }
 0xd78   :  { %v3923_v26 = vpop.xlane.xlu0 %3922 }
 0xd79   :  { %5578 = vrcp.f32 %v3923_v26 }
 0xd7a   :  { %v3932_v20 = vpop.xlane.xlu1 %3931 }
 0xd7b   :  { %5580 = vrcp.f32 %v3932_v20 }
 0xd7c   :  { %v3929_v38 = vpop.xlane.xlu0 %3928 }
 0xd7d   :  { %5582 = vrcp.f32 %v3929_v38 }
 0xd7e   :  { %v3938_v47 = vpop.xlane.xlu1 %3937 }
 0xd7f   :  { %5584 = vrcp.f32 %v3938_v47 }
 0xd80   :  { %v3935_v30 = vpop.xlane.xlu0 %3934 }
 0xd81   :  { %5586 = vrcp.f32 %v3935_v30 }
 0xd84   :  { %v5577_v48 = vpop.eup %5576 }
 0xd85   :  { %v3942_v45 = vmul.f32 %v5577_v48, %v5565_v35 }
 0xd86   :  { %v5579_v23 = vpop.eup %5578 }
 0xd87   :  { %v3940_v24 = vmul.f32 %v5579_v23, %v5567_v1 }
 0xd88   :  { %v5581_v27 = vpop.eup %5580 }
 0xd89   :  { %5384 = vmatprep.mubr.msk.f32.mxu0 %vm1477_vm5, %v3940_v24  ;;  %v3946_v39 = vmul.f32 %v5581_v27, %v5569_v36 }
 0xd8a   :  { %v5583_v49 = vpop.eup %5582  ;;  %5385 = vmatmul.mubr.msk.f32.vlgmr.msra.gmra.mxu0 %vm1477_vm5, %v3942_v45 }
 0xd8b   :  { %v3944_v56 = vmul.f32 %v5583_v49, %v5571_v40 }
 0xd8c   :  { %v5585_v34 = vpop.eup %5584 }
 0xd8d   :  { %5387 = vmatprep.mubr.msk.f32.mxu0 %vm1477_vm5, %v3944_v56  ;;  %v3950_v5 = vmul.f32 %v5585_v34, %v5573_v15 }
 0xd8e   :  { %v5587_v61 = vpop.eup %5586  ;;  %5388 = vmatmul.mubr.msk.f32.gmra.mxu0 %vm1477_vm5, %v3946_v39 }
 0xd8f   :  { %v3948_v62 = vmul.f32 %v5587_v61, %v5575_v8 }
 0xd91   :  { %5390 = vmatprep.mubr.msk.f32.mxu0 %vm1477_vm5, %v3948_v62 }
 0xd92   :  { %5391 = vmatmul.mubr.msk.f32.gmra.mxu0 %vm1477_vm5, %v3950_v5 }
 0xe4a   :  { %v5386_v3 = vpop.f32.mrf.mxu0 }
 0xe4b   :  { %4419 = vst.msk [vmem:[%s7015_s2 + $0x158] sm:$0xff] %vm552_vm1, %v5386_v3 }
 0xe4c   :  { %v4035_v0 = vpop.f32.mrf.mxu0 }
 0xe4d   :  { %4418 = vst.msk [vmem:[%s7015_s2 + $0x150] sm:$0xff] %vm552_vm1, %v4035_v0 }
 0xe4e   :  { %v5389_v10 = vpop.f32.mrf.mxu0 }
 0xe4f   :  { %4421 = vst.msk [vmem:[%s7015_s2 + $0x168] sm:$0xff] %vm552_vm1, %v5389_v10 }
 0xe50   :  { %v4045_v42 = vpop.f32.mrf.mxu0 }
 0xe51   :  { %4420 = vst.msk [vmem:[%s7015_s2 + $0x160] sm:$0xff] %vm552_vm1, %v4045_v42 }
 0xe52   :  { %v5392_v4 = vpop.f32.mrf.mxu0 }
 0xe53   :  { %4423 = vst.msk [vmem:[%s7015_s2 + $0x178] sm:$0xff] %vm552_vm1, %v5392_v4 }
 0xe54   :  { %v4055_v44 = vpop.f32.mrf.mxu0 }
 0xe55   :  { %4422 = vst.msk [vmem:[%s7015_s2 + $0x170] sm:$0xff] %vm552_vm1, %v4055_v44 }
 0xe56   :  { %4075 = vsyncpa [#allocation6], 1 }

</bundles_post_ra>
